<compile_context>
chip_gen: v6e
topology: v6e:2x2x1
jax: 0.10.0
libtpu: 0.0.40
codegen_flags: <defaults>
</compile_context>

<pallas_src>
import numpy as np
import jax
import jax.numpy as jnp
from jax.experimental import pallas as pl
from jax.experimental.pallas import tpu as pltpu

C_IN = 2
C_OUT = 64
KH = KW = 3
STRIDE = 2
PAD = 1
POOL = 7
T = POOL * POOL              # 49 pooled positions
KP = C_IN * KH * KW          # 18 im2col taps
LATENT_DIM = 256             # small demo value (module default is 768)
FC_DTYPE = jnp.bfloat16      # FC streaming dtype (accumulation stays f32)


def _encoder_kernel(pat_ref, lp_ref, wct_ref, bc_ref, wfc_ref, bfc_ref, o_ref,
                    pooled_s, flat_s):
    # pat_ref : (Bt, S_IN, KP)   im2col patches for Bt samples
    # lp_ref  : (T, S_IN)        adaptive-avg-pool matrix kron(Ph^T, Pw^T) (rows sum to 1)
    # wct_ref : (KP, C_OUT)      conv weight, transposed
    # bc_ref  : (1, C_OUT)       conv bias
    # wfc_ref : (T*C_OUT, K)     fc weight (rows permuted to t*64+c order), bf16, resident
    # bfc_ref : (1, K)           fc bias
    # o_ref   : (Bt, K)          lane-dense output block
    # pooled_s: (Bt, T, C_OUT)   f32 scratch (pooled feature map)
    # flat_s  : (Bt, T*C_OUT)    bf16 scratch (flattened FC input)
    Bt = pat_ref.shape[0]
    for b in range(Bt):                                    # static unroll (Bt <= 8)
        # Reassociated conv+pool (pool applied to the patches first):
        #   (49, S_IN) @ (S_IN, 18) then (49, 18) @ (18, 64).
        # Adding the conv bias after the pool is exact because every pool row sums to 1.
        red = jnp.dot(lp_ref[...], pat_ref[b], preferred_element_type=jnp.float32)
        pooled_s[b] = (jnp.dot(red, wct_ref[...], preferred_element_type=jnp.float32)
                       + bc_ref[...])

    # Flatten (Bt, 49, 64) -> (Bt, 3136): not a tile-aligned reshape, so scatter the 49
    # 64-lane channel rows into a lane-dense scratch at offset t*64 (t-major / c-minor
    # order, matching the fc-weight row permutation done in the wrapper).
    for t in range(T):
        flat_s[:, pl.ds(t * C_OUT, C_OUT)] = pooled_s[:, t, :].astype(flat_s.dtype)

    # Fused FC against the VMEM-resident bf16 weight; f32 accumulation; (Bt, K) output.
    o_ref[...] = (jnp.dot(flat_s[...], wfc_ref[...], preferred_element_type=jnp.float32)
                  + bfc_ref[...]).astype(o_ref.dtype)


def _adaptive_pool_matrix(in_size, out_size):
    # PyTorch AdaptiveAvgPool semantics: window i = [floor(i*in/out), ceil((i+1)*in/out))
    p = np.zeros((in_size, out_size), dtype=np.float32)
    for i in range(out_size):
        s = (i * in_size) // out_size
        e = -((-(i + 1) * in_size) // out_size)
        p[s:e, i] = 1.0 / (e - s)
    return p


@jax.jit
def optical_flow_encoder(x, w_conv, b_conv, w_fc, b_fc):
    """x: (B,1,2,H,W) f32; w_conv: (64,2,3,3); b_conv: (64,);
       w_fc: (latent, 64*7*7) [PyTorch layout]; b_fc: (latent,)  ->  (B, latent)."""
    B = x.shape[0]
    K = w_fc.shape[0]
    xs = x[:, 0]                                              # .squeeze(1) -> (B, 2, H, W)
    Hh, Ww = xs.shape[2], xs.shape[3]
    OH = (Hh + 2 * PAD - KH) // STRIDE + 1
    OW = (Ww + 2 * PAD - KW) // STRIDE + 1
    S_IN = OH * OW

    # ---------- layout prep (pure data movement / constants; fused under jit) ----------
    # TODO(synk): at realistic flow resolutions move the im2col tap extraction into the
    # kernel (strided pl.ds loads on a padded-input block) to avoid the HBM blow-up, and
    # switch the dense kron pool matrix to separable Ph^T / Pw^T matmuls.
    xp = jnp.pad(xs, ((0, 0), (0, 0), (PAD, PAD), (PAD, PAD)))
    taps = []
    for kh in range(KH):
        for kw in range(KW):
            taps.append(xp[:, :, kh:kh + STRIDE * OH:STRIDE,
                               kw:kw + STRIDE * OW:STRIDE])   # (B, C_IN, OH, OW)
    pat = jnp.stack(taps, axis=-1)                            # (B, C_IN, OH, OW, 9)
    # rows: s = oh*OW + ow ; cols: cin*9 + kh*3 + kw  (matches w_conv flattening)
    pat = pat.transpose(0, 2, 3, 1, 4).reshape(B, S_IN, KP)

    wct = w_conv.reshape(C_OUT, KP).T                         # (18, 64)
    bc2 = b_conv.reshape(1, C_OUT)
    ph = _adaptive_pool_matrix(OH, POOL)                      # (OH, 7)
    pw = _adaptive_pool_matrix(OW, POOL)                      # (OW, 7)
    lpool = jnp.asarray(np.kron(ph.T, pw.T))                  # (49, OH*OW), rows sum to 1
    # fc weight: permute rows from PyTorch flatten order (c*49+t) to kernel order (t*64+c);
    # stream it in bf16 (f32 accumulation in-kernel).
    wfc2 = (w_fc.reshape(K, C_OUT, T).transpose(2, 1, 0)
                 .reshape(T * C_OUT, K).astype(FC_DTYPE))
    bfc2 = b_fc.reshape(1, K)

    # ---------- batch tiling ----------
    if B <= 8:
        Bt, Bp = B, B            # single full-batch block (block == full array dim)
    else:
        Bt = 8                   # 8 samples / grid step; >=2 parallel steps for v7x 2xTC
        Bp = -(-B // Bt) * Bt
    if Bp != B:
        pat = jnp.pad(pat, ((0, Bp - B), (0, 0), (0, 0)))
    nb = Bp // Bt

    y = pl.pallas_call(
        _encoder_kernel,
        out_shape=jax.ShapeDtypeStruct((Bp, K), jnp.float32),
        grid_spec=pltpu.PrefetchScalarGridSpec(
            num_scalar_prefetch=0,
            grid=(nb,),
            in_specs=[
                pl.BlockSpec((Bt, S_IN, KP), lambda b: (b, 0, 0)),
                pl.BlockSpec((T, S_IN), lambda b: (0, 0)),
                pl.BlockSpec((KP, C_OUT), lambda b: (0, 0)),
                pl.BlockSpec((1, C_OUT), lambda b: (0, 0)),
                pl.BlockSpec((T * C_OUT, K), lambda b: (0, 0)),   # resident fc weight
                pl.BlockSpec((1, K), lambda b: (0, 0)),
            ],
            out_specs=pl.BlockSpec((Bt, K), lambda b: (b, 0)),
            scratch_shapes=[pltpu.VMEM((Bt, T, C_OUT), jnp.float32),
                            pltpu.VMEM((Bt, T * C_OUT), FC_DTYPE)],
        ),
        compiler_params=pltpu.CompilerParams(
            dimension_semantics=("parallel",),
            # bf16 resident fc weight + double-buffered pat/out blocks stay well under
            # this on all of v5e / v6e / v7x (v7x physical VMEM is 64 MiB).
            vmem_limit_bytes=32 * 1024 * 1024),
    )(pat, lpool, wct, bc2, wfc2, bfc2)
    return y[:B]


def _reference(x, w_conv, b_conv, w_fc, b_fc):
    xs = x[:, 0]
    conv = jax.lax.conv_general_dilated(
        xs, w_conv, window_strides=(STRIDE, STRIDE),
        padding=((PAD, PAD), (PAD, PAD)),
        dimension_numbers=("NCHW", "OIHW", "NCHW"),
        precision=jax.lax.Precision.HIGHEST)
    conv = conv + b_conv[None, :, None, None]
    Bq, Cq, Hq, Wq = conv.shape
    rows = []
    for i in range(POOL):
        hs, he = (i * Hq) // POOL, -((-(i + 1) * Hq) // POOL)
        cols = []
        for j in range(POOL):
            ws, we = (j * Wq) // POOL, -((-(j + 1) * Wq) // POOL)
            cols.append(conv[:, :, hs:he, ws:we].mean(axis=(2, 3)))
        rows.append(jnp.stack(cols, axis=-1))
    pooled = jnp.stack(rows, axis=-2)                         # (B, C, 7, 7)
    flat = pooled.reshape(Bq, -1)
    return jnp.dot(flat, w_fc.T, precision=jax.lax.Precision.HIGHEST) + b_fc


if __name__ == "__main__":
    key = jax.random.PRNGKey(0)
    k1, k2, k3, k4, k5 = jax.random.split(key, 5)
    B, Hin, Win = 2, 16, 16

    x = jax.random.normal(k1, (B, 1, C_IN, Hin, Win), dtype=jnp.float32)
    w_conv = jax.random.normal(k2, (C_OUT, C_IN, KH, KW), dtype=jnp.float32) * 0.1
    b_conv = jax.random.normal(k3, (C_OUT,), dtype=jnp.float32) * 0.1
    w_fc = jax.random.normal(k4, (LATENT_DIM, C_OUT * T), dtype=jnp.float32) * 0.02
    b_fc = jax.random.normal(k5, (LATENT_DIM,), dtype=jnp.float32) * 0.02

    out = jax.block_until_ready(optical_flow_encoder(x, w_conv, b_conv, w_fc, b_fc))
    assert out.shape == (B, LATENT_DIM), out.shape

    ref = _reference(x, w_conv, b_conv, w_fc, b_fc)
    err = float(jnp.max(jnp.abs(out - ref)))
    assert jnp.allclose(out, ref, atol=2e-2, rtol=2e-2), err

    print("KERNEL_OK")
</pallas_src>

<mosaic_0001>
module attributes {stable_mosaic.version = 11 : i64} {
  func.func @_encoder_kernel(%arg0: i32, %arg1: memref<2x64x18xf32, #tpu.memory_space<vmem>>, %arg2: memref<49x64xf32, #tpu.memory_space<vmem>>, %arg3: memref<18x64xf32, #tpu.memory_space<vmem>>, %arg4: memref<1x64xf32, #tpu.memory_space<vmem>>, %arg5: memref<3136x256xbf16, #tpu.memory_space<vmem>>, %arg6: memref<1x256xf32, #tpu.memory_space<vmem>>, %arg7: memref<2x256xf32, #tpu.memory_space<vmem>>, %arg8: memref<2x49x64xf32, #tpu.memory_space<vmem>>, %arg9: memref<2x3136xbf16, #tpu.memory_space<vmem>>) attributes {dimension_semantics = [#tpu.dimension_semantics<parallel>], iteration_bounds = array<i64: 1>, scalar_prefetch = 0 : i64, scratch_operands = 2 : i64, tpu.core_type = #tpu.core_type<tc>, window_params = [{transform_indices = @transform_0, window_bounds = array<i64: 2, 64, 18>}, {pipeline_mode = #tpu.pipeline_mode<synchronous>, transform_indices = @transform_1, window_bounds = array<i64: 49, 64>}, {pipeline_mode = #tpu.pipeline_mode<synchronous>, transform_indices = @transform_2, window_bounds = array<i64: 18, 64>}, {pipeline_mode = #tpu.pipeline_mode<synchronous>, transform_indices = @transform_3, window_bounds = array<i64: 1, 64>}, {pipeline_mode = #tpu.pipeline_mode<synchronous>, transform_indices = @transform_4, window_bounds = array<i64: 3136, 256>}, {pipeline_mode = #tpu.pipeline_mode<synchronous>, transform_indices = @transform_5, window_bounds = array<i64: 1, 256>}, {transform_indices = @transform_6, window_bounds = array<i64: 2, 256>}]} {
    %c0 = arith.constant 0 : index
    %c0_0 = arith.constant 0 : index
    %0 = vector.load %arg2[%c0, %c0_0] : memref<49x64xf32, #tpu.memory_space<vmem>>, vector<49x64xf32>
    %c0_1 = arith.constant 0 : index
    %c0_2 = arith.constant 0 : index
    %c0_3 = arith.constant 0 : index
    %1 = vector.load %arg1[%c0_1, %c0_2, %c0_3] : memref<2x64x18xf32, #tpu.memory_space<vmem>>, vector<1x64x18xf32>
    %2 = vector.shape_cast %1 : vector<1x64x18xf32> to vector<64x18xf32>
    %cst = arith.constant dense<0.000000e+00> : vector<49x18xf32>
    %3 = tpu.matmul %0, %2, %cst {dimension_numbers = #tpu.dot_dimension_numbers<[1], [0], [0], [1], [0, 0, 1, 1], [], []>} : vector<49x64xf32>, vector<64x18xf32>, vector<49x18xf32> -> vector<49x18xf32>
    %c0_4 = arith.constant 0 : index
    %c0_5 = arith.constant 0 : index
    %4 = vector.load %arg3[%c0_4, %c0_5] : memref<18x64xf32, #tpu.memory_space<vmem>>, vector<18x64xf32>
    %cst_6 = arith.constant dense<0.000000e+00> : vector<49x64xf32>
    %5 = tpu.matmul %3, %4, %cst_6 {dimension_numbers = #tpu.dot_dimension_numbers<[1], [0], [0], [1], [0, 0, 1, 1], [], []>} : vector<49x18xf32>, vector<18x64xf32>, vector<49x64xf32> -> vector<49x64xf32>
    %c0_7 = arith.constant 0 : index
    %c0_8 = arith.constant 0 : index
    %6 = vector.load %arg4[%c0_7, %c0_8] : memref<1x64xf32, #tpu.memory_space<vmem>>, vector<1x64xf32>
    %7 = vector.broadcast %6 : vector<1x64xf32> to vector<49x64xf32>
    %8 = arith.addf %5, %7 : vector<49x64xf32>
    %c0_9 = arith.constant 0 : index
    %c0_10 = arith.constant 0 : index
    %c0_11 = arith.constant 0 : index
    %9 = vector.load %arg8[%c0_9, %c0_10, %c0_11] : memref<2x49x64xf32, #tpu.memory_space<vmem>>, vector<1x49x64xf32>
    %10 = vector.shape_cast %9 : vector<1x49x64xf32> to vector<49x64xf32>
    %11 = vector.shape_cast %8 : vector<49x64xf32> to vector<1x49x64xf32>
    tpu.vector_store %arg8[%c0_9, %c0_10, %c0_11], %11 {strides = array<i32>} : memref<2x49x64xf32, #tpu.memory_space<vmem>>, vector<1x49x64xf32>,
    %c0_12 = arith.constant 0 : index
    %c0_13 = arith.constant 0 : index
    %12 = vector.load %arg2[%c0_12, %c0_13] : memref<49x64xf32, #tpu.memory_space<vmem>>, vector<49x64xf32>
    %c1 = arith.constant 1 : index
    %c0_14 = arith.constant 0 : index
    %c0_15 = arith.constant 0 : index
    %13 = vector.load %arg1[%c1, %c0_14, %c0_15] : memref<2x64x18xf32, #tpu.memory_space<vmem>>, vector<1x64x18xf32>
    %14 = vector.shape_cast %13 : vector<1x64x18xf32> to vector<64x18xf32>
    %cst_16 = arith.constant dense<0.000000e+00> : vector<49x18xf32>
    %15 = tpu.matmul %12, %14, %cst_16 {dimension_numbers = #tpu.dot_dimension_numbers<[1], [0], [0], [1], [0, 0, 1, 1], [], []>} : vector<49x64xf32>, vector<64x18xf32>, vector<49x18xf32> -> vector<49x18xf32>
    %c0_17 = arith.constant 0 : index
    %c0_18 = arith.constant 0 : index
    %16 = vector.load %arg3[%c0_17, %c0_18] : memref<18x64xf32, #tpu.memory_space<vmem>>, vector<18x64xf32>
    %cst_19 = arith.constant dense<0.000000e+00> : vector<49x64xf32>
    %17 = tpu.matmul %15, %16, %cst_19 {dimension_numbers = #tpu.dot_dimension_numbers<[1], [0], [0], [1], [0, 0, 1, 1], [], []>} : vector<49x18xf32>, vector<18x64xf32>, vector<49x64xf32> -> vector<49x64xf32>
    %c0_20 = arith.constant 0 : index
    %c0_21 = arith.constant 0 : index
    %18 = vector.load %arg4[%c0_20, %c0_21] : memref<1x64xf32, #tpu.memory_space<vmem>>, vector<1x64xf32>
    %19 = vector.broadcast %18 : vector<1x64xf32> to vector<49x64xf32>
    %20 = arith.addf %17, %19 : vector<49x64xf32>
    %c1_22 = arith.constant 1 : index
    %c0_23 = arith.constant 0 : index
    %c0_24 = arith.constant 0 : index
    %21 = vector.load %arg8[%c1_22, %c0_23, %c0_24] : memref<2x49x64xf32, #tpu.memory_space<vmem>>, vector<1x49x64xf32>
    %22 = vector.shape_cast %21 : vector<1x49x64xf32> to vector<49x64xf32>
    %23 = vector.shape_cast %20 : vector<49x64xf32> to vector<1x49x64xf32>
    tpu.vector_store %arg8[%c1_22, %c0_23, %c0_24], %23 {strides = array<i32>} : memref<2x49x64xf32, #tpu.memory_space<vmem>>, vector<1x49x64xf32>,
    %c0_25 = arith.constant 0 : index
    %c0_26 = arith.constant 0 : index
    %c0_27 = arith.constant 0 : index
    %24 = vector.load %arg8[%c0_25, %c0_26, %c0_27] : memref<2x49x64xf32, #tpu.memory_space<vmem>>, vector<2x1x64xf32>
    %25 = vector.shape_cast %24 : vector<2x1x64xf32> to vector<2x64xf32>
    %26 = arith.truncf %25 : vector<2x64xf32> to vector<2x64xbf16>
    %c0_28 = arith.constant 0 : index
    %c0_29 = arith.constant 0 : index
    %27 = vector.load %arg9[%c0_28, %c0_29] : memref<2x3136xbf16, #tpu.memory_space<vmem>>, vector<2x64xbf16>
    tpu.vector_store %arg9[%c0_28, %c0_29], %26 {strides = array<i32>} : memref<2x3136xbf16, #tpu.memory_space<vmem>>, vector<2x64xbf16>,
    %c0_30 = arith.constant 0 : index
    %c1_31 = arith.constant 1 : index
    %c0_32 = arith.constant 0 : index
    %28 = vector.load %arg8[%c0_30, %c1_31, %c0_32] : memref<2x49x64xf32, #tpu.memory_space<vmem>>, vector<2x1x64xf32>
    %29 = vector.shape_cast %28 : vector<2x1x64xf32> to vector<2x64xf32>
    %30 = arith.truncf %29 : vector<2x64xf32> to vector<2x64xbf16>
    %c0_33 = arith.constant 0 : index
    %c64 = arith.constant 64 : index
    %31 = vector.load %arg9[%c0_33, %c64] : memref<2x3136xbf16, #tpu.memory_space<vmem>>, vector<2x64xbf16>
    tpu.vector_store %arg9[%c0_33, %c64], %30 {strides = array<i32>} : memref<2x3136xbf16, #tpu.memory_space<vmem>>, vector<2x64xbf16>,
    %c0_34 = arith.constant 0 : index
    %c2 = arith.constant 2 : index
    %c0_35 = arith.constant 0 : index
    %32 = vector.load %arg8[%c0_34, %c2, %c0_35] : memref<2x49x64xf32, #tpu.memory_space<vmem>>, vector<2x1x64xf32>
    %33 = vector.shape_cast %32 : vector<2x1x64xf32> to vector<2x64xf32>
    %34 = arith.truncf %33 : vector<2x64xf32> to vector<2x64xbf16>
    %c0_36 = arith.constant 0 : index
    %c128 = arith.constant 128 : index
    %35 = vector.load %arg9[%c0_36, %c128] : memref<2x3136xbf16, #tpu.memory_space<vmem>>, vector<2x64xbf16>
    tpu.vector_store %arg9[%c0_36, %c128], %34 {strides = array<i32>} : memref<2x3136xbf16, #tpu.memory_space<vmem>>, vector<2x64xbf16>,
    %c0_37 = arith.constant 0 : index
    %c3 = arith.constant 3 : index
    %c0_38 = arith.constant 0 : index
    %36 = vector.load %arg8[%c0_37, %c3, %c0_38] : memref<2x49x64xf32, #tpu.memory_space<vmem>>, vector<2x1x64xf32>
    %37 = vector.shape_cast %36 : vector<2x1x64xf32> to vector<2x64xf32>
    %38 = arith.truncf %37 : vector<2x64xf32> to vector<2x64xbf16>
    %c0_39 = arith.constant 0 : index
    %c192 = arith.constant 192 : index
    %39 = vector.load %arg9[%c0_39, %c192] : memref<2x3136xbf16, #tpu.memory_space<vmem>>, vector<2x64xbf16>
    tpu.vector_store %arg9[%c0_39, %c192], %38 {strides = array<i32>} : memref<2x3136xbf16, #tpu.memory_space<vmem>>, vector<2x64xbf16>,
    %c0_40 = arith.constant 0 : index
    %c4 = arith.constant 4 : index
    %c0_41 = arith.constant 0 : index
    %40 = vector.load %arg8[%c0_40, %c4, %c0_41] : memref<2x49x64xf32, #tpu.memory_space<vmem>>, vector<2x1x64xf32>
    %41 = vector.shape_cast %40 : vector<2x1x64xf32> to vector<2x64xf32>
    %42 = arith.truncf %41 : vector<2x64xf32> to vector<2x64xbf16>
    %c0_42 = arith.constant 0 : index
    %c256 = arith.constant 256 : index
    %43 = vector.load %arg9[%c0_42, %c256] : memref<2x3136xbf16, #tpu.memory_space<vmem>>, vector<2x64xbf16>
    tpu.vector_store %arg9[%c0_42, %c256], %42 {strides = array<i32>} : memref<2x3136xbf16, #tpu.memory_space<vmem>>, vector<2x64xbf16>,
    %c0_43 = arith.constant 0 : index
    %c5 = arith.constant 5 : index
    %c0_44 = arith.constant 0 : index
    %44 = vector.load %arg8[%c0_43, %c5, %c0_44] : memref<2x49x64xf32, #tpu.memory_space<vmem>>, vector<2x1x64xf32>
    %45 = vector.shape_cast %44 : vector<2x1x64xf32> to vector<2x64xf32>
    %46 = arith.truncf %45 : vector<2x64xf32> to vector<2x64xbf16>
    %c0_45 = arith.constant 0 : index
    %c320 = arith.constant 320 : index
    %47 = vector.load %arg9[%c0_45, %c320] : memref<2x3136xbf16, #tpu.memory_space<vmem>>, vector<2x64xbf16>
    tpu.vector_store %arg9[%c0_45, %c320], %46 {strides = array<i32>} : memref<2x3136xbf16, #tpu.memory_space<vmem>>, vector<2x64xbf16>,
    %c0_46 = arith.constant 0 : index
    %c6 = arith.constant 6 : index
    %c0_47 = arith.constant 0 : index
    %48 = vector.load %arg8[%c0_46, %c6, %c0_47] : memref<2x49x64xf32, #tpu.memory_space<vmem>>, vector<2x1x64xf32>
    %49 = vector.shape_cast %48 : vector<2x1x64xf32> to vector<2x64xf32>
    %50 = arith.truncf %49 : vector<2x64xf32> to vector<2x64xbf16>
    %c0_48 = arith.constant 0 : index
    %c384 = arith.constant 384 : index
    %51 = vector.load %arg9[%c0_48, %c384] : memref<2x3136xbf16, #tpu.memory_space<vmem>>, vector<2x64xbf16>
    tpu.vector_store %arg9[%c0_48, %c384], %50 {strides = array<i32>} : memref<2x3136xbf16, #tpu.memory_space<vmem>>, vector<2x64xbf16>,
    %c0_49 = arith.constant 0 : index
    %c7 = arith.constant 7 : index
    %c0_50 = arith.constant 0 : index
    %52 = vector.load %arg8[%c0_49, %c7, %c0_50] : memref<2x49x64xf32, #tpu.memory_space<vmem>>, vector<2x1x64xf32>
    %53 = vector.shape_cast %52 : vector<2x1x64xf32> to vector<2x64xf32>
    %54 = arith.truncf %53 : vector<2x64xf32> to vector<2x64xbf16>
    %c0_51 = arith.constant 0 : index
    %c448 = arith.constant 448 : index
    %55 = vector.load %arg9[%c0_51, %c448] : memref<2x3136xbf16, #tpu.memory_space<vmem>>, vector<2x64xbf16>
    tpu.vector_store %arg9[%c0_51, %c448], %54 {strides = array<i32>} : memref<2x3136xbf16, #tpu.memory_space<vmem>>, vector<2x64xbf16>,
    %c0_52 = arith.constant 0 : index
    %c8 = arith.constant 8 : index
    %c0_53 = arith.constant 0 : index
    %56 = vector.load %arg8[%c0_52, %c8, %c0_53] : memref<2x49x64xf32, #tpu.memory_space<vmem>>, vector<2x1x64xf32>
    %57 = vector.shape_cast %56 : vector<2x1x64xf32> to vector<2x64xf32>
    %58 = arith.truncf %57 : vector<2x64xf32> to vector<2x64xbf16>
    %c0_54 = arith.constant 0 : index
    %c512 = arith.constant 512 : index
    %59 = vector.load %arg9[%c0_54, %c512] : memref<2x3136xbf16, #tpu.memory_space<vmem>>, vector<2x64xbf16>
    tpu.vector_store %arg9[%c0_54, %c512], %58 {strides = array<i32>} : memref<2x3136xbf16, #tpu.memory_space<vmem>>, vector<2x64xbf16>,
    %c0_55 = arith.constant 0 : index
    %c9 = arith.constant 9 : index
    %c0_56 = arith.constant 0 : index
    %60 = vector.load %arg8[%c0_55, %c9, %c0_56] : memref<2x49x64xf32, #tpu.memory_space<vmem>>, vector<2x1x64xf32>
    %61 = vector.shape_cast %60 : vector<2x1x64xf32> to vector<2x64xf32>
    %62 = arith.truncf %61 : vector<2x64xf32> to vector<2x64xbf16>
    %c0_57 = arith.constant 0 : index
    %c576 = arith.constant 576 : index
    %63 = vector.load %arg9[%c0_57, %c576] : memref<2x3136xbf16, #tpu.memory_space<vmem>>, vector<2x64xbf16>
    tpu.vector_store %arg9[%c0_57, %c576], %62 {strides = array<i32>} : memref<2x3136xbf16, #tpu.memory_space<vmem>>, vector<2x64xbf16>,
    %c0_58 = arith.constant 0 : index
    %c10 = arith.constant 10 : index
    %c0_59 = arith.constant 0 : index
    %64 = vector.load %arg8[%c0_58, %c10, %c0_59] : memref<2x49x64xf32, #tpu.memory_space<vmem>>, vector<2x1x64xf32>
    %65 = vector.shape_cast %64 : vector<2x1x64xf32> to vector<2x64xf32>
    %66 = arith.truncf %65 : vector<2x64xf32> to vector<2x64xbf16>
    %c0_60 = arith.constant 0 : index
    %c640 = arith.constant 640 : index
    %67 = vector.load %arg9[%c0_60, %c640] : memref<2x3136xbf16, #tpu.memory_space<vmem>>, vector<2x64xbf16>
    tpu.vector_store %arg9[%c0_60, %c640], %66 {strides = array<i32>} : memref<2x3136xbf16, #tpu.memory_space<vmem>>, vector<2x64xbf16>,
    %c0_61 = arith.constant 0 : index
    %c11 = arith.constant 11 : index
    %c0_62 = arith.constant 0 : index
    %68 = vector.load %arg8[%c0_61, %c11, %c0_62] : memref<2x49x64xf32, #tpu.memory_space<vmem>>, vector<2x1x64xf32>
    %69 = vector.shape_cast %68 : vector<2x1x64xf32> to vector<2x64xf32>
    %70 = arith.truncf %69 : vector<2x64xf32> to vector<2x64xbf16>
    %c0_63 = arith.constant 0 : index
    %c704 = arith.constant 704 : index
    %71 = vector.load %arg9[%c0_63, %c704] : memref<2x3136xbf16, #tpu.memory_space<vmem>>, vector<2x64xbf16>
    tpu.vector_store %arg9[%c0_63, %c704], %70 {strides = array<i32>} : memref<2x3136xbf16, #tpu.memory_space<vmem>>, vector<2x64xbf16>,
    %c0_64 = arith.constant 0 : index
    %c12 = arith.constant 12 : index
    %c0_65 = arith.constant 0 : index
    %72 = vector.load %arg8[%c0_64, %c12, %c0_65] : memref<2x49x64xf32, #tpu.memory_space<vmem>>, vector<2x1x64xf32>
    %73 = vector.shape_cast %72 : vector<2x1x64xf32> to vector<2x64xf32>
    %74 = arith.truncf %73 : vector<2x64xf32> to vector<2x64xbf16>
    %c0_66 = arith.constant 0 : index
    %c768 = arith.constant 768 : index
    %75 = vector.load %arg9[%c0_66, %c768] : memref<2x3136xbf16, #tpu.memory_space<vmem>>, vector<2x64xbf16>
    tpu.vector_store %arg9[%c0_66, %c768], %74 {strides = array<i32>} : memref<2x3136xbf16, #tpu.memory_space<vmem>>, vector<2x64xbf16>,
    %c0_67 = arith.constant 0 : index
    %c13 = arith.constant 13 : index
    %c0_68 = arith.constant 0 : index
    %76 = vector.load %arg8[%c0_67, %c13, %c0_68] : memref<2x49x64xf32, #tpu.memory_space<vmem>>, vector<2x1x64xf32>
    %77 = vector.shape_cast %76 : vector<2x1x64xf32> to vector<2x64xf32>
    %78 = arith.truncf %77 : vector<2x64xf32> to vector<2x64xbf16>
    %c0_69 = arith.constant 0 : index
    %c832 = arith.constant 832 : index
    %79 = vector.load %arg9[%c0_69, %c832] : memref<2x3136xbf16, #tpu.memory_space<vmem>>, vector<2x64xbf16>
    tpu.vector_store %arg9[%c0_69, %c832], %78 {strides = array<i32>} : memref<2x3136xbf16, #tpu.memory_space<vmem>>, vector<2x64xbf16>,
    %c0_70 = arith.constant 0 : index
    %c14 = arith.constant 14 : index
    %c0_71 = arith.constant 0 : index
    %80 = vector.load %arg8[%c0_70, %c14, %c0_71] : memref<2x49x64xf32, #tpu.memory_space<vmem>>, vector<2x1x64xf32>
    %81 = vector.shape_cast %80 : vector<2x1x64xf32> to vector<2x64xf32>
    %82 = arith.truncf %81 : vector<2x64xf32> to vector<2x64xbf16>
    %c0_72 = arith.constant 0 : index
    %c896 = arith.constant 896 : index
    %83 = vector.load %arg9[%c0_72, %c896] : memref<2x3136xbf16, #tpu.memory_space<vmem>>, vector<2x64xbf16>
    tpu.vector_store %arg9[%c0_72, %c896], %82 {strides = array<i32>} : memref<2x3136xbf16, #tpu.memory_space<vmem>>, vector<2x64xbf16>,
    %c0_73 = arith.constant 0 : index
    %c15 = arith.constant 15 : index
    %c0_74 = arith.constant 0 : index
    %84 = vector.load %arg8[%c0_73, %c15, %c0_74] : memref<2x49x64xf32, #tpu.memory_space<vmem>>, vector<2x1x64xf32>
    %85 = vector.shape_cast %84 : vector<2x1x64xf32> to vector<2x64xf32>
    %86 = arith.truncf %85 : vector<2x64xf32> to vector<2x64xbf16>
    %c0_75 = arith.constant 0 : index
    %c960 = arith.constant 960 : index
    %87 = vector.load %arg9[%c0_75, %c960] : memref<2x3136xbf16, #tpu.memory_space<vmem>>, vector<2x64xbf16>
    tpu.vector_store %arg9[%c0_75, %c960], %86 {strides = array<i32>} : memref<2x3136xbf16, #tpu.memory_space<vmem>>, vector<2x64xbf16>,
    %c0_76 = arith.constant 0 : index
    %c16 = arith.constant 16 : index
    %c0_77 = arith.constant 0 : index
    %88 = vector.load %arg8[%c0_76, %c16, %c0_77] : memref<2x49x64xf32, #tpu.memory_space<vmem>>, vector<2x1x64xf32>
    %89 = vector.shape_cast %88 : vector<2x1x64xf32> to vector<2x64xf32>
    %90 = arith.truncf %89 : vector<2x64xf32> to vector<2x64xbf16>
    %c0_78 = arith.constant 0 : index
    %c1024 = arith.constant 1024 : index
    %91 = vector.load %arg9[%c0_78, %c1024] : memref<2x3136xbf16, #tpu.memory_space<vmem>>, vector<2x64xbf16>
    tpu.vector_store %arg9[%c0_78, %c1024], %90 {strides = array<i32>} : memref<2x3136xbf16, #tpu.memory_space<vmem>>, vector<2x64xbf16>,
    %c0_79 = arith.constant 0 : index
    %c17 = arith.constant 17 : index
    %c0_80 = arith.constant 0 : index
    %92 = vector.load %arg8[%c0_79, %c17, %c0_80] : memref<2x49x64xf32, #tpu.memory_space<vmem>>, vector<2x1x64xf32>
    %93 = vector.shape_cast %92 : vector<2x1x64xf32> to vector<2x64xf32>
    %94 = arith.truncf %93 : vector<2x64xf32> to vector<2x64xbf16>
    %c0_81 = arith.constant 0 : index
    %c1088 = arith.constant 1088 : index
    %95 = vector.load %arg9[%c0_81, %c1088] : memref<2x3136xbf16, #tpu.memory_space<vmem>>, vector<2x64xbf16>
    tpu.vector_store %arg9[%c0_81, %c1088], %94 {strides = array<i32>} : memref<2x3136xbf16, #tpu.memory_space<vmem>>, vector<2x64xbf16>,
    %c0_82 = arith.constant 0 : index
    %c18 = arith.constant 18 : index
    %c0_83 = arith.constant 0 : index
    %96 = vector.load %arg8[%c0_82, %c18, %c0_83] : memref<2x49x64xf32, #tpu.memory_space<vmem>>, vector<2x1x64xf32>
    %97 = vector.shape_cast %96 : vector<2x1x64xf32> to vector<2x64xf32>
    %98 = arith.truncf %97 : vector<2x64xf32> to vector<2x64xbf16>
    %c0_84 = arith.constant 0 : index
    %c1152 = arith.constant 1152 : index
    %99 = vector.load %arg9[%c0_84, %c1152] : memref<2x3136xbf16, #tpu.memory_space<vmem>>, vector<2x64xbf16>
    tpu.vector_store %arg9[%c0_84, %c1152], %98 {strides = array<i32>} : memref<2x3136xbf16, #tpu.memory_space<vmem>>, vector<2x64xbf16>,
    %c0_85 = arith.constant 0 : index
    %c19 = arith.constant 19 : index
    %c0_86 = arith.constant 0 : index
    %100 = vector.load %arg8[%c0_85, %c19, %c0_86] : memref<2x49x64xf32, #tpu.memory_space<vmem>>, vector<2x1x64xf32>
    %101 = vector.shape_cast %100 : vector<2x1x64xf32> to vector<2x64xf32>
    %102 = arith.truncf %101 : vector<2x64xf32> to vector<2x64xbf16>
    %c0_87 = arith.constant 0 : index
    %c1216 = arith.constant 1216 : index
    %103 = vector.load %arg9[%c0_87, %c1216] : memref<2x3136xbf16, #tpu.memory_space<vmem>>, vector<2x64xbf16>
    tpu.vector_store %arg9[%c0_87, %c1216], %102 {strides = array<i32>} : memref<2x3136xbf16, #tpu.memory_space<vmem>>, vector<2x64xbf16>,
    %c0_88 = arith.constant 0 : index
    %c20 = arith.constant 20 : index
    %c0_89 = arith.constant 0 : index
    %104 = vector.load %arg8[%c0_88, %c20, %c0_89] : memref<2x49x64xf32, #tpu.memory_space<vmem>>, vector<2x1x64xf32>
    %105 = vector.shape_cast %104 : vector<2x1x64xf32> to vector<2x64xf32>
    %106 = arith.truncf %105 : vector<2x64xf32> to vector<2x64xbf16>
    %c0_90 = arith.constant 0 : index
    %c1280 = arith.constant 1280 : index
    %107 = vector.load %arg9[%c0_90, %c1280] : memref<2x3136xbf16, #tpu.memory_space<vmem>>, vector<2x64xbf16>
    tpu.vector_store %arg9[%c0_90, %c1280], %106 {strides = array<i32>} : memref<2x3136xbf16, #tpu.memory_space<vmem>>, vector<2x64xbf16>,
    %c0_91 = arith.constant 0 : index
    %c21 = arith.constant 21 : index
    %c0_92 = arith.constant 0 : index
    %108 = vector.load %arg8[%c0_91, %c21, %c0_92] : memref<2x49x64xf32, #tpu.memory_space<vmem>>, vector<2x1x64xf32>
    %109 = vector.shape_cast %108 : vector<2x1x64xf32> to vector<2x64xf32>
    %110 = arith.truncf %109 : vector<2x64xf32> to vector<2x64xbf16>
    %c0_93 = arith.constant 0 : index
    %c1344 = arith.constant 1344 : index
    %111 = vector.load %arg9[%c0_93, %c1344] : memref<2x3136xbf16, #tpu.memory_space<vmem>>, vector<2x64xbf16>
    tpu.vector_store %arg9[%c0_93, %c1344], %110 {strides = array<i32>} : memref<2x3136xbf16, #tpu.memory_space<vmem>>, vector<2x64xbf16>,
    %c0_94 = arith.constant 0 : index
    %c22 = arith.constant 22 : index
    %c0_95 = arith.constant 0 : index
    %112 = vector.load %arg8[%c0_94, %c22, %c0_95] : memref<2x49x64xf32, #tpu.memory_space<vmem>>, vector<2x1x64xf32>
    %113 = vector.shape_cast %112 : vector<2x1x64xf32> to vector<2x64xf32>
    %114 = arith.truncf %113 : vector<2x64xf32> to vector<2x64xbf16>
    %c0_96 = arith.constant 0 : index
    %c1408 = arith.constant 1408 : index
    %115 = vector.load %arg9[%c0_96, %c1408] : memref<2x3136xbf16, #tpu.memory_space<vmem>>, vector<2x64xbf16>
    tpu.vector_store %arg9[%c0_96, %c1408], %114 {strides = array<i32>} : memref<2x3136xbf16, #tpu.memory_space<vmem>>, vector<2x64xbf16>,
    %c0_97 = arith.constant 0 : index
    %c23 = arith.constant 23 : index
    %c0_98 = arith.constant 0 : index
    %116 = vector.load %arg8[%c0_97, %c23, %c0_98] : memref<2x49x64xf32, #tpu.memory_space<vmem>>, vector<2x1x64xf32>
    %117 = vector.shape_cast %116 : vector<2x1x64xf32> to vector<2x64xf32>
    %118 = arith.truncf %117 : vector<2x64xf32> to vector<2x64xbf16>
    %c0_99 = arith.constant 0 : index
    %c1472 = arith.constant 1472 : index
    %119 = vector.load %arg9[%c0_99, %c1472] : memref<2x3136xbf16, #tpu.memory_space<vmem>>, vector<2x64xbf16>
    tpu.vector_store %arg9[%c0_99, %c1472], %118 {strides = array<i32>} : memref<2x3136xbf16, #tpu.memory_space<vmem>>, vector<2x64xbf16>,
    %c0_100 = arith.constant 0 : index
    %c24 = arith.constant 24 : index
    %c0_101 = arith.constant 0 : index
    %120 = vector.load %arg8[%c0_100, %c24, %c0_101] : memref<2x49x64xf32, #tpu.memory_space<vmem>>, vector<2x1x64xf32>
    %121 = vector.shape_cast %120 : vector<2x1x64xf32> to vector<2x64xf32>
    %122 = arith.truncf %121 : vector<2x64xf32> to vector<2x64xbf16>
    %c0_102 = arith.constant 0 : index
    %c1536 = arith.constant 1536 : index
    %123 = vector.load %arg9[%c0_102, %c1536] : memref<2x3136xbf16, #tpu.memory_space<vmem>>, vector<2x64xbf16>
    tpu.vector_store %arg9[%c0_102, %c1536], %122 {strides = array<i32>} : memref<2x3136xbf16, #tpu.memory_space<vmem>>, vector<2x64xbf16>,
    %c0_103 = arith.constant 0 : index
    %c25 = arith.constant 25 : index
    %c0_104 = arith.constant 0 : index
    %124 = vector.load %arg8[%c0_103, %c25, %c0_104] : memref<2x49x64xf32, #tpu.memory_space<vmem>>, vector<2x1x64xf32>
    %125 = vector.shape_cast %124 : vector<2x1x64xf32> to vector<2x64xf32>
    %126 = arith.truncf %125 : vector<2x64xf32> to vector<2x64xbf16>
    %c0_105 = arith.constant 0 : index
    %c1600 = arith.constant 1600 : index
    %127 = vector.load %arg9[%c0_105, %c1600] : memref<2x3136xbf16, #tpu.memory_space<vmem>>, vector<2x64xbf16>
    tpu.vector_store %arg9[%c0_105, %c1600], %126 {strides = array<i32>} : memref<2x3136xbf16, #tpu.memory_space<vmem>>, vector<2x64xbf16>,
    %c0_106 = arith.constant 0 : index
    %c26 = arith.constant 26 : index
    %c0_107 = arith.constant 0 : index
    %128 = vector.load %arg8[%c0_106, %c26, %c0_107] : memref<2x49x64xf32, #tpu.memory_space<vmem>>, vector<2x1x64xf32>
    %129 = vector.shape_cast %128 : vector<2x1x64xf32> to vector<2x64xf32>
    %130 = arith.truncf %129 : vector<2x64xf32> to vector<2x64xbf16>
    %c0_108 = arith.constant 0 : index
    %c1664 = arith.constant 1664 : index
    %131 = vector.load %arg9[%c0_108, %c1664] : memref<2x3136xbf16, #tpu.memory_space<vmem>>, vector<2x64xbf16>
    tpu.vector_store %arg9[%c0_108, %c1664], %130 {strides = array<i32>} : memref<2x3136xbf16, #tpu.memory_space<vmem>>, vector<2x64xbf16>,
    %c0_109 = arith.constant 0 : index
    %c27 = arith.constant 27 : index
    %c0_110 = arith.constant 0 : index
    %132 = vector.load %arg8[%c0_109, %c27, %c0_110] : memref<2x49x64xf32, #tpu.memory_space<vmem>>, vector<2x1x64xf32>
    %133 = vector.shape_cast %132 : vector<2x1x64xf32> to vector<2x64xf32>
    %134 = arith.truncf %133 : vector<2x64xf32> to vector<2x64xbf16>
    %c0_111 = arith.constant 0 : index
    %c1728 = arith.constant 1728 : index
    %135 = vector.load %arg9[%c0_111, %c1728] : memref<2x3136xbf16, #tpu.memory_space<vmem>>, vector<2x64xbf16>
    tpu.vector_store %arg9[%c0_111, %c1728], %134 {strides = array<i32>} : memref<2x3136xbf16, #tpu.memory_space<vmem>>, vector<2x64xbf16>,
    %c0_112 = arith.constant 0 : index
    %c28 = arith.constant 28 : index
    %c0_113 = arith.constant 0 : index
    %136 = vector.load %arg8[%c0_112, %c28, %c0_113] : memref<2x49x64xf32, #tpu.memory_space<vmem>>, vector<2x1x64xf32>
    %137 = vector.shape_cast %136 : vector<2x1x64xf32> to vector<2x64xf32>
    %138 = arith.truncf %137 : vector<2x64xf32> to vector<2x64xbf16>
    %c0_114 = arith.constant 0 : index
    %c1792 = arith.constant 1792 : index
    %139 = vector.load %arg9[%c0_114, %c1792] : memref<2x3136xbf16, #tpu.memory_space<vmem>>, vector<2x64xbf16>
    tpu.vector_store %arg9[%c0_114, %c1792], %138 {strides = array<i32>} : memref<2x3136xbf16, #tpu.memory_space<vmem>>, vector<2x64xbf16>,
    %c0_115 = arith.constant 0 : index
    %c29 = arith.constant 29 : index
    %c0_116 = arith.constant 0 : index
    %140 = vector.load %arg8[%c0_115, %c29, %c0_116] : memref<2x49x64xf32, #tpu.memory_space<vmem>>, vector<2x1x64xf32>
    %141 = vector.shape_cast %140 : vector<2x1x64xf32> to vector<2x64xf32>
    %142 = arith.truncf %141 : vector<2x64xf32> to vector<2x64xbf16>
    %c0_117 = arith.constant 0 : index
    %c1856 = arith.constant 1856 : index
    %143 = vector.load %arg9[%c0_117, %c1856] : memref<2x3136xbf16, #tpu.memory_space<vmem>>, vector<2x64xbf16>
    tpu.vector_store %arg9[%c0_117, %c1856], %142 {strides = array<i32>} : memref<2x3136xbf16, #tpu.memory_space<vmem>>, vector<2x64xbf16>,
    %c0_118 = arith.constant 0 : index
    %c30 = arith.constant 30 : index
    %c0_119 = arith.constant 0 : index
    %144 = vector.load %arg8[%c0_118, %c30, %c0_119] : memref<2x49x64xf32, #tpu.memory_space<vmem>>, vector<2x1x64xf32>
    %145 = vector.shape_cast %144 : vector<2x1x64xf32> to vector<2x64xf32>
    %146 = arith.truncf %145 : vector<2x64xf32> to vector<2x64xbf16>
    %c0_120 = arith.constant 0 : index
    %c1920 = arith.constant 1920 : index
    %147 = vector.load %arg9[%c0_120, %c1920] : memref<2x3136xbf16, #tpu.memory_space<vmem>>, vector<2x64xbf16>
    tpu.vector_store %arg9[%c0_120, %c1920], %146 {strides = array<i32>} : memref<2x3136xbf16, #tpu.memory_space<vmem>>, vector<2x64xbf16>,
    %c0_121 = arith.constant 0 : index
    %c31 = arith.constant 31 : index
    %c0_122 = arith.constant 0 : index
    %148 = vector.load %arg8[%c0_121, %c31, %c0_122] : memref<2x49x64xf32, #tpu.memory_space<vmem>>, vector<2x1x64xf32>
    %149 = vector.shape_cast %148 : vector<2x1x64xf32> to vector<2x64xf32>
    %150 = arith.truncf %149 : vector<2x64xf32> to vector<2x64xbf16>
    %c0_123 = arith.constant 0 : index
    %c1984 = arith.constant 1984 : index
    %151 = vector.load %arg9[%c0_123, %c1984] : memref<2x3136xbf16, #tpu.memory_space<vmem>>, vector<2x64xbf16>
    tpu.vector_store %arg9[%c0_123, %c1984], %150 {strides = array<i32>} : memref<2x3136xbf16, #tpu.memory_space<vmem>>, vector<2x64xbf16>,
    %c0_124 = arith.constant 0 : index
    %c32 = arith.constant 32 : index
    %c0_125 = arith.constant 0 : index
    %152 = vector.load %arg8[%c0_124, %c32, %c0_125] : memref<2x49x64xf32, #tpu.memory_space<vmem>>, vector<2x1x64xf32>
    %153 = vector.shape_cast %152 : vector<2x1x64xf32> to vector<2x64xf32>
    %154 = arith.truncf %153 : vector<2x64xf32> to vector<2x64xbf16>
    %c0_126 = arith.constant 0 : index
    %c2048 = arith.constant 2048 : index
    %155 = vector.load %arg9[%c0_126, %c2048] : memref<2x3136xbf16, #tpu.memory_space<vmem>>, vector<2x64xbf16>
    tpu.vector_store %arg9[%c0_126, %c2048], %154 {strides = array<i32>} : memref<2x3136xbf16, #tpu.memory_space<vmem>>, vector<2x64xbf16>,
    %c0_127 = arith.constant 0 : index
    %c33 = arith.constant 33 : index
    %c0_128 = arith.constant 0 : index
    %156 = vector.load %arg8[%c0_127, %c33, %c0_128] : memref<2x49x64xf32, #tpu.memory_space<vmem>>, vector<2x1x64xf32>
    %157 = vector.shape_cast %156 : vector<2x1x64xf32> to vector<2x64xf32>
    %158 = arith.truncf %157 : vector<2x64xf32> to vector<2x64xbf16>
    %c0_129 = arith.constant 0 : index
    %c2112 = arith.constant 2112 : index
    %159 = vector.load %arg9[%c0_129, %c2112] : memref<2x3136xbf16, #tpu.memory_space<vmem>>, vector<2x64xbf16>
    tpu.vector_store %arg9[%c0_129, %c2112], %158 {strides = array<i32>} : memref<2x3136xbf16, #tpu.memory_space<vmem>>, vector<2x64xbf16>,
    %c0_130 = arith.constant 0 : index
    %c34 = arith.constant 34 : index
    %c0_131 = arith.constant 0 : index
    %160 = vector.load %arg8[%c0_130, %c34, %c0_131] : memref<2x49x64xf32, #tpu.memory_space<vmem>>, vector<2x1x64xf32>
    %161 = vector.shape_cast %160 : vector<2x1x64xf32> to vector<2x64xf32>
    %162 = arith.truncf %161 : vector<2x64xf32> to vector<2x64xbf16>
    %c0_132 = arith.constant 0 : index
    %c2176 = arith.constant 2176 : index
    %163 = vector.load %arg9[%c0_132, %c2176] : memref<2x3136xbf16, #tpu.memory_space<vmem>>, vector<2x64xbf16>
    tpu.vector_store %arg9[%c0_132, %c2176], %162 {strides = array<i32>} : memref<2x3136xbf16, #tpu.memory_space<vmem>>, vector<2x64xbf16>,
    %c0_133 = arith.constant 0 : index
    %c35 = arith.constant 35 : index
    %c0_134 = arith.constant 0 : index
    %164 = vector.load %arg8[%c0_133, %c35, %c0_134] : memref<2x49x64xf32, #tpu.memory_space<vmem>>, vector<2x1x64xf32>
    %165 = vector.shape_cast %164 : vector<2x1x64xf32> to vector<2x64xf32>
    %166 = arith.truncf %165 : vector<2x64xf32> to vector<2x64xbf16>
    %c0_135 = arith.constant 0 : index
    %c2240 = arith.constant 2240 : index
    %167 = vector.load %arg9[%c0_135, %c2240] : memref<2x3136xbf16, #tpu.memory_space<vmem>>, vector<2x64xbf16>
    tpu.vector_store %arg9[%c0_135, %c2240], %166 {strides = array<i32>} : memref<2x3136xbf16, #tpu.memory_space<vmem>>, vector<2x64xbf16>,
    %c0_136 = arith.constant 0 : index
    %c36 = arith.constant 36 : index
    %c0_137 = arith.constant 0 : index
    %168 = vector.load %arg8[%c0_136, %c36, %c0_137] : memref<2x49x64xf32, #tpu.memory_space<vmem>>, vector<2x1x64xf32>
    %169 = vector.shape_cast %168 : vector<2x1x64xf32> to vector<2x64xf32>
    %170 = arith.truncf %169 : vector<2x64xf32> to vector<2x64xbf16>
    %c0_138 = arith.constant 0 : index
    %c2304 = arith.constant 2304 : index
    %171 = vector.load %arg9[%c0_138, %c2304] : memref<2x3136xbf16, #tpu.memory_space<vmem>>, vector<2x64xbf16>
    tpu.vector_store %arg9[%c0_138, %c2304], %170 {strides = array<i32>} : memref<2x3136xbf16, #tpu.memory_space<vmem>>, vector<2x64xbf16>,
    %c0_139 = arith.constant 0 : index
    %c37 = arith.constant 37 : index
    %c0_140 = arith.constant 0 : index
    %172 = vector.load %arg8[%c0_139, %c37, %c0_140] : memref<2x49x64xf32, #tpu.memory_space<vmem>>, vector<2x1x64xf32>
    %173 = vector.shape_cast %172 : vector<2x1x64xf32> to vector<2x64xf32>
    %174 = arith.truncf %173 : vector<2x64xf32> to vector<2x64xbf16>
    %c0_141 = arith.constant 0 : index
    %c2368 = arith.constant 2368 : index
    %175 = vector.load %arg9[%c0_141, %c2368] : memref<2x3136xbf16, #tpu.memory_space<vmem>>, vector<2x64xbf16>
    tpu.vector_store %arg9[%c0_141, %c2368], %174 {strides = array<i32>} : memref<2x3136xbf16, #tpu.memory_space<vmem>>, vector<2x64xbf16>,
    %c0_142 = arith.constant 0 : index
    %c38 = arith.constant 38 : index
    %c0_143 = arith.constant 0 : index
    %176 = vector.load %arg8[%c0_142, %c38, %c0_143] : memref<2x49x64xf32, #tpu.memory_space<vmem>>, vector<2x1x64xf32>
    %177 = vector.shape_cast %176 : vector<2x1x64xf32> to vector<2x64xf32>
    %178 = arith.truncf %177 : vector<2x64xf32> to vector<2x64xbf16>
    %c0_144 = arith.constant 0 : index
    %c2432 = arith.constant 2432 : index
    %179 = vector.load %arg9[%c0_144, %c2432] : memref<2x3136xbf16, #tpu.memory_space<vmem>>, vector<2x64xbf16>
    tpu.vector_store %arg9[%c0_144, %c2432], %178 {strides = array<i32>} : memref<2x3136xbf16, #tpu.memory_space<vmem>>, vector<2x64xbf16>,
    %c0_145 = arith.constant 0 : index
    %c39 = arith.constant 39 : index
    %c0_146 = arith.constant 0 : index
    %180 = vector.load %arg8[%c0_145, %c39, %c0_146] : memref<2x49x64xf32, #tpu.memory_space<vmem>>, vector<2x1x64xf32>
    %181 = vector.shape_cast %180 : vector<2x1x64xf32> to vector<2x64xf32>
    %182 = arith.truncf %181 : vector<2x64xf32> to vector<2x64xbf16>
    %c0_147 = arith.constant 0 : index
    %c2496 = arith.constant 2496 : index
    %183 = vector.load %arg9[%c0_147, %c2496] : memref<2x3136xbf16, #tpu.memory_space<vmem>>, vector<2x64xbf16>
    tpu.vector_store %arg9[%c0_147, %c2496], %182 {strides = array<i32>} : memref<2x3136xbf16, #tpu.memory_space<vmem>>, vector<2x64xbf16>,
    %c0_148 = arith.constant 0 : index
    %c40 = arith.constant 40 : index
    %c0_149 = arith.constant 0 : index
    %184 = vector.load %arg8[%c0_148, %c40, %c0_149] : memref<2x49x64xf32, #tpu.memory_space<vmem>>, vector<2x1x64xf32>
    %185 = vector.shape_cast %184 : vector<2x1x64xf32> to vector<2x64xf32>
    %186 = arith.truncf %185 : vector<2x64xf32> to vector<2x64xbf16>
    %c0_150 = arith.constant 0 : index
    %c2560 = arith.constant 2560 : index
    %187 = vector.load %arg9[%c0_150, %c2560] : memref<2x3136xbf16, #tpu.memory_space<vmem>>, vector<2x64xbf16>
    tpu.vector_store %arg9[%c0_150, %c2560], %186 {strides = array<i32>} : memref<2x3136xbf16, #tpu.memory_space<vmem>>, vector<2x64xbf16>,
    %c0_151 = arith.constant 0 : index
    %c41 = arith.constant 41 : index
    %c0_152 = arith.constant 0 : index
    %188 = vector.load %arg8[%c0_151, %c41, %c0_152] : memref<2x49x64xf32, #tpu.memory_space<vmem>>, vector<2x1x64xf32>
    %189 = vector.shape_cast %188 : vector<2x1x64xf32> to vector<2x64xf32>
    %190 = arith.truncf %189 : vector<2x64xf32> to vector<2x64xbf16>
    %c0_153 = arith.constant 0 : index
    %c2624 = arith.constant 2624 : index
    %191 = vector.load %arg9[%c0_153, %c2624] : memref<2x3136xbf16, #tpu.memory_space<vmem>>, vector<2x64xbf16>
    tpu.vector_store %arg9[%c0_153, %c2624], %190 {strides = array<i32>} : memref<2x3136xbf16, #tpu.memory_space<vmem>>, vector<2x64xbf16>,
    %c0_154 = arith.constant 0 : index
    %c42 = arith.constant 42 : index
    %c0_155 = arith.constant 0 : index
    %192 = vector.load %arg8[%c0_154, %c42, %c0_155] : memref<2x49x64xf32, #tpu.memory_space<vmem>>, vector<2x1x64xf32>
    %193 = vector.shape_cast %192 : vector<2x1x64xf32> to vector<2x64xf32>
    %194 = arith.truncf %193 : vector<2x64xf32> to vector<2x64xbf16>
    %c0_156 = arith.constant 0 : index
    %c2688 = arith.constant 2688 : index
    %195 = vector.load %arg9[%c0_156, %c2688] : memref<2x3136xbf16, #tpu.memory_space<vmem>>, vector<2x64xbf16>
    tpu.vector_store %arg9[%c0_156, %c2688], %194 {strides = array<i32>} : memref<2x3136xbf16, #tpu.memory_space<vmem>>, vector<2x64xbf16>,
    %c0_157 = arith.constant 0 : index
    %c43 = arith.constant 43 : index
    %c0_158 = arith.constant 0 : index
    %196 = vector.load %arg8[%c0_157, %c43, %c0_158] : memref<2x49x64xf32, #tpu.memory_space<vmem>>, vector<2x1x64xf32>
    %197 = vector.shape_cast %196 : vector<2x1x64xf32> to vector<2x64xf32>
    %198 = arith.truncf %197 : vector<2x64xf32> to vector<2x64xbf16>
    %c0_159 = arith.constant 0 : index
    %c2752 = arith.constant 2752 : index
    %199 = vector.load %arg9[%c0_159, %c2752] : memref<2x3136xbf16, #tpu.memory_space<vmem>>, vector<2x64xbf16>
    tpu.vector_store %arg9[%c0_159, %c2752], %198 {strides = array<i32>} : memref<2x3136xbf16, #tpu.memory_space<vmem>>, vector<2x64xbf16>,
    %c0_160 = arith.constant 0 : index
    %c44 = arith.constant 44 : index
    %c0_161 = arith.constant 0 : index
    %200 = vector.load %arg8[%c0_160, %c44, %c0_161] : memref<2x49x64xf32, #tpu.memory_space<vmem>>, vector<2x1x64xf32>
    %201 = vector.shape_cast %200 : vector<2x1x64xf32> to vector<2x64xf32>
    %202 = arith.truncf %201 : vector<2x64xf32> to vector<2x64xbf16>
    %c0_162 = arith.constant 0 : index
    %c2816 = arith.constant 2816 : index
    %203 = vector.load %arg9[%c0_162, %c2816] : memref<2x3136xbf16, #tpu.memory_space<vmem>>, vector<2x64xbf16>
    tpu.vector_store %arg9[%c0_162, %c2816], %202 {strides = array<i32>} : memref<2x3136xbf16, #tpu.memory_space<vmem>>, vector<2x64xbf16>,
    %c0_163 = arith.constant 0 : index
    %c45 = arith.constant 45 : index
    %c0_164 = arith.constant 0 : index
    %204 = vector.load %arg8[%c0_163, %c45, %c0_164] : memref<2x49x64xf32, #tpu.memory_space<vmem>>, vector<2x1x64xf32>
    %205 = vector.shape_cast %204 : vector<2x1x64xf32> to vector<2x64xf32>
    %206 = arith.truncf %205 : vector<2x64xf32> to vector<2x64xbf16>
    %c0_165 = arith.constant 0 : index
    %c2880 = arith.constant 2880 : index
    %207 = vector.load %arg9[%c0_165, %c2880] : memref<2x3136xbf16, #tpu.memory_space<vmem>>, vector<2x64xbf16>
    tpu.vector_store %arg9[%c0_165, %c2880], %206 {strides = array<i32>} : memref<2x3136xbf16, #tpu.memory_space<vmem>>, vector<2x64xbf16>,
    %c0_166 = arith.constant 0 : index
    %c46 = arith.constant 46 : index
    %c0_167 = arith.constant 0 : index
    %208 = vector.load %arg8[%c0_166, %c46, %c0_167] : memref<2x49x64xf32, #tpu.memory_space<vmem>>, vector<2x1x64xf32>
    %209 = vector.shape_cast %208 : vector<2x1x64xf32> to vector<2x64xf32>
    %210 = arith.truncf %209 : vector<2x64xf32> to vector<2x64xbf16>
    %c0_168 = arith.constant 0 : index
    %c2944 = arith.constant 2944 : index
    %211 = vector.load %arg9[%c0_168, %c2944] : memref<2x3136xbf16, #tpu.memory_space<vmem>>, vector<2x64xbf16>
    tpu.vector_store %arg9[%c0_168, %c2944], %210 {strides = array<i32>} : memref<2x3136xbf16, #tpu.memory_space<vmem>>, vector<2x64xbf16>,
    %c0_169 = arith.constant 0 : index
    %c47 = arith.constant 47 : index
    %c0_170 = arith.constant 0 : index
    %212 = vector.load %arg8[%c0_169, %c47, %c0_170] : memref<2x49x64xf32, #tpu.memory_space<vmem>>, vector<2x1x64xf32>
    %213 = vector.shape_cast %212 : vector<2x1x64xf32> to vector<2x64xf32>
    %214 = arith.truncf %213 : vector<2x64xf32> to vector<2x64xbf16>
    %c0_171 = arith.constant 0 : index
    %c3008 = arith.constant 3008 : index
    %215 = vector.load %arg9[%c0_171, %c3008] : memref<2x3136xbf16, #tpu.memory_space<vmem>>, vector<2x64xbf16>
    tpu.vector_store %arg9[%c0_171, %c3008], %214 {strides = array<i32>} : memref<2x3136xbf16, #tpu.memory_space<vmem>>, vector<2x64xbf16>,
    %c0_172 = arith.constant 0 : index
    %c48 = arith.constant 48 : index
    %c0_173 = arith.constant 0 : index
    %216 = vector.load %arg8[%c0_172, %c48, %c0_173] : memref<2x49x64xf32, #tpu.memory_space<vmem>>, vector<2x1x64xf32>
    %217 = vector.shape_cast %216 : vector<2x1x64xf32> to vector<2x64xf32>
    %218 = arith.truncf %217 : vector<2x64xf32> to vector<2x64xbf16>
    %c0_174 = arith.constant 0 : index
    %c3072 = arith.constant 3072 : index
    %219 = vector.load %arg9[%c0_174, %c3072] : memref<2x3136xbf16, #tpu.memory_space<vmem>>, vector<2x64xbf16>
    tpu.vector_store %arg9[%c0_174, %c3072], %218 {strides = array<i32>} : memref<2x3136xbf16, #tpu.memory_space<vmem>>, vector<2x64xbf16>,
    %c0_175 = arith.constant 0 : index
    %c0_176 = arith.constant 0 : index
    %220 = vector.load %arg9[%c0_175, %c0_176] : memref<2x3136xbf16, #tpu.memory_space<vmem>>, vector<2x3136xbf16>
    %c0_177 = arith.constant 0 : index
    %c0_178 = arith.constant 0 : index
    %221 = vector.load %arg5[%c0_177, %c0_178] : memref<3136x256xbf16, #tpu.memory_space<vmem>>, vector<3136x256xbf16>
    %cst_179 = arith.constant dense<0.000000e+00> : vector<2x256xf32>
    %222 = tpu.matmul %220, %221, %cst_179 {dimension_numbers = #tpu.dot_dimension_numbers<[1], [0], [0], [1], [0, 0, 1, 1], [], []>} : vector<2x3136xbf16>, vector<3136x256xbf16>, vector<2x256xf32> -> vector<2x256xf32>
    %c0_180 = arith.constant 0 : index
    %c0_181 = arith.constant 0 : index
    %223 = vector.load %arg6[%c0_180, %c0_181] : memref<1x256xf32, #tpu.memory_space<vmem>>, vector<1x256xf32>
    %224 = vector.broadcast %223 : vector<1x256xf32> to vector<2x256xf32>
    %225 = arith.addf %222, %224 : vector<2x256xf32>
    %c0_182 = arith.constant 0 : index
    %c0_183 = arith.constant 0 : index
    %226 = vector.load %arg7[%c0_182, %c0_183] : memref<2x256xf32, #tpu.memory_space<vmem>>, vector<2x256xf32>
    tpu.vector_store %arg7[%c0_182, %c0_183], %225 {strides = array<i32>} : memref<2x256xf32, #tpu.memory_space<vmem>>, vector<2x256xf32>,
    return
  }
  func.func @transform_0(%arg0: i32) -> (i32, i32, i32) {
    %c0_i32 = arith.constant 0 : i32
    %c0_i32_0 = arith.constant 0 : i32
    %c0_i32_1 = arith.constant 0 : i32
    return %arg0, %c0_i32, %c0_i32_0 : i32, i32, i32
  }
  func.func @transform_1(%arg0: i32) -> (i32, i32) {
    %c0_i32 = arith.constant 0 : i32
    %c0_i32_0 = arith.constant 0 : i32
    %c0_i32_1 = arith.constant 0 : i32
    return %c0_i32, %c0_i32_0 : i32, i32
  }
  func.func @transform_2(%arg0: i32) -> (i32, i32) {
    %c0_i32 = arith.constant 0 : i32
    %c0_i32_0 = arith.constant 0 : i32
    %c0_i32_1 = arith.constant 0 : i32
    return %c0_i32, %c0_i32_0 : i32, i32
  }
  func.func @transform_3(%arg0: i32) -> (i32, i32) {
    %c0_i32 = arith.constant 0 : i32
    %c0_i32_0 = arith.constant 0 : i32
    %c0_i32_1 = arith.constant 0 : i32
    return %c0_i32, %c0_i32_0 : i32, i32
  }
  func.func @transform_4(%arg0: i32) -> (i32, i32) {
    %c0_i32 = arith.constant 0 : i32
    %c0_i32_0 = arith.constant 0 : i32
    %c0_i32_1 = arith.constant 0 : i32
    return %c0_i32, %c0_i32_0 : i32, i32
  }
  func.func @transform_5(%arg0: i32) -> (i32, i32) {
    %c0_i32 = arith.constant 0 : i32
    %c0_i32_0 = arith.constant 0 : i32
    %c0_i32_1 = arith.constant 0 : i32
    return %c0_i32, %c0_i32_0 : i32, i32
  }
  func.func @transform_6(%arg0: i32) -> (i32, i32) {
    %c0_i32 = arith.constant 0 : i32
    %c0_i32_0 = arith.constant 0 : i32
    return %arg0, %c0_i32 : i32, i32
  }
}

</mosaic_0001>

<bundles_post_ra>
// kernel: optical_flow_encoder.1
= control target key start
LH: loop header
LB: loop body
LE: loop exit
PB: predicated region body
PF: predicated region fallthrough
CT: control target
= control target key end

     0   :  { %v9054_v1 = vmov 0.0   ;;  %vm9055_vm0 = vmmov 0   ;;  %vm194_vm1 = vcmask 1041408   ;;  %vm40_vm2 = vcmask 523264   ;;  %s11443_s0 = inlined_call_operand.vmem [shape: f32[2,64,18], index: 0, kind: input, shape index: {}]   ;;  %s11444_s1 = inlined_call_operand.vmem [shape: f32[49,64], index: 1, kind: input, shape index: {}]   ;;  %s11445_s2 = inlined_call_operand.vmem [shape: f32[18,64], index: 2, kind: input, shape index: {}]   ;;  %s11446_s3 = inlined_call_operand.vmem [shape: f32[1,64], index: 3, kind: input, shape index: {}]   ;;  %s11447_s4 = inlined_call_operand.vmem [shape: bf16[3136,256], index: 4, kind: input, shape index: {}]   ;;  %s11448_s5 = inlined_call_operand.vmem [shape: f32[1,256], index: 5, kind: input, shape index: {}]   ;;  %s11449_s6 = inlined_call_operand.hbm [shape: f32[2,256], index: 6, kind: output, shape index: {}]  }
   0x1   :  { %v39_v0 = vld [vmem:[%s11443_s0 + $0x38] sm:$0xff]  ;;  %8306 = vmatprep.subr.mxu0 %v9054_v1  ;;  %v38_v2 = vld [vmem:[%s11443_s0 + $0x30] sm:$0xff]  ;;  %8322 = vmatprep.mubr.msk.f32.mxu0 %vm9055_vm0, %v9054_v1  ;;  %v37_v3 = vld [vmem:[%s11443_s0 + $0x28] sm:$0xff] }
   0x2   :  { %8307 = vmatpush3.msra.mxu0 %v39_v0  ;;  %8343 = vmatprep.subr.mxu1 %v9054_v1  ;;  %v36_v4 = vld [vmem:[%s11443_s0 + $0x20] sm:$0xff]  ;;  %v35_v5 = vld [vmem:[%s11443_s0 + $0x18] sm:$0xff]  ;;  %v164_v6 = vld [vmem:[%s11445_s2 + $0x10] sm:$0x3] }
   0x3   :  { %8308 = vmatprep.subr.mxu0 %v9054_v1  ;;  %8349 = vmatprep.mubr.msk.f32.mxu1 %vm9055_vm0, %v9054_v1  ;;  %v9125_v7 = vld [vmem:[%s11445_s2 + $0x8] sm:$0xff]  ;;  %v9130_v8 = vld [vmem:[%s11445_s2] sm:$0xff]  ;;  %v34_v9 = vld [vmem:[%s11443_s0 + $0x10] sm:$0xff] }
   0x4   :  { %8309 = vmatpush3.msra.mxu0 %v38_v2  ;;  %8344 = vmatpush3.msk.msra.mxu1 %vm194_vm1, %v164_v6  ;;  %v33_v10 = vld [vmem:[%s11443_s0 + $0x8] sm:$0xff]  ;;  %v32_v11 = vld [vmem:[%s11443_s0] sm:$0xff]  ;;  %v9170_v14 = vld [vmem:[%s11444_s1 + $0x10] sm:$0xff] }
   0x5   :  { %8310 = vmatprep.subr.mxu0 %v9054_v1  ;;  %8345 = vmatprep.subr.mxu1 %v9054_v1  ;;  %v9153_v12 = vld [vmem:[%s11444_s1] sm:$0xff]  ;;  %v9160_v13 = vld [vmem:[%s11444_s1 + $0x8] sm:$0xff]  ;;  %v9179_v15 = vld [vmem:[%s11444_s1 + $0x18] sm:$0xff] }
   0x6   :  { %8311 = vmatpush3.msra.mxu0 %v37_v3  ;;  %8346 = vmatpush3.msra.mxu1 %v9125_v7  ;;  %v9188_v16 = vld [vmem:[%s11444_s1 + $0x20] sm:$0xff]  ;;  %v9197_v17 = vld [vmem:[%s11444_s1 + $0x28] sm:$0xff]  ;;  %v31_v18 = vld [vmem:[%s11444_s1 + $0x30] sm:$0x1] }
   0x7   :  { %8312 = vmatprep.subr.mxu0 %v9054_v1  ;;  %8347 = vmatprep.subr.mxu1 %v9054_v1 }
   0x8   :  { %8313 = vmatpush3.msra.mxu0 %v36_v4  ;;  %8348 = vmatpush3.msra.mxu1 %v9130_v8 }
   0x9   :  { %8314 = vmatprep.subr.mxu0 %v9054_v1  ;;  %8370 = vmatprep.subr.mxu1 %v9054_v1 }
   0xa   :  { %8315 = vmatpush3.msra.mxu0 %v35_v5 }
   0xb   :  { %8316 = vmatprep.subr.mxu0 %v9054_v1 }
   0xc   :  { %8317 = vmatpush3.msra.mxu0 %v34_v9 }
   0xd   :  { %8318 = vmatprep.subr.mxu0 %v9054_v1 }
   0xe   :  { %8319 = vmatpush3.msra.mxu0 %v33_v10 }
   0xf   :  { %8320 = vmatprep.subr.mxu0 %v9054_v1 }
  0x10   :  { %8321 = vmatpush3.msra.mxu0 %v32_v11 }
  0x11   :  { %8323 = vmatmul.mubr.msk.f32.vlgmr.msra.gmra.mxu0 %vm40_vm2, %v9153_v12  ;;  %8407 = vmatprep.subr.mxu0 %v9054_v1 }
  0x12   :  { %8325 = vmatprep.mubr.msk.f32.mxu0 %vm9055_vm0, %v9054_v1 }
  0x15   :  { %8326 = vmatmul.mubr.msk.f32.gmra.mxu0 %vm40_vm2, %v9160_v13 }
  0x16   :  { %8328 = vmatprep.mubr.msk.f32.mxu0 %vm9055_vm0, %v9054_v1 }
  0x19   :  { %8329 = vmatmul.mubr.msk.f32.gmra.mxu0 %vm40_vm2, %v9170_v14 }
  0x1a   :  { %8331 = vmatprep.mubr.msk.f32.mxu0 %vm9055_vm0, %v9054_v1 }
  0x1d   :  { %8332 = vmatmul.mubr.msk.f32.gmra.mxu0 %vm40_vm2, %v9179_v15 }
  0x1e   :  { %8334 = vmatprep.mubr.msk.f32.mxu0 %vm9055_vm0, %v9054_v1 }
  0x21   :  { %8335 = vmatmul.mubr.msk.f32.gmra.mxu0 %vm40_vm2, %v9188_v16 }
  0x22   :  { %8337 = vmatprep.mubr.msk.f32.mxu0 %vm9055_vm0, %v9054_v1 }
  0x25   :  { %8338 = vmatmul.mubr.msk.f32.gmra.mxu0 %vm40_vm2, %v9197_v17 }
  0x26   :  { %8340 = vmatprep.mubr.msk.f32.mxu0 %vm9055_vm0, %v9054_v1 }
  0x29   :  { %8341 = vmatmul.mubr.msk.f32.gmra.mxu0 %vm40_vm2, %v31_v18 }
  0x2a   :  { %8413 = vmatprep.mubr.msk.f32.mxu0 %vm9055_vm0, %v9054_v1 }
  0x2b   :  { %11 = vsyncpa [#allocation5], 0  ;;  %vm172_vm3 = vcmask 146432   ;;  %v7844_v19 = vld [vmem:[%s11443_s0 + $0x78] sm:$0xff]  ;;  %v7843_v21 = vld [vmem:[%s11443_s0 + $0x70] sm:$0xff]  ;;  %vm304_vm4 = vcmask 516096   ;;  %v594_v18 = vlaneseq }
  0x2c   :  { %v7842_v23 = vld [vmem:[%s11443_s0 + $0x68] sm:$0xff]  ;;  %v7841_v25 = vld [vmem:[%s11443_s0 + $0x60] sm:$0xff]  ;;  %v7840_v27 = vld [vmem:[%s11443_s0 + $0x58] sm:$0xff]  ;;  %vm650_vm5 = vcmask 1041409   ;;  %vm753_vm6 = vcmask 1040896  }
  0x2d   :  { %v7839_v29 = vld [vmem:[%s11443_s0 + $0x50] sm:$0xff]  ;;  %v7838_v31 = vld [vmem:[%s11443_s0 + $0x48] sm:$0xff]  ;;  %v7837_v33 = vld [vmem:[%s11443_s0 + $0x40] sm:$0xff] }
  0x2e   :  { %v312_v41 = vld [vmem:[%s11444_s1 + $0x30] sm:$0x1]  ;;  %v9304_v43 = vld [vmem:[%s11446_s3] ss:$0 sm:$0xff] }
  0x2f   :  { %v445_v42 = vld [vmem:[%s11445_s2 + $0x10] sm:$0x3] }
  0x30   :  { %8408 = vmatpush3.msk.msra.mxu0 %vm194_vm1, %v445_v42 }
  0x31   :  { %8409 = vmatprep.subr.mxu0 %v9054_v1 }
  0x32   :  { %8410 = vmatpush3.msra.mxu0 %v9125_v7 }
  0x33   :  { %8411 = vmatprep.subr.mxu0 %v9054_v1 }
  0x34   :  { %8412 = vmatpush3.msra.mxu0 %v9130_v8 }
  0xd1   :  { %v128_v20 = vpop.f32.mrf.mxu0 }
  0xd2   :  { %8350 = vmatmul.mubr.msk.f32.vlgmr.msra.gmra.mxu1 %vm172_vm3, %v128_v20  ;;  %v9339_v20 = vshrl.u32 %v594_v18, 7 }
  0xd3   :  { %8371 = vmatpush3.msra.mxu1 %v7844_v19  ;;  %v8324_v22 = vpop.f32.mrf.mxu0  ;;  %8352 = vmatprep.mubr.msk.f32.mxu1 %vm9055_vm0, %v9054_v1 }
  0xd4   :  { %8372 = vmatprep.subr.mxu1 %v9054_v1  ;;  %11455 = vst [vmem:[#allocation7_spill] sm:$0xff] %v9339_v20 }
  0xd5   :  { %v133_v24 = vpop.f32.mrf.mxu0  ;;  %8373 = vmatpush3.msra.mxu1 %v7843_v21 }
  0xd6   :  { %8353 = vmatmul.mubr.msk.f32.gmra.mxu1 %vm172_vm3, %v133_v24  ;;  %8374 = vmatprep.subr.mxu1 %v9054_v1  ;;  %v9057_v24 = vmov 1935823168  }
  0xd7   :  { %v8327_v26 = vpop.f32.mrf.mxu0  ;;  %8355 = vmatprep.mubr.msk.f32.mxu1 %vm9055_vm0, %v9054_v1  ;;  %8375 = vmatpush3.msra.mxu1 %v7842_v23 }
  0xd8   :  { %8376 = vmatprep.subr.mxu1 %v9054_v1 }
  0xd9   :  { %v138_v28 = vpop.f32.mrf.mxu0  ;;  %8377 = vmatpush3.msra.mxu1 %v7841_v25  ;;  %v620_v25 = vunpack.c.l.s4 %v9057_v24 }
  0xda   :  { %8356 = vmatmul.mubr.msk.f32.gmra.mxu1 %vm172_vm3, %v138_v28  ;;  %8378 = vmatprep.subr.mxu1 %v9054_v1 }
  0xdb   :  { %v8330_v30 = vpop.f32.mrf.mxu0  ;;  %8358 = vmatprep.mubr.msk.f32.mxu1 %vm9055_vm0, %v9054_v1  ;;  %8379 = vmatpush3.msra.mxu1 %v7840_v27 }
  0xdc   :  { %8380 = vmatprep.subr.mxu1 %v9054_v1  ;;  %v621_v30 = vunpack.c.0.s8 %v620_v25 }
  0xdd   :  { %v143_v32 = vpop.f32.mrf.mxu0  ;;  %8381 = vmatpush3.msra.mxu1 %v7839_v29 }
  0xde   :  { %8359 = vmatmul.mubr.msk.f32.gmra.mxu1 %vm172_vm3, %v143_v32  ;;  %8382 = vmatprep.subr.mxu1 %v9054_v1 }
  0xdf   :  { %v8333_v34 = vpop.f32.mrf.mxu0  ;;  %8361 = vmatprep.mubr.msk.f32.mxu1 %vm9055_vm0, %v9054_v1  ;;  %8383 = vmatpush3.msra.mxu1 %v7838_v31 }
  0xe0   :  { %8384 = vmatprep.subr.mxu1 %v9054_v1 }
  0xe1   :  { %v148_v35 = vpop.f32.mrf.mxu0  ;;  %8385 = vmatpush3.msra.mxu1 %v7837_v33 }
  0xe2   :  { %8362 = vmatmul.mubr.msk.f32.gmra.mxu1 %vm172_vm3, %v148_v35 }
  0xe3   :  { %v8336_v36 = vpop.f32.mrf.mxu0  ;;  %8364 = vmatprep.mubr.msk.f32.mxu1 %vm9055_vm0, %v9054_v1 }
  0xe5   :  { %v153_v37 = vpop.f32.mrf.mxu0 }
  0xe6   :  { %8365 = vmatmul.mubr.msk.f32.gmra.mxu1 %vm172_vm3, %v153_v37 }
  0xe7   :  { %v8339_v38 = vpop.f32.mrf.mxu0  ;;  %8367 = vmatprep.mubr.msk.f32.mxu1 %vm9055_vm0, %v9054_v1 }
  0xe9   :  { %v158_v39 = vpop.f32.mrf.mxu0 }
  0xea   :  { %8368 = vmatmul.mubr.msk.f32.gmra.mxu1 %vm172_vm3, %v158_v39  ;;  %v9348_v39 = vsub.s32 %v621_v30, %v9339_v20 }
  0xeb   :  { %v8342_v40 = vpop.f32.mrf.mxu0  ;;  %8386 = vmatprep.mubr.msk.f32.mxu1 %vm9055_vm0, %v9054_v1 }
  0xee   :  { %8387 = vmatmul.mubr.msk.f32.vlgmr.msra.gmra.mxu1 %vm40_vm2, %v9153_v12 }
  0xef   :  { %8389 = vmatprep.mubr.msk.f32.mxu1 %vm9055_vm0, %v9054_v1 }
  0xf2   :  { %8390 = vmatmul.mubr.msk.f32.gmra.mxu1 %vm40_vm2, %v9160_v13 }
  0xf3   :  { %8392 = vmatprep.mubr.msk.f32.mxu1 %vm9055_vm0, %v9054_v1 }
  0xf6   :  { %8393 = vmatmul.mubr.msk.f32.gmra.mxu1 %vm40_vm2, %v9170_v14 }
  0xf7   :  { %8395 = vmatprep.mubr.msk.f32.mxu1 %vm9055_vm0, %v9054_v1 }
  0xfa   :  { %8396 = vmatmul.mubr.msk.f32.gmra.mxu1 %vm40_vm2, %v9179_v15 }
  0xfb   :  { %8398 = vmatprep.mubr.msk.f32.mxu1 %vm9055_vm0, %v9054_v1 }
  0xfe   :  { %8399 = vmatmul.mubr.msk.f32.gmra.mxu1 %vm40_vm2, %v9188_v16  ;;  %v9056_v16 = vmov 1966171168  }
  0xff   :  { %8401 = vmatprep.mubr.msk.f32.mxu1 %vm9055_vm0, %v9054_v1 }
 0x102   :  { %8402 = vmatmul.mubr.msk.f32.gmra.mxu1 %vm40_vm2, %v9197_v17  ;;  %v592_v17 = vunpack.c.l.s4 %v9056_v16 }
 0x103   :  { %8404 = vmatprep.mubr.msk.f32.mxu1 %vm9055_vm0, %v9054_v1 }
 0x104   :  { %v593_v19 = vunpack.c.0.s8 %v592_v17 }
 0x106   :  { %8405 = vmatmul.mubr.msk.f32.gmra.mxu1 %vm40_vm2, %v312_v41  ;;  %v9342_v23 = vsub.s32 %v593_v19, %v9339_v20 }
 0x192   :  { %v264_v44 = vpop.f32.mrf.mxu1 }
 0x193   :  { %v265_v45 = vadd.f32 %v9304_v43, %v264_v44 }
 0x194   :  { %v8351_v46 = vpop.f32.mrf.mxu1 }
 0x195   :  { %298 = vst.msk [vmem:[#allocation2] sm:$0xff] %vm40_vm2, %v265_v45 }
 0x196   :  { %v269_v47 = vpop.f32.mrf.mxu1 }
 0x197   :  { %v270_v48 = vadd.f32 %v9304_v43, %v269_v47 }
 0x198   :  { %v8354_v49 = vpop.f32.mrf.mxu1 }
 0x199   :  { %299 = vst.msk [vmem:[#allocation2 + $0x8] sm:$0xff] %vm40_vm2, %v270_v48 }
 0x19a   :  { %v274_v50 = vpop.f32.mrf.mxu1 }
 0x19b   :  { %v275_v51 = vadd.f32 %v9304_v43, %v274_v50 }
 0x19c   :  { %v8357_v52 = vpop.f32.mrf.mxu1  ;;  %v1006_v21 = vld [vmem:[#allocation2 + $0x5] sm:$0x1]  ;;  %v669_v22 = vld [vmem:[#allocation2 + $0x1] sm:$0x1]  ;;  %v1174_v27 = vld [vmem:[#allocation2 + $0x7] sm:$0x1] }
 0x19d   :  { %300 = vst.msk [vmem:[#allocation2 + $0x10] sm:$0xff] %vm40_vm2, %v275_v51  ;;  %v1008_v26 = vpack.c.bf16 %v1006_v21, %v1006_v21  ;;  %v671_v28 = vpack.c.bf16 %v669_v22, %v669_v22  ;;  %v1176_v29 = vpack.c.bf16 %v1174_v27, %v1174_v27  ;;  %v923_v44 = vld [vmem:[#allocation2 + $0x4] sm:$0x1]  ;;  %v585_v48 = vld [vmem:[#allocation2] sm:$0x1] }
 0x19e   :  { %v279_v53 = vpop.f32.mrf.mxu1  ;;  %v925_v52 = vpack.c.bf16 %v923_v44, %v923_v44 }
 0x19f   :  { %v280_v54 = vadd.f32 %v9304_v43, %v279_v53  ;;  %v1018_v31 = vrot.slane %v1008_v26, %v9342_v23  ;;  %v681_v34 = vrot.slane %v671_v28, %v9342_v23  ;;  %v1186_v38 = vrot.slane %v1176_v29, %v9342_v23 }
 0x1a0   :  { %v8360_v55 = vpop.f32.mrf.mxu1  ;;  %v1510_v33 = vld [vmem:[#allocation2 + $0xb] sm:$0x1]  ;;  %v1342_v35 = vld [vmem:[#allocation2 + $0x9] sm:$0x1]  ;;  %v1846_v36 = vld [vmem:[#allocation2 + $0xf] sm:$0x1] }
 0x1a1   :  { %301 = vst.msk [vmem:[#allocation2 + $0x18] sm:$0xff] %vm40_vm2, %v280_v54  ;;  %v1678_v37 = vld [vmem:[#allocation2 + $0xd] sm:$0x1]  ;;  %v1025_v40 = vrot.slane %v1018_v31, %v9342_v23  ;;  %v1512_v42 = vpack.c.bf16 %v1510_v33, %v1510_v33  ;;  %v1344_v45 = vpack.c.bf16 %v1342_v35, %v1342_v35  ;;  %v1848_v46 = vpack.c.bf16 %v1846_v36, %v1846_v36 }
 0x1a2   :  { %v284_v56 = vpop.f32.mrf.mxu1  ;;  %v1680_v47 = vpack.c.bf16 %v1678_v37, %v1678_v37  ;;  %v688_v49 = vrot.slane %v681_v34, %v9342_v23  ;;  %v1193_v50 = vrot.slane %v1186_v38, %v9342_v23 }
 0x1a3   :  { %v285_v57 = vadd.f32 %v9304_v43, %v284_v56  ;;  %v1046_v53 = vrot.slane %v1025_v40, %v9348_v39  ;;  %v1522_v55 = vrot.slane %v1512_v42, %v9342_v23 }
 0x1a4   :  { %v8363_v58 = vpop.f32.mrf.mxu1  ;;  %v2182_v51 = vld [vmem:[#allocation2 + $0x13] sm:$0x1]  ;;  %v2014_v56 = vld [vmem:[#allocation2 + $0x11] sm:$0x1] }
 0x1a5   :  { %302 = vst.msk [vmem:[#allocation2 + $0x20] sm:$0xff] %vm40_vm2, %v285_v57  ;;  %v2518_v57 = vld [vmem:[#allocation2 + $0x17] sm:$0x1]  ;;  %v587_v58 = vpack.c.bf16 %v585_v48, %v585_v48 }
 0x1a6   :  { %v289_v59 = vpop.f32.mrf.mxu1 }
 0x1a7   :  { %v290_v60 = vadd.f32 %v9304_v43, %v289_v59  ;;  %v1354_v59 = vrot.slane %v1344_v45, %v9342_v23 }
 0x1a8   :  { %v8366_v61 = vpop.f32.mrf.mxu1  ;;  %v3190_v16 = vld [vmem:[#allocation2 + $0x1f] sm:$0x1]  ;;  %v3022_v24 = vld [vmem:[#allocation2 + $0x1d] sm:$0x1] }
 0x1a9   :  { %303 = vst.msk [vmem:[#allocation2 + $0x28] sm:$0xff] %vm40_vm2, %v290_v60  ;;  %v1858_v60 = vrot.slane %v1848_v46, %v9342_v23  ;;  %v1690_v61 = vrot.slane %v1680_v47, %v9342_v23  ;;  %v3192_v31 = vpack.c.bf16 %v3190_v16, %v3190_v16  ;;  %v3024_v36 = vpack.c.bf16 %v3022_v24, %v3022_v24 }
 0x1aa   :  { %v294_v62 = vpop.f32.mrf.mxu1 }
 0x1ab   :  { %v295_v63 = vadd.f32 %v9304_v43, %v294_v62  ;;  %v709_v62 = vrot.slane %v688_v49, %v9348_v39 }
 0x1ac   :  { %v8369_v0 = vpop.f32.mrf.mxu1  ;;  %v3526_v37 = vld [vmem:[#allocation2 + $0x23] sm:$0x1] }
 0x1ad   :  { %305 = vst.msk [vmem:[#allocation2 + $0x30] sm:$0x1] %vm304_vm4, %v295_v63  ;;  %v2184_v63 = vpack.c.bf16 %v2182_v51, %v2182_v51  ;;  %v9361_v0 = vld [vmem:[#allocation2 + $0x6] sm:$0x1]  ;;  %v716_v18 = vrot.slane %v709_v62, %v9348_v39  ;;  %v3528_v51 = vpack.c.bf16 %v3526_v37, %v3526_v37 }
 0x1ae   :  { %v409_v2 = vpop.f32.mrf.mxu1  ;;  %v1093_v17 = vpack.c.bf16 %v9361_v0, %v9361_v0 }
 0x1af   :  { %8414 = vmatmul.mubr.msk.f32.vlgmr.msra.gmra.mxu0 %vm172_vm3, %v409_v2  ;;  %v1214_v2 = vrot.slane %v1193_v50, %v9348_v39  ;;  %v2194_v19 = vrot.slane %v2184_v63, %v9342_v23  ;;  %v9390_v38 = vunpack.c.l.b16 %v716_v18  ;;  %v3202_v50 = vrot.slane %v3192_v31, %v9342_v23 }
 0x1b0   :  { %v8388_v3 = vpop.f32.mrf.mxu1  ;;  %8416 = vmatprep.mubr.msk.f32.mxu0 %vm9055_vm0, %v9054_v1  ;;  %v4534_v24 = vld [vmem:[#allocation2 + $0x2f] sm:$0x1] }
 0x1b1   :  { %v2016_v3 = vpack.c.bf16 %v2014_v56, %v2014_v56  ;;  %v1221_v25 = vrot.slane %v1214_v2, %v9348_v39  ;;  %v2201_v40 = vrot.slane %v2194_v19, %v9342_v23  ;;  %v3034_v56 = vrot.slane %v3024_v36, %v9342_v23 }
 0x1b2   :  { %v414_v4 = vpop.f32.mrf.mxu1  ;;  %v4536_v36 = vpack.c.bf16 %v4534_v24, %v4534_v24 }
 0x1b3   :  { %8417 = vmatmul.mubr.msk.f32.gmra.mxu0 %vm172_vm3, %v414_v4  ;;  %v2520_v4 = vpack.c.bf16 %v2518_v57, %v2518_v57  ;;  %v2026_v26 = vrot.slane %v2016_v3, %v9342_v23  ;;  %v9395_v44 = vunpack.c.l.b16 %v1221_v25  ;;  %v3862_v3 = vld [vmem:[#allocation2 + $0x27] sm:$0x1] }
 0x1b4   :  { %v8391_v5 = vpop.f32.mrf.mxu1  ;;  %8419 = vmatprep.mubr.msk.f32.mxu0 %vm9055_vm0, %v9054_v1  ;;  %v3864_v19 = vpack.c.bf16 %v3862_v3, %v3862_v3  ;;  %v8449_v3 = vld [vmem:[%s11447_s4 + $0x64] ss:$8 sps:$4 sm:$0xff]  }
 0x1b5   :  { %v2350_v5 = vld [vmem:[#allocation2 + $0x15] sm:$0x1]  ;;  %v2530_v27 = vrot.slane %v2520_v4, %v9342_v23  ;;  %v2033_v45 = vrot.slane %v2026_v26, %v9342_v23 }
 0x1b6   :  { %v419_v6 = vpop.f32.mrf.mxu1  ;;  %v2352_v21 = vpack.c.bf16 %v2350_v5, %v2350_v5 }
 0x1b7   :  { %8420 = vmatmul.mubr.msk.f32.gmra.mxu0 %vm172_vm3, %v419_v6  ;;  %v2854_v6 = vld [vmem:[#allocation2 + $0x1b] sm:$0x1]  ;;  %v2537_v46 = vrot.slane %v2530_v27, %v9342_v23 }
 0x1b8   :  { %v8394_v7 = vpop.f32.mrf.mxu1  ;;  %8422 = vmatprep.mubr.msk.f32.mxu0 %vm9055_vm0, %v9054_v1  ;;  %v2856_v22 = vpack.c.bf16 %v2854_v6, %v2854_v6  ;;  %v3209_v6 = vrot.slane %v3202_v50, %v9342_v23  ;;  %v755_v50 = vld [vmem:[#allocation2 + $0x2] sm:$0x1] }
 0x1b9   :  { %v9365_v7 = vrot.slane %v925_v52, %v9342_v23  ;;  %v3358_v52 = vld [vmem:[#allocation2 + $0x21] sm:$0x1]  ;;  %v2558_v62 = vrot.slane %v2537_v46, %v9348_v39 }
 0x1ba   :  { %v424_v8 = vpop.f32.mrf.mxu1  ;;  %v2866_v42 = vrot.slane %v2856_v22, %v9342_v23  ;;  %v3360_v2 = vpack.c.bf16 %v3358_v52, %v3358_v52  ;;  %v4030_v22 = vld [vmem:[#allocation2 + $0x29] sm:$0x1] }
 0x1bb   :  { %8423 = vmatmul.mubr.msk.f32.gmra.mxu0 %vm172_vm3, %v424_v8  ;;  %v1053_v8 = vrot.slane %v1046_v53, %v9348_v39  ;;  %v2565_v26 = vrot.slane %v2558_v62, %v9348_v39 }
 0x1bc   :  { %v8397_v9 = vpop.f32.mrf.mxu1  ;;  %8425 = vmatprep.mubr.msk.f32.mxu0 %vm9055_vm0, %v9054_v1 }
 0x1bd   :  { %v9383_v28 = vunpack.c.l.b16 %v1053_v8  ;;  %v3538_v8 = vrot.slane %v3528_v51, %v9342_v23  ;;  %v9444_v46 = vunpack.c.l.b16 %v2565_v26  ;;  %v1427_v51 = vld [vmem:[#allocation2 + $0xa] sm:$0x1] }
 0x1be   :  { %v429_v10 = vpop.f32.mrf.mxu1 }
 0x1bf   :  { %8426 = vmatmul.mubr.msk.f32.gmra.mxu0 %vm172_vm3, %v429_v10  ;;  %v1529_v10 = vrot.slane %v1522_v55, %v9342_v23  ;;  %v3545_v31 = vrot.slane %v3538_v8, %v9342_v23 }
 0x1c0   :  { %v8400_v11 = vpop.f32.mrf.mxu1  ;;  %8428 = vmatprep.mubr.msk.f32.mxu0 %vm9055_vm0, %v9054_v1 }
 0x1c1   :  { %v2686_v11 = vld [vmem:[#allocation2 + $0x19] sm:$0x1]  ;;  %v1550_v30 = vrot.slane %v1529_v10, %v9348_v39 }
 0x1c2   :  { %v434_v12 = vpop.f32.mrf.mxu1 }
 0x1c3   :  { %8429 = vmatmul.mubr.msk.f32.gmra.mxu0 %vm172_vm3, %v434_v12  ;;  %v9371_v12 = vrot.slane %v587_v58, %v9342_v23  ;;  %v1557_v49 = vrot.slane %v1550_v30, %v9348_v39  ;;  %v2222_v58 = vrot.slane %v2201_v40, %v9348_v39  ;;  %v3230_v30 = vrot.slane %v3209_v6, %v9348_v39 }
 0x1c4   :  { %v8403_v13 = vpop.f32.mrf.mxu1  ;;  %8431 = vmatprep.mubr.msk.f32.mxu0 %vm9055_vm0, %v9054_v1  ;;  %v838_v1 = vld [vmem:[#allocation2 + $0x3] sm:$0x1] }
 0x1c5   :  { %v840_v32 = vpack.c.bf16 %v838_v1, %v838_v1  ;;  %v1361_v13 = vrot.slane %v1354_v59, %v9342_v23  ;;  %v2688_v1 = vpack.c.bf16 %v2686_v11, %v2686_v11  ;;  %v9415_v5 = vunpack.c.l.b16 %v1557_v49  ;;  %v4366_v49 = vld [vmem:[#allocation2 + $0x2d] sm:$0x1] }
 0x1c6   :  { %v439_v14 = vpop.f32.mrf.mxu1 }
 0x1c7   :  { %8432 = vmatmul.mubr.msk.f32.gmra.mxu0 %vm172_vm3, %v439_v14  ;;  %v850_v41 = vrot.slane %v840_v32, %v9342_v23  ;;  %v1865_v14 = vrot.slane %v1858_v60, %v9342_v23  ;;  %v4619_v32 = vld [vmem:[#allocation2 + $0x30] sm:$0x1]  ;;  %v1382_v33 = vrot.slane %v1361_v13, %v9348_v39  ;;  %v2698_v47 = vrot.slane %v2688_v1, %v9342_v23 }
 0x1c8   :  { %v8406_v15 = vpop.f32.mrf.mxu1  ;;  %v4621_v48 = vpack.c.bf16 %v4619_v32, %v4619_v32  ;;  %v2873_v60 = vrot.slane %v2866_v42, %v9342_v23  ;;  %v3041_v13 = vrot.slane %v3034_v56, %v9342_v23  ;;  %v3370_v1 = vrot.slane %v3360_v2, %v9342_v23  ;;  %v8441_v56 = vld [vmem:[%s11447_s4 + $0x70] ss:$8 sps:$4 sm:$0xff]   ;;  %v8446_v2 = vld [vmem:[%s11447_s4 + $0x174] ss:$8 sps:$4 sm:$0xff]  }
 0x1c9   :  { %v857_v54 = vrot.slane %v850_v41, %v9342_v23  ;;  %v1697_v15 = vrot.slane %v1690_v61, %v9342_v23  ;;  %v1886_v34 = vrot.slane %v1865_v14, %v9348_v39  ;;  %v2362_v41 = vrot.slane %v2352_v21, %v9342_v23  ;;  %v3694_v14 = vld [vmem:[#allocation2 + $0x25] sm:$0x1]  ;;  %v4198_v21 = vld [vmem:[#allocation2 + $0x2b] sm:$0x1]  ;;  %7303 = vmatprep.subr.bf16.mxu0 %v8446_v2 }
 0x1ca   :  { %v1389_v53 = vrot.slane %v1382_v33, %v9348_v39  ;;  %v2054_v61 = vrot.slane %v2033_v45, %v9348_v39  ;;  %v2705_v63 = vrot.slane %v2698_v47, %v9342_v23  ;;  %v4631_v4 = vrot.slane %v4621_v48, %v9342_v23 }
 0x1cb   :  { %v878_v9 = vrot.slane %v857_v54, %v9348_v39  ;;  %v1718_v35 = vrot.slane %v1697_v15, %v9348_v39  ;;  %v1893_v54 = vrot.slane %v1886_v34, %v9348_v39  ;;  %v2369_v59 = vrot.slane %v2362_v41, %v9342_v23 }
 0x1cc   :  { %v2229_v15 = vrot.slane %v2222_v58, %v9348_v39  ;;  %v2894_v18 = vrot.slane %v2873_v60, %v9348_v39  ;;  %v2061_v25 = vrot.slane %v2054_v61, %v9348_v39  ;;  %v2726_v27 = vrot.slane %v2705_v63, %v9348_v39  ;;  %v8443_v58 = vld [vmem:[%s11447_s4 + $0x74] ss:$8 sps:$4 sm:$0xff]  }
 0x1cd   :  { %v885_v29 = vrot.slane %v878_v9, %v9348_v39  ;;  %v1725_v55 = vrot.slane %v1718_v35, %v9348_v39  ;;  %v9419_v9 = vunpack.c.l.b16 %v1389_v53  ;;  %v9421_v10 = vunpack.c.l.b16 %v1893_v54  ;;  %7262 = vmatprep.subr.bf16.mxu1 %v8443_v58 }
 0x1ce   :  { %v2390_v16 = vrot.slane %v2369_v59, %v9348_v39  ;;  %v3696_v32 = vpack.c.bf16 %v3694_v14, %v3694_v14  ;;  %v3062_v33 = vrot.slane %v3041_v13, %v9348_v39  ;;  %v4200_v34 = vpack.c.bf16 %v4198_v21, %v4198_v21  ;;  %v8444_v59 = vld [vmem:[%s11447_s4 + $0x170] ss:$8 sps:$4 sm:$0xff]   ;;  %v8452_v14 = vld [vmem:[%s11447_s4 + $0x164] ss:$8 sps:$4 sm:$0xff]   ;;  %7263 = vmatpush1.bf16.msra.mxu1 %v8441_v56 }
 0x1cf   :  { %v9406_v57 = vunpack.c.l.b16 %v885_v29  ;;  %v9423_v11 = vunpack.c.l.b16 %v1725_v55  ;;  %v4638_v29 = vrot.slane %v4631_v4, %v9342_v23  ;;  %v4032_v35 = vpack.c.bf16 %v4030_v22, %v4030_v22  ;;  %7304 = vmatpush1.bf16.msra.mxu0 %v8444_v59  ;;  %7264 = vmatprep.subr.bf16.mxu1 %v8449_v3 }
 0x1d0   :  { %v9437_v37 = vunpack.c.l.b16 %v2229_v15  ;;  %v2397_v40 = vrot.slane %v2390_v16, %v9348_v39  ;;  %v2901_v41 = vrot.slane %v2894_v18, %v9348_v39  ;;  %v3874_v42 = vrot.slane %v3864_v19, %v9342_v23  ;;  %v8447_v18 = vld [vmem:[%s11447_s4 + $0x60] ss:$8 sps:$4 sm:$0xff]   ;;  %7305 = vmatprep.subr.bf16.mxu0 %v8452_v14 }
 0x1d1   :  { %v9442_v45 = vunpack.c.l.b16 %v2061_v25  ;;  %v2733_v47 = vrot.slane %v2726_v27, %v9348_v39  ;;  %v3377_v48 = vrot.slane %v3370_v1, %v9342_v23  ;;  %v4659_v52 = vrot.slane %v4638_v29, %v9348_v39  ;;  %v8450_v27 = vld [vmem:[%s11447_s4 + $0x160] ss:$8 sps:$4 sm:$0xff]   ;;  %v8455_v1 = vld [vmem:[%s11447_s4 + $0x54] ss:$8 sps:$4 sm:$0xff]  }
 0x1d2   :  { %v3237_v53 = vrot.slane %v3230_v30, %v9348_v39  ;;  %v3566_v54 = vrot.slane %v3545_v31, %v9348_v39  ;;  %v3706_v55 = vrot.slane %v3696_v32, %v9342_v23  ;;  %v3069_v60 = vrot.slane %v3062_v33, %v9348_v39  ;;  %v1259_v29 = vld [vmem:[#allocation2 + $0x8] sm:$0x1]  ;;  %7265 = vmatpush1.bf16.msra.mxu1 %v8447_v18 }
 0x1d3   :  { %v4210_v61 = vrot.slane %v4200_v34, %v9342_v23  ;;  %v4042_v62 = vrot.slane %v4032_v35, %v9342_v23  ;;  %v4546_v63 = vrot.slane %v4536_v36, %v9342_v23  ;;  %v9471_v4 = vunpack.c.l.b16 %v2397_v40  ;;  %v8458_v34 = vld [vmem:[%s11447_s4 + $0x154] ss:$8 sps:$4 sm:$0xff]   ;;  %7306 = vmatpush1.bf16.msra.mxu0 %v8450_v27  ;;  %7266 = vmatprep.subr.bf16.mxu1 %v8455_v1 }
 0x1d4   :  { %v9473_v6 = vunpack.c.l.b16 %v2901_v41  ;;  %v3881_v8 = vrot.slane %v3874_v42, %v9342_v23  ;;  %v4368_v13 = vpack.c.bf16 %v4366_v49, %v4366_v49  ;;  %v9479_v15 = vunpack.c.l.b16 %v2733_v47  ;;  %v1763_v42 = vld [vmem:[#allocation2 + $0xe] sm:$0x1]  ;;  %7307 = vmatprep.subr.bf16.mxu0 %v8458_v34  ;;  %v1931_v34 = vld [vmem:[#allocation2 + $0x10] sm:$0x1] }
 0x1d5   :  { %v3398_v16 = vrot.slane %v3377_v48, %v9348_v39  ;;  %v757_v19 = vpack.c.bf16 %v755_v50, %v755_v50  ;;  %v1429_v21 = vpack.c.bf16 %v1427_v51, %v1427_v51  ;;  %v4666_v22 = vrot.slane %v4659_v52, %v9348_v39  ;;  %v8453_v48 = vld [vmem:[%s11447_s4 + $0x50] ss:$8 sps:$4 sm:$0xff]   ;;  %v1595_v52 = vld [vmem:[#allocation2 + $0xc] sm:$0x1] }
 0x1d6   :  { %v9486_v24 = vunpack.c.l.b16 %v3237_v53  ;;  %v3573_v25 = vrot.slane %v3566_v54, %v9348_v39  ;;  %v3713_v26 = vrot.slane %v3706_v55, %v9342_v23  ;;  %v9496_v30 = vunpack.c.l.b16 %v3069_v60  ;;  %v8461_v54 = vld [vmem:[%s11447_s4 + $0x44] ss:$8 sps:$4 sm:$0xff]   ;;  %7267 = vmatpush1.bf16.msra.mxu1 %v8453_v48 }
 0x1d7   :  { %v4217_v31 = vrot.slane %v4210_v61, %v9342_v23  ;;  %v4049_v32 = vrot.slane %v4042_v62, %v9342_v23  ;;  %v4553_v33 = vrot.slane %v4546_v63, %v9342_v23  ;;  %v3902_v35 = vrot.slane %v3881_v8, %v9348_v39  ;;  %v8464_v60 = vld [vmem:[%s11447_s4 + $0x144] ss:$8 sps:$4 sm:$0xff]   ;;  %v2099_v62 = vld [vmem:[#allocation2 + $0x12] sm:$0x1]  ;;  %7268 = vmatprep.subr.bf16.mxu1 %v8461_v54 }
 0x1d8   :  { %v4378_v36 = vrot.slane %v4368_v13, %v9342_v23  ;;  %v942_v40 = vrot.slane %v9365_v7, %v9342_v23  ;;  %v1103_v41 = vrot.slane %v1093_v17, %v9342_v23  ;;  %v3405_v47 = vrot.slane %v3398_v16, %v9348_v39  ;;  %v8456_v17 = vld [vmem:[%s11447_s4 + $0x150] ss:$8 sps:$4 sm:$0xff]   ;;  %v8459_v13 = vld [vmem:[%s11447_s4 + $0x40] ss:$8 sps:$4 sm:$0xff]  }
 0x1d9   :  { %v767_v49 = vrot.slane %v757_v19, %v9342_v23  ;;  %v1439_v50 = vrot.slane %v1429_v21, %v9342_v23  ;;  %v1261_v51 = vpack.c.bf16 %v1259_v29, %v1259_v29  ;;  %v9518_v7 = vunpack.c.l.b16 %v4666_v22  ;;  %7308 = vmatpush1.bf16.msra.mxu0 %v8456_v17  ;;  %v8462_v22 = vld [vmem:[%s11447_s4 + $0x140] ss:$8 sps:$4 sm:$0xff]  }
 0x1da   :  { %v9520_v53 = vunpack.c.l.b16 %v3573_v25  ;;  %v3734_v0 = vrot.slane %v3713_v26, %v9348_v39  ;;  %v604_v55 = vrot.slane %v9371_v12, %v9342_v23  ;;  %v4238_v56 = vrot.slane %v4217_v31, %v9348_v39  ;;  %v8467_v25 = vld [vmem:[%s11447_s4 + $0x34] ss:$8 sps:$4 sm:$0xff]   ;;  %7309 = vmatprep.subr.bf16.mxu0 %v8464_v60  ;;  %7269 = vmatpush1.bf16.msra.mxu1 %v8459_v13  ;;  %v2771_v13 = vld [vmem:[#allocation2 + $0x1a] sm:$0x1] }
 0x1db   :  { %v4070_v58 = vrot.slane %v4049_v32, %v9348_v39  ;;  %v4574_v59 = vrot.slane %v4553_v33, %v9348_v39  ;;  %v1765_v61 = vpack.c.bf16 %v1763_v42, %v1763_v42  ;;  %v4385_v63 = vrot.slane %v4378_v36, %v9342_v23  ;;  %v8470_v32 = vld [vmem:[%s11447_s4 + $0x134] ss:$8 sps:$4 sm:$0xff]   ;;  %7270 = vmatprep.subr.bf16.mxu1 %v8467_v25 }
 0x1dc   :  { %v963_v2 = vrot.slane %v942_v40, %v9348_v39  ;;  %v1110_v3 = vrot.slane %v1103_v41, %v9342_v23  ;;  %v1597_v12 = vpack.c.bf16 %v1595_v52, %v1595_v52  ;;  %v3909_v8 = vrot.slane %v3902_v35, %v9348_v39  ;;  %v8468_v52 = vld [vmem:[%s11447_s4 + $0x130] ss:$8 sps:$4 sm:$0xff]  }
 0x1dd   :  { %v774_v14 = vrot.slane %v767_v49, %v9342_v23  ;;  %v1446_v16 = vrot.slane %v1439_v50, %v9342_v23  ;;  %v1271_v18 = vrot.slane %v1261_v51, %v9342_v23  ;;  %v9547_v19 = vunpack.c.l.b16 %v3405_v47  ;;  %v8465_v47 = vld [vmem:[%s11447_s4 + $0x30] ss:$8 sps:$4 sm:$0xff]   ;;  %7310 = vmatpush1.bf16.msra.mxu0 %v8462_v22 }
 0x1de   :  { %v3741_v21 = vrot.slane %v3734_v0, %v9348_v39  ;;  %v625_v26 = vrot.slane %v604_v55, %v9348_v39  ;;  %v2101_v27 = vpack.c.bf16 %v2099_v62, %v2099_v62  ;;  %v4245_v1 = vrot.slane %v4238_v56, %v9348_v39  ;;  %v8473_v0 = vld [vmem:[%s11447_s4 + $0x24] ss:$8 sps:$4 sm:$0xff]   ;;  %v2435_v56 = vld [vmem:[#allocation2 + $0x16] sm:$0x1]  ;;  %7311 = vmatprep.subr.bf16.mxu0 %v8470_v32 }
 0x1df   :  { %v4077_v29 = vrot.slane %v4070_v58, %v9348_v39  ;;  %v4581_v31 = vrot.slane %v4574_v59, %v9348_v39  ;;  %v1775_v33 = vrot.slane %v1765_v61, %v9342_v23  ;;  %v4406_v35 = vrot.slane %v4385_v63, %v9348_v39  ;;  %v8476_v61 = vld [vmem:[%s11447_s4 + $0x124] ss:$8 sps:$4 sm:$0xff]   ;;  %v2267_v63 = vld [vmem:[#allocation2 + $0x14] sm:$0x1]  ;;  %7271 = vmatpush1.bf16.msra.mxu1 %v8465_v47 }
 0x1e0   :  { %v970_v36 = vrot.slane %v963_v2, %v9348_v39  ;;  %v1131_v40 = vrot.slane %v1110_v3, %v9348_v39  ;;  %v1607_v41 = vrot.slane %v1597_v12, %v9342_v23  ;;  %v9568_v42 = vunpack.c.l.b16 %v3909_v8  ;;  %7272 = vmatprep.subr.bf16.mxu1 %v8473_v0 }
 0x1e1   :  { %v795_v48 = vrot.slane %v774_v14, %v9348_v39  ;;  %v9575_v49 = vrot.slane %v1446_v16, %v9348_v39  ;;  %v1278_v50 = vrot.slane %v1271_v18, %v9342_v23  ;;  %v9578_v51 = vunpack.c.l.b16 %v3741_v21  ;;  %v2603_v14 = vld [vmem:[#allocation2 + $0x18] sm:$0x1]  ;;  %v3107_v16 = vld [vmem:[#allocation2 + $0x1e] sm:$0x1]  ;;  %v8471_v18 = vld [vmem:[%s11447_s4 + $0x20] ss:$8 sps:$4 sm:$0xff]   ;;  %7312 = vmatpush1.bf16.msra.mxu0 %v8468_v52 }
 0x1e2   :  { %v632_v17 = vrot.slane %v625_v26, %v9348_v39  ;;  %v2111_v54 = vrot.slane %v2101_v27, %v9342_v23  ;;  %v1933_v55 = vpack.c.bf16 %v1931_v34, %v1931_v34  ;;  %v9588_v58 = vunpack.c.l.b16 %v4245_v1  ;;  %v2939_v27 = vld [vmem:[#allocation2 + $0x1c] sm:$0x1]  ;;  %v3443_v1 = vld [vmem:[#allocation2 + $0x22] sm:$0x1]  ;;  %7313 = vmatprep.subr.bf16.mxu0 %v8476_v61 }
 0x1e3   :  { %v9590_v59 = vunpack.c.l.b16 %v4077_v29  ;;  %v9592_v60 = vunpack.c.l.b16 %v4581_v31  ;;  %v1782_v62 = vrot.slane %v1775_v33, %v9342_v23  ;;  %v4413_v2 = vrot.slane %v4406_v35, %v9348_v39  ;;  %v8474_v29 = vld [vmem:[%s11447_s4 + $0x120] ss:$8 sps:$4 sm:$0xff]   ;;  %v8479_v31 = vld [vmem:[%s11447_s4 + $0x14] ss:$8 sps:$4 sm:$0xff]   ;;  %7273 = vmatpush1.bf16.msra.mxu1 %v8471_v18 }
 0x1e4   :  { %v9599_v3 = vunpack.c.l.b16 %v970_v36  ;;  %v1138_v12 = vrot.slane %v1131_v40, %v9348_v39  ;;  %v1614_v8 = vrot.slane %v1607_v41, %v9342_v23  ;;  %v802_v21 = vrot.slane %v795_v48, %v9348_v39  ;;  %v8482_v36 = vld [vmem:[%s11447_s4 + $0x114] ss:$8 sps:$4 sm:$0xff]   ;;  %7274 = vmatprep.subr.bf16.mxu1 %v8479_v31 }
 0x1e5   :  { %v1474_v22 = vrot.slane %v9575_v49, %v9348_v39  ;;  %v1299_v25 = vrot.slane %v1278_v50, %v9348_v39  ;;  %v2437_v26 = vpack.c.bf16 %v2435_v56, %v2435_v56  ;;  %v9616_v32 = vunpack.c.l.b16 %v632_v17  ;;  %v3275_v17 = vld [vmem:[#allocation2 + $0x20] sm:$0x1]  ;;  %7314 = vmatpush1.bf16.msra.mxu0 %v8474_v29  ;;  %v3947_v29 = vld [vmem:[#allocation2 + $0x28] sm:$0x1] }
 0x1e6   :  { %v2118_v33 = vrot.slane %v2111_v54, %v9342_v23  ;;  %v1943_v34 = vrot.slane %v1933_v55, %v9342_v23  ;;  %v2269_v35 = vpack.c.bf16 %v2267_v63, %v2267_v63  ;;  %v1803_v40 = vrot.slane %v1782_v62, %v9348_v39  ;;  %v8477_v54 = vld [vmem:[%s11447_s4 + $0x10] ss:$8 sps:$4 sm:$0xff]   ;;  %v3779_v63 = vld [vmem:[#allocation2 + $0x26] sm:$0x1]  ;;  %7315 = vmatprep.subr.bf16.mxu0 %v8482_v36  ;;  %v8483_v36 = vld [vmem:[%s11447_s4] ss:$8 sps:$4 sm:$0xff]  }
 0x1e7   :  { %v2773_v41 = vpack.c.bf16 %v2771_v13, %v2771_v13  ;;  %v2605_v47 = vpack.c.bf16 %v2603_v14, %v2603_v14  ;;  %v3109_v48 = vpack.c.bf16 %v3107_v16, %v3107_v16  ;;  %v9624_v49 = vunpack.c.l.b16 %v4413_v2  ;;  %v3611_v2 = vld [vmem:[#allocation2 + $0x24] sm:$0x1]  ;;  %7275 = vmatpush1.bf16.msra.mxu1 %v8477_v54 }
 0x1e8   :  { %v9627_v50 = vrot.slane %v1614_v8, %v9348_v39  ;;  %v2941_v52 = vpack.c.bf16 %v2939_v27, %v2939_v27  ;;  %v3445_v0 = vpack.c.bf16 %v3443_v1, %v3443_v1  ;;  %v9632_v55 = vunpack.c.l.b16 %v1138_v12  ;;  %v8480_v8 = vld [vmem:[%s11447_s4 + $0x110] ss:$8 sps:$4 sm:$0xff]   ;;  %v8485_v13 = vld [vmem:[%s11447_s4 + $0x4] ss:$8 sps:$4 sm:$0xff]  }
 0x1e9   :  { %v9634_v56 = vunpack.c.l.b16 %v802_v21  ;;  %v1306_v61 = vrot.slane %v1299_v25, %v9348_v39  ;;  %v2447_v62 = vrot.slane %v2437_v26, %v9342_v23  ;;  %v9644_v12 = vunpack.c.l.b16 %v1474_v22  ;;  %v4115_v21 = vld [vmem:[#allocation2 + $0x2a] sm:$0x1]  ;;  %v8488_v25 = vld [vmem:[%s11447_s4 + $0x104] ss:$8 sps:$4 sm:$0xff]   ;;  %7316 = vmatpush1.bf16.msra.mxu0 %v8480_v8  ;;  %7276 = vmatprep.subr.bf16.mxu1 %v8485_v13 }
 0x1ea   :  { %v9647_v14 = vrot.slane %v2118_v33, %v9348_v39  ;;  %v1950_v16 = vrot.slane %v1943_v34, %v9342_v23  ;;  %v2279_v18 = vrot.slane %v2269_v35, %v9342_v23  ;;  %v1810_v26 = vrot.slane %v1803_v40, %v9348_v39  ;;  %7317 = vmatprep.subr.bf16.mxu0 %v8488_v25  ;;  %v4451_v25 = vld [vmem:[#allocation2 + $0x2e] sm:$0x1] }
 0x1eb   :  { %v2783_v27 = vrot.slane %v2773_v41, %v9342_v23  ;;  %v2615_v22 = vrot.slane %v2605_v47, %v9342_v23  ;;  %v3119_v1 = vrot.slane %v3109_v48, %v9342_v23  ;;  %v1642_v31 = vrot.slane %v9627_v50, %v9348_v39  ;;  %v8486_v48 = vld [vmem:[%s11447_s4 + $0x100] ss:$8 sps:$4 sm:$0xff]   ;;  %v8491_v50 = vld [vmem:[%s11447_s4 + $0xf4] ss:$8 sps:$4 sm:$0xff]   ;;  %7277 = vmatpush1.bf16.msra.mxu1 %v8483_v36 }
 0x1ec   :  { %v2951_v33 = vrot.slane %v2941_v52, %v9342_v23  ;;  %v3455_v34 = vrot.slane %v3445_v0, %v9342_v23  ;;  %v3277_v35 = vpack.c.bf16 %v3275_v17, %v3275_v17  ;;  %v2454_v40 = vrot.slane %v2447_v62, %v9342_v23  ;;  %v8494_v62 = vld [vmem:[%s11447_s4 + $0x1f4] ss:$8 sps:$4 sm:$0xff]   ;;  %7278 = vmatprep.subr.bf16.mxu1 %v8491_v50 }
 0x1ed   :  { %v3781_v41 = vpack.c.bf16 %v3779_v63, %v3779_v63  ;;  %v3613_v47 = vpack.c.bf16 %v3611_v2, %v3611_v2  ;;  %v4117_v20 = vpack.c.bf16 %v4115_v21, %v4115_v21  ;;  %v9672_v52 = vunpack.c.l.b16 %v1306_v61  ;;  %7318 = vmatpush1.bf16.msra.mxu0 %v8486_v48 }
 0x1ee   :  { %v9675_v0 = vrot.slane %v1950_v16, %v9348_v39  ;;  %v2286_v17 = vrot.slane %v2279_v18, %v9342_v23  ;;  %v3949_v54 = vpack.c.bf16 %v3947_v29, %v3947_v29  ;;  %v2146_v63 = vrot.slane %v9647_v14, %v9348_v39  ;;  %v8489_v14 = vld [vmem:[%s11447_s4 + $0xf0] ss:$8 sps:$4 sm:$0xff]   ;;  %7319 = vmatprep.subr.bf16.mxu0 %v8494_v62 }
 0x1ef   :  { %11456 = vst [vmem:[#allocation8_spill] sm:$0xff] %v9672_v52  ;;  %v2790_v2 = vrot.slane %v2783_v27, %v9342_v23  ;;  %v2622_v8 = vrot.slane %v2615_v22, %v9342_v23  ;;  %v3126_v61 = vrot.slane %v3119_v1, %v9342_v23  ;;  %v9686_v13 = vunpack.c.l.b16 %v1810_v26  ;;  %v8492_v29 = vld [vmem:[%s11447_s4 + $0x1f0] ss:$8 sps:$4 sm:$0xff]   ;;  %7279 = vmatpush2.bf16.msra.mxu1 %v8489_v14 }
 0x1f0   :  { %v2958_v16 = vrot.slane %v2951_v33, %v9342_v23  ;;  %v3462_v18 = vrot.slane %v3455_v34, %v9342_v23  ;;  %v3287_v21 = vrot.slane %v3277_v35, %v9342_v23  ;;  %v2475_v27 = vrot.slane %v2454_v40, %v9348_v39  ;;  %v8497_v33 = vld [vmem:[%s11447_s4 + $0xe4] ss:$8 sps:$4 sm:$0xff]  }
 0x1f1   :  { %11457 = vst [vmem:[#allocation9_spill] sm:$0xff] %v9686_v13  ;;  %v3791_v22 = vrot.slane %v3781_v41, %v9342_v23  ;;  %v3623_v1 = vrot.slane %v3613_v47, %v9342_v23  ;;  %v4127_v26 = vrot.slane %v4117_v20, %v9342_v23  ;;  %v9704_v34 = vunpack.c.l.b16 %v1642_v31  ;;  %v4283_v20 = vld [vmem:[#allocation2 + $0x2c] sm:$0x1]  ;;  %7320 = vmatpush2.bf16.msra.mxu0 %v8492_v29 }
 0x1f2   :  { %v1978_v35 = vrot.slane %v9675_v0, %v9348_v39  ;;  %v2307_v36 = vrot.slane %v2286_v17, %v9348_v39  ;;  %v3959_v40 = vrot.slane %v3949_v54, %v9342_v23  ;;  %v2811_v47 = vrot.slane %v2790_v2, %v9348_v39  ;;  %v8495_v54 = vld [vmem:[%s11447_s4 + $0xe0] ss:$8 sps:$4 sm:$0xff]   ;;  %7280 = vmatprep.subr.bf16.mxu1 %v8497_v33 }
 0x1f3   :  { %11458 = vst [vmem:[#allocation10_spill] sm:$0xff] %v9704_v34  ;;  %v2643_v48 = vrot.slane %v2622_v8, %v9348_v39  ;;  %v3147_v50 = vrot.slane %v3126_v61, %v9348_v39  ;;  %v4453_v13 = vpack.c.bf16 %v4451_v25, %v4451_v25  ;;  %v2979_v34 = vrot.slane %v2958_v16, %v9348_v39 }
 0x1f4   :  { %v3483_v0 = vrot.slane %v3462_v18, %v9348_v39  ;;  %v3294_v17 = vrot.slane %v3287_v21, %v9342_v23  ;;  %v3798_v62 = vrot.slane %v3791_v22, %v9342_v23  ;;  %v3630_v2 = vrot.slane %v3623_v1, %v9342_v23  ;;  %7281 = vmatpush2.bf16.msra.mxu1 %v8495_v54 }
 0x1f5   :  { %v4134_v8 = vrot.slane %v4127_v26, %v9342_v23  ;;  %v4285_v61 = vpack.c.bf16 %v4283_v20, %v4283_v20  ;;  %v9724_v16 = vunpack.c.l.b16 %v2146_v63  ;;  %v2314_v18 = vrot.slane %v2307_v36, %v9348_v39 }
 0x1f6   :  { %v3966_v21 = vrot.slane %v3959_v40, %v9342_v23  ;;  %v2818_v14 = vrot.slane %v2811_v47, %v9348_v39  ;;  %v2650_v22 = vrot.slane %v2643_v48, %v9348_v39  ;;  %v3154_v1 = vrot.slane %v3147_v50, %v9348_v39 }
 0x1f7   :  { %11459 = vst [vmem:[#allocation11_spill] sm:$0xff] %v9724_v16  ;;  %v4463_v26 = vrot.slane %v4453_v13, %v9342_v23  ;;  %v2986_v63 = vrot.slane %v2979_v34, %v9348_v39  ;;  %v3490_v33 = vrot.slane %v3483_v0, %v9348_v39  ;;  %v9740_v40 = vrot.slane %v3798_v62, %v9348_v39 }
 0x1f8   :  { %v9743_v20 = vrot.slane %v3630_v2, %v9348_v39  ;;  %v9749_v13 = vrot.slane %v4285_v61, %v9342_v23  ;;  %v9752_v34 = vunpack.c.l.b16 %v1978_v35  ;;  %v9756_v48 = vunpack.c.l.b16 %v2314_v18 }
 0x1f9   :  { %v9759_v50 = vrot.slane %v3966_v21, %v9348_v39  ;;  %v9761_v0 = vunpack.c.l.b16 %v2818_v14  ;;  %v9765_v54 = vunpack.c.l.b16 %v3154_v1  ;;  %v4470_v62 = vrot.slane %v4463_v26, %v9342_v23 }
 0x1fa   :  { %11461 = vst [vmem:[#allocation13_spill] sm:$0xff] %v9749_v13  ;;  %11462 = vst [vmem:[#allocation14_spill] sm:$0xff] %v9752_v34  ;;  %v9769_v35 = vunpack.c.l.b16 %v2986_v63 }
 0x1fb   :  { %11464 = vst [vmem:[#allocation16_spill] sm:$0xff] %v9756_v48  ;;  %11465 = vst [vmem:[#allocation17_spill] sm:$0xff] %v9759_v50  ;;  %v9789_v1 = vrot.slane %v4470_v62, %v9348_v39 }
 0x1fc   :  { %11466 = vst [vmem:[#allocation18_spill] sm:$0xff] %v9761_v0  ;;  %11468 = vst [vmem:[#allocation20_spill] sm:$0xff] %v9765_v54 }
 0x1fd   :  { %11469 = vst [vmem:[#allocation21_spill] sm:$0xff] %v9769_v35  ;;  %11471 = vst [vmem:[#allocation23_spill] sm:$0xff] %v9789_v1 }
 0x26f   :  { %v543_v41 = vpop.f32.mrf.mxu0 }
 0x270   :  { %v544_v31 = vadd.f32 %v9304_v43, %v543_v41  ;;  %v9746_v41 = vrot.slane %v4134_v8, %v9348_v39  ;;  %v9771_v8 = vunpack.c.l.b16 %v3490_v33 }
 0x271   :  { %v8415_v52 = vpop.f32.mrf.mxu0 }
 0x272   :  { %578 = vst.msk [vmem:[#allocation2 + $0x38] sm:$0xff] %vm40_vm2, %v544_v31  ;;  %v2482_v52 = vrot.slane %v2475_v27, %v9348_v39  ;;  %v9737_v27 = vrot.slane %v3294_v17, %v9348_v39  ;;  %11460 = vst [vmem:[#allocation12_spill] sm:$0xff] %v9746_v41  ;;  %v9763_v17 = vunpack.c.l.b16 %v2650_v22 }
 0x273   :  { %v548_v25 = vpop.f32.mrf.mxu0  ;;  %11470 = vst [vmem:[#allocation22_spill] sm:$0xff] %v9771_v8 }
 0x274   :  { %v549_v29 = vadd.f32 %v9304_v43, %v548_v25  ;;  %v9754_v47 = vunpack.c.l.b16 %v2482_v52  ;;  %11467 = vst [vmem:[#allocation19_spill] sm:$0xff] %v9763_v17 }
 0x275   :  { %v8418_v36 = vpop.f32.mrf.mxu0 }
 0x276   :  { %579 = vst.msk [vmem:[#allocation2 + $0x40] sm:$0xff] %vm40_vm2, %v549_v29  ;;  %11463 = vst [vmem:[#allocation15_spill] sm:$0xff] %v9754_v47 }
 0x277   :  { %v553_v31 = vpop.f32.mrf.mxu0 }
 0x278   :  { %v554_v2 = vadd.f32 %v9304_v43, %v553_v31 }
 0x279   :  { %v8421_v52 = vpop.f32.mrf.mxu0  ;;  %v1007_v18 = vld [vmem:[#allocation2 + $0x3d] sm:$0x1]  ;;  %v670_v21 = vld [vmem:[#allocation2 + $0x39] sm:$0x1]  ;;  %v1175_v25 = vld [vmem:[#allocation2 + $0x3f] sm:$0x1] }
 0x27a   :  { %580 = vst.msk [vmem:[#allocation2 + $0x48] sm:$0xff] %vm40_vm2, %v554_v2  ;;  %v1009_v29 = vpack.c.bf16 %v1007_v18, %v1007_v18  ;;  %v672_v63 = vpack.c.bf16 %v670_v21, %v670_v21  ;;  %v1177_v33 = vpack.c.bf16 %v1175_v25, %v1175_v25  ;;  %v839_v36 = vld [vmem:[#allocation2 + $0x3b] sm:$0x1]  ;;  %v924_v31 = vld [vmem:[#allocation2 + $0x3c] sm:$0x1] }
 0x27b   :  { %v586_v52 = vld [vmem:[#allocation2 + $0x38] sm:$0x1]  ;;  %v558_v61 = vpop.f32.mrf.mxu0  ;;  %v841_v8 = vpack.c.bf16 %v839_v36, %v839_v36  ;;  %v926_v22 = vpack.c.bf16 %v924_v31, %v924_v31  ;;  %v9786_v54 = vld [vmem:[#allocation2 + $0x3e] sm:$0x1] }
 0x27c   :  { %v588_v35 = vpack.c.bf16 %v586_v52, %v586_v52  ;;  %v559_v2 = vadd.f32 %v9304_v43, %v558_v61  ;;  %v1032_v18 = vrot.slane %v1009_v29, %v9342_v23  ;;  %v695_v21 = vrot.slane %v672_v63, %v9342_v23  ;;  %v9031_v43 = vld [vmem:[%s11446_s3] ss:$0 sm:$0xff]  ;;  %s9058_s3 = smov 64  }
 0x27d   :  { %v1200_v25 = vrot.slane %v1177_v33, %v9342_v23  ;;  %v8424_v26 = vpop.f32.mrf.mxu0  ;;  %v864_v14 = vrot.slane %v841_v8, %v9342_v23  ;;  %v1511_v36 = vld [vmem:[#allocation2 + $0x43] sm:$0x1]  ;;  %v1343_v31 = vld [vmem:[#allocation2 + $0x41] sm:$0x1]  ;;  %v1847_v52 = vld [vmem:[#allocation2 + $0x47] sm:$0x1]  ;;  %v9797_v13 = vrot.slane %v926_v22, %v9342_v23 }
 0x27e   :  { %v9800_v62 = vrot.slane %v588_v35, %v9342_v23  ;;  %581 = vst.msk [vmem:[#allocation2 + $0x50] sm:$0xff] %vm40_vm2, %v559_v2  ;;  %v1039_v61 = vrot.slane %v1032_v18, %v9342_v23  ;;  %v702_v26 = vrot.slane %v695_v21, %v9342_v23  ;;  %v1513_v29 = vpack.c.bf16 %v1511_v36, %v1511_v36  ;;  %v1679_v63 = vld [vmem:[#allocation2 + $0x45] sm:$0x1] }
 0x27f   :  { %v1207_v8 = vrot.slane %v1200_v25, %v9342_v23  ;;  %v563_v33 = vpop.f32.mrf.mxu0  ;;  %v871_v22 = vrot.slane %v864_v14, %v9342_v23  ;;  %v1345_v1 = vpack.c.bf16 %v1343_v31, %v1343_v31  ;;  %v1849_v50 = vpack.c.bf16 %v1847_v52, %v1847_v52 }
 0x280   :  { %v1681_v35 = vpack.c.bf16 %v1679_v63, %v1679_v63  ;;  %v564_v41 = vadd.f32 %v9031_v43, %v563_v33  ;;  %v1060_v2 = vrot.slane %v1039_v61, %v9348_v39  ;;  %v723_v18 = vrot.slane %v702_v26, %v9348_v39 }
 0x281   :  { %v1228_v21 = vrot.slane %v1207_v8, %v9348_v39  ;;  %v8427_v25 = vpop.f32.mrf.mxu0  ;;  %v892_v36 = vrot.slane %v871_v22, %v9348_v39  ;;  %v1536_v17 = vrot.slane %v1513_v29, %v9342_v23  ;;  %v1368_v14 = vrot.slane %v1345_v1, %v9342_v23  ;;  %v8498_v8 = vld [vmem:[%s11447_s4 + $0x1e0] ss:$8 sps:$4 sm:$0xff]   ;;  %v8500_v1 = vld [vmem:[%s11447_s4 + $0x1e4] ss:$8 sps:$4 sm:$0xff]  }
 0x282   :  { %v1872_v31 = vrot.slane %v1849_v50, %v9342_v23  ;;  %582 = vst.msk [vmem:[#allocation2 + $0x58] sm:$0xff] %vm40_vm2, %v564_v41  ;;  %v1067_v52 = vrot.slane %v1060_v2, %v9348_v39  ;;  %v730_v63 = vrot.slane %v723_v18, %v9348_v39  ;;  %v1704_v26 = vrot.slane %v1681_v35, %v9342_v23  ;;  %v8501_v35 = vld [vmem:[%s11447_s4 + $0xd0] ss:$8 sps:$4 sm:$0xff]   ;;  %v8503_v2 = vld [vmem:[%s11447_s4 + $0xd4] ss:$8 sps:$4 sm:$0xff]  }
 0x283   :  { %v1235_v61 = vrot.slane %v1228_v21, %v9348_v39  ;;  %v568_v29 = vpop.f32.mrf.mxu0  ;;  %v899_v50 = vrot.slane %v892_v36, %v9348_v39  ;;  %v1543_v41 = vrot.slane %v1536_v17, %v9342_v23  ;;  %v1375_v33 = vrot.slane %v1368_v14, %v9342_v23  ;;  %7321 = vmatprep.subr.bf16.mxu0 %v8500_v1 }
 0x284   :  { %v1879_v22 = vrot.slane %v1872_v31, %v9342_v23  ;;  %v569_v18 = vadd.f32 %v9031_v43, %v568_v29  ;;  %v1069_v21 = vunpack.c.l.b16 %v1067_v52  ;;  %v732_v25 = vunpack.c.l.b16 %v730_v63  ;;  %7322 = vmatpush2.bf16.msra.mxu0 %v8498_v8  ;;  %7282 = vmatprep.subr.bf16.mxu1 %v8503_v2  ;;  %v8504_v8 = vld [vmem:[%s11447_s4 + $0x1d0] ss:$8 sps:$4 sm:$0xff]  }
 0x285   :  { %v1237_v0 = vunpack.c.l.b16 %v1235_v61  ;;  %v8430_v36 = vpop.f32.mrf.mxu0  ;;  %v901_v48 = vunpack.c.l.b16 %v899_v50  ;;  %v1564_v17 = vrot.slane %v1543_v41, %v9348_v39  ;;  %v1396_v14 = vrot.slane %v1375_v33, %v9348_v39  ;;  %7283 = vmatpush2.bf16.msra.mxu1 %v8501_v35  ;;  %v8506_v41 = vld [vmem:[%s11447_s4 + $0x1d4] ss:$8 sps:$4 sm:$0xff]   ;;  %v8509_v35 = vld [vmem:[%s11447_s4 + $0xc4] ss:$8 sps:$4 sm:$0xff]  }
 0x286   :  { %v1900_v31 = vrot.slane %v1879_v22, %v9348_v39  ;;  %583 = vst.msk [vmem:[#allocation2 + $0x60] sm:$0xff] %vm40_vm2, %v569_v18  ;;  %v1070_v47 = vrot.slane %v1069_v21, 7  ;;  %v733_v34 = vrot.slane %v732_v25, 7  ;;  %v1711_v52 = vrot.slane %v1704_v26, %v9342_v23  ;;  %v8507_v22 = vld [vmem:[%s11447_s4 + $0xc0] ss:$8 sps:$4 sm:$0xff]   ;;  %7323 = vmatprep.subr.bf16.mxu0 %v8506_v41  ;;  %7284 = vmatprep.subr.bf16.mxu1 %v8509_v35 }
 0x287   :  { %v1238_v16 = vrot.slane %v1237_v0, 7  ;;  %v573_v63 = vpop.f32.mrf.mxu0  ;;  %v902_v61 = vrot.slane %v901_v48, 7  ;;  %v1571_v1 = vrot.slane %v1564_v17, %v9348_v39  ;;  %v1403_v29 = vrot.slane %v1396_v14, %v9348_v39  ;;  %v8510_v21 = vld [vmem:[%s11447_s4 + $0x1c0] ss:$8 sps:$4 sm:$0xff]   ;;  %v8512_v25 = vld [vmem:[%s11447_s4 + $0x1c4] ss:$8 sps:$4 sm:$0xff]  }
 0x288   :  { %v1907_v50 = vrot.slane %v1900_v31, %v9348_v39  ;;  %v574_v0 = vadd.f32 %v9031_v43, %v573_v63  ;;  %v1071_v26 = vsel %vm650_vm5, %v1070_v47, %v9383_v28  ;;  %v734_v48 = vsel %vm650_vm5, %v733_v34, %v9390_v38  ;;  %7324 = vmatpush2.bf16.msra.mxu0 %v8504_v8  ;;  %v2183_v31 = vld [vmem:[#allocation2 + $0x4b] sm:$0x1]  ;;  %v8515_v63 = vld [vmem:[%s11447_s4 + $0xb4] ss:$8 sps:$4 sm:$0xff]   ;;  %v8513_v8 = vld [vmem:[%s11447_s4 + $0xb0] ss:$8 sps:$4 sm:$0xff]  }
 0x289   :  { %v1239_v33 = vsel %vm650_vm5, %v1238_v16, %v9395_v44  ;;  %v1072_v2 = vpack.c.b16 %v1071_v26, %v1071_v26  ;;  %v735_v18 = vpack.c.b16 %v734_v48, %v734_v48  ;;  %v903_v28 = vsel %vm650_vm5, %v902_v61, %v9406_v57  ;;  %v8433_v47 = vpop.f32.mrf.mxu0  ;;  %7285 = vmatpush2.bf16.msra.mxu1 %v8507_v22  ;;  %v2015_v48 = vld [vmem:[#allocation2 + $0x49] sm:$0x1]  ;;  %v2351_v22 = vld [vmem:[#allocation2 + $0x4d] sm:$0x1] }
 0x28a   :  { %v1240_v43 = vpack.c.b16 %v1239_v33, %v1239_v33  ;;  %584 = vst.msk [vmem:[#allocation2 + $0x68] sm:$0x1] %vm304_vm4, %v574_v0  ;;  %v904_v38 = vpack.c.b16 %v903_v28, %v903_v28  ;;  %v1573_v44 = vunpack.c.l.b16 %v1571_v1  ;;  %v1405_v16 = vunpack.c.l.b16 %v1403_v29  ;;  %7325 = vmatprep.subr.bf16.mxu0 %v8512_v25  ;;  %v2519_v33 = vld [vmem:[#allocation2 + $0x4f] sm:$0x1]  ;;  %7286 = vmatprep.subr.bf16.mxu1 %v8515_v63  ;;  %v8516_v28 = vld [vmem:[%s11447_s4 + $0x1b0] ss:$8 sps:$4 sm:$0xff]  }
 0x28b   :  { %v1909_v34 = vunpack.c.l.b16 %v1907_v50  ;;  %v1079_v57 = vrot.slane %v1072_v2, %v9342_v23  ;;  %v742_v36 = vrot.slane %v735_v18, %v9342_v23  ;;  %v1732_v14 = vrot.slane %v1711_v52, %v9348_v39  ;;  %v8518_v47 = vld [vmem:[%s11447_s4 + $0x1b4] ss:$8 sps:$4 sm:$0xff]  }
 0x28c   :  { %v1247_v17 = vrot.slane %v1240_v43, %v9342_v23  ;;  %v911_v61 = vrot.slane %v904_v38, %v9342_v23  ;;  %v1574_v1 = vrot.slane %v1573_v44, 7  ;;  %v1406_v29 = vrot.slane %v1405_v16, 7  ;;  %7326 = vmatpush2.bf16.msra.mxu0 %v8510_v21 }
 0x28d   :  { %v1910_v50 = vrot.slane %v1909_v34, 7  ;;  %v1086_v41 = vrot.slane %v1079_v57, %v9342_v23  ;;  %v749_v52 = vrot.slane %v742_v36, %v9342_v23  ;;  %v1739_v26 = vrot.slane %v1732_v14, %v9348_v39  ;;  %7287 = vmatpush2.bf16.msra.mxu1 %v8513_v8  ;;  %v8519_v57 = vld [vmem:[%s11447_s4 + $0xa0] ss:$8 sps:$4 sm:$0xff]   ;;  %7327 = vmatprep.subr.bf16.mxu0 %v8518_v47  ;;  %v2855_v8 = vld [vmem:[#allocation2 + $0x53] sm:$0x1] }
 0x28e   :  { %v1254_v0 = vrot.slane %v1247_v17, %v9342_v23  ;;  %v918_v35 = vrot.slane %v911_v61, %v9342_v23  ;;  %v1575_v2 = vsel %vm650_vm5, %v1574_v1, %v9415_v5  ;;  %v1407_v18 = vsel %vm650_vm5, %v1406_v29, %v9419_v9 }
 0x28f   :  { %v1911_v43 = vsel %vm650_vm5, %v1910_v50, %v9421_v10  ;;  %1087 = vrot.lane.b32.xlu1 %v1086_v41, %s9058_s3  ;;  %750 = vrot.lane.b32.xlu0 %v749_v52, %s9058_s3  ;;  %v1576_v5 = vpack.c.b16 %v1575_v2, %v1575_v2  ;;  %v1408_v38 = vpack.c.b16 %v1407_v18, %v1407_v18  ;;  %v1741_v44 = vunpack.c.l.b16 %v1739_v26  ;;  %v8521_v10 = vld [vmem:[%s11447_s4 + $0xa4] ss:$8 sps:$4 sm:$0xff]  }
 0x290   :  { %v1912_v9 = vpack.c.b16 %v1911_v43, %v1911_v43  ;;  %v2185_v16 = vpack.c.bf16 %v2183_v31, %v2183_v31  ;;  %v2017_v34 = vpack.c.bf16 %v2015_v48, %v2015_v48  ;;  %v2521_v21 = vpack.c.bf16 %v2519_v33, %v2519_v33  ;;  %7288 = vmatprep.subr.bf16.mxu1 %v8521_v10  ;;  %v2687_v48 = vld [vmem:[#allocation2 + $0x51] sm:$0x1] }
 0x291   :  { %v2353_v25 = vpack.c.bf16 %v2351_v22, %v2351_v22  ;;  %v4620_v36 = vld [vmem:[#allocation2 + $0x68] sm:$0x1]  ;;  %v1583_v17 = vrot.slane %v1576_v5, %v9342_v23  ;;  %v1415_v14 = vrot.slane %v1408_v38, %v9342_v23  ;;  %v1742_v61 = vrot.slane %v1741_v44, 7  ;;  %7328 = vmatpush2.bf16.msra.mxu0 %v8516_v28  ;;  %7289 = vmatpush2.bf16.msra.mxu1 %v8519_v57 }
 0x292   :  { %v1919_v63 = vrot.slane %v1912_v9, %v9342_v23  ;;  %v4622_v1 = vpack.c.bf16 %v4620_v36, %v4620_v36  ;;  %v2208_v31 = vrot.slane %v2185_v16, %v9342_v23  ;;  %v2040_v29 = vrot.slane %v2017_v34, %v9342_v23 }
 0x293   :  { %v2544_v50 = vrot.slane %v2521_v21, %v9342_v23  ;;  %1255 = vrot.lane.b32.xlu1 %v1254_v0, %s9058_s3  ;;  %919 = vrot.lane.b32.xlu0 %v918_v35, %s9058_s3  ;;  %v1590_v41 = vrot.slane %v1583_v17, %v9342_v23  ;;  %v1422_v52 = vrot.slane %v1415_v14, %v9342_v23  ;;  %v3191_v14 = vld [vmem:[#allocation2 + $0x57] sm:$0x1] }
 0x294   :  { %v1926_v26 = vrot.slane %v1919_v63, %v9342_v23  ;;  %v11472_v33 = vrot.slane %v9737_v27, %v9348_v39  ;;  %v4645_v2 = vrot.slane %v4622_v1, %v9342_v23  ;;  %v1743_v18 = vsel %vm650_vm5, %v1742_v61, %v9423_v11  ;;  %v8522_v63 = vld [vmem:[%s11447_s4 + $0x1a0] ss:$8 sps:$4 sm:$0xff]   ;;  %v8524_v61 = vld [vmem:[%s11447_s4 + $0x1a4] ss:$8 sps:$4 sm:$0xff]  }
 0x295   :  { %v2215_v0 = vrot.slane %v2208_v31, %v9342_v23  ;;  %v2047_v35 = vrot.slane %v2040_v29, %v9342_v23  ;;  %v1744_v43 = vpack.c.b16 %v1743_v18, %v1743_v18  ;;  %v2551_v28 = vrot.slane %v2544_v50, %v9342_v23  ;;  %v8525_v50 = vld [vmem:[%s11447_s4 + $0x90] ss:$8 sps:$4 sm:$0xff]   ;;  %7329 = vmatprep.subr.bf16.mxu0 %v8524_v61 }
 0x296   :  { %v9925_v22 = vunpack.c.l.b16 %v11472_v33  ;;  %v2376_v47 = vrot.slane %v2353_v25, %v9342_v23  ;;  %v2857_v5 = vpack.c.bf16 %v2855_v8, %v2855_v8  ;;  %v4652_v27 = vrot.slane %v4645_v2, %v9342_v23  ;;  %v8527_v8 = vld [vmem:[%s11447_s4 + $0x94] ss:$8 sps:$4 sm:$0xff]   ;;  %7330 = vmatpush2.bf16.msra.mxu0 %v8522_v63 }
 0x297   :  { %v2236_v38 = vrot.slane %v2215_v0, %v9348_v39  ;;  %v2068_v9 = vrot.slane %v2047_v35, %v9348_v39  ;;  %v2689_v44 = vpack.c.bf16 %v2687_v48, %v2687_v48  ;;  %1591 = vrot.lane.b32.xlu1 %v1590_v41, %s9058_s3  ;;  %1423 = vrot.lane.b32.xlu0 %v1422_v52, %s9058_s3 }
 0x298   :  { %v1751_v11 = vrot.slane %v1744_v43, %v9342_v23  ;;  %v2572_v10 = vrot.slane %v2551_v28, %v9348_v39  ;;  %v2383_v16 = vrot.slane %v2376_v47, %v9342_v23  ;;  %v11473_v34 = vrot.slane %v9740_v40, %v9348_v39  ;;  %7290 = vmatprep.subr.bf16.mxu1 %v8527_v8 }
 0x299   :  { %v4673_v25 = vrot.slane %v4652_v27, %v9348_v39  ;;  %v2243_v57 = vrot.slane %v2236_v38, %v9348_v39  ;;  %v2075_v36 = vrot.slane %v2068_v9, %v9348_v39  ;;  %v2880_v17 = vrot.slane %v2857_v5, %v9342_v23  ;;  %v8528_v27 = vld [vmem:[%s11447_s4 + $0x190] ss:$8 sps:$4 sm:$0xff]   ;;  %7291 = vmatpush2.bf16.msra.mxu1 %v8525_v50 }
 0x29a   :  { %v9945_v21 = vunpack.c.l.b16 %v11473_v34  ;;  %v1758_v40 = vrot.slane %v1751_v11, %v9342_v23  ;;  %v2579_v1 = vrot.slane %v2572_v10, %v9348_v39  ;;  %v2404_v31 = vrot.slane %v2383_v16, %v9348_v39  ;;  %v8531_v10 = vld [vmem:[%s11447_s4 + $0x80] ss:$8 sps:$4 sm:$0xff]   ;;  %v8533_v16 = vld [vmem:[%s11447_s4 + $0x84] ss:$8 sps:$4 sm:$0xff]  }
 0x29b   :  { %v2712_v29 = vrot.slane %v2689_v44, %v9342_v23  ;;  %v4680_v41 = vrot.slane %v4673_v25, %v9348_v39  ;;  %v2245_v52 = vunpack.c.l.b16 %v2243_v57  ;;  %v2077_v48 = vunpack.c.l.b16 %v2075_v36  ;;  %1927 = vrot.lane.b32.xlu1 %v1926_v26, %s9058_s3  ;;  %v8530_v26 = vld [vmem:[%s11447_s4 + $0x194] ss:$8 sps:$4 sm:$0xff]   ;;  %7292 = vmatprep.subr.bf16.mxu1 %v8533_v16 }
 0x29c   :  { %v2887_v33 = vrot.slane %v2880_v17, %v9342_v23  ;;  %1759 = vrot.lane.b32.xlu0 %v1758_v40, %s9058_s3  ;;  %v2581_v2 = vunpack.c.l.b16 %v2579_v1  ;;  %v2411_v18 = vrot.slane %v2404_v31, %v9348_v39  ;;  %v3193_v35 = vpack.c.bf16 %v3191_v14, %v3191_v14  ;;  %7331 = vmatprep.subr.bf16.mxu0 %v8530_v26  ;;  %v3695_v16 = vld [vmem:[#allocation2 + $0x5d] sm:$0x1] }
 0x29d   :  { %v2719_v0 = vrot.slane %v2712_v29, %v9342_v23  ;;  %v4682_v43 = vunpack.c.l.b16 %v4680_v41  ;;  %v2246_v28 = vrot.slane %v2245_v52, 7  ;;  %v2078_v47 = vrot.slane %v2077_v48, 7  ;;  %v3023_v29 = vld [vmem:[#allocation2 + $0x55] sm:$0x1]  ;;  %7332 = vmatpush2.bf16.msra.mxu0 %v8528_v27  ;;  %7293 = vmatpush2.bf16.msra.mxu1 %v8531_v10  ;;  %v3863_v10 = vld [vmem:[#allocation2 + $0x5f] sm:$0x1] }
 0x29e   :  { %v2908_v5 = vrot.slane %v2887_v33, %v9348_v39  ;;  %v2582_v38 = vrot.slane %v2581_v2, 7  ;;  %v2413_v9 = vunpack.c.l.b16 %v2411_v18  ;;  %v3216_v11 = vrot.slane %v3193_v35, %v9342_v23  ;;  %v8539_v52 = vld [vmem:[%s11447_s4 + $0x274] ss:$8 sps:$4 sm:$0xff]  }
 0x29f   :  { %v2740_v44 = vrot.slane %v2719_v0, %v9348_v39  ;;  %v4683_v34 = vrot.slane %v4682_v43, 7  ;;  %v2247_v25 = vsel %vm650_vm5, %v2246_v28, %v9437_v37  ;;  %v2079_v57 = vsel %vm650_vm5, %v2078_v47, %v9442_v45  ;;  %v8534_v45 = vld [vmem:[%s11447_s4 + $0x180] ss:$8 sps:$4 sm:$0xff]   ;;  %v3527_v47 = vld [vmem:[#allocation2 + $0x5b] sm:$0x1]  ;;  %7344 = vmatprep.subr.bf16.mxu1 %v8539_v52 }
 0x2a0   :  { %v2915_v36 = vrot.slane %v2908_v5, %v9348_v39  ;;  %v2248_v17 = vpack.c.b16 %v2247_v25, %v2247_v25  ;;  %v2080_v14 = vpack.c.b16 %v2079_v57, %v2079_v57  ;;  %v2583_v63 = vsel %vm650_vm5, %v2582_v38, %v9444_v46  ;;  %v8536_v46 = vld [vmem:[%s11447_s4 + $0x184] ss:$8 sps:$4 sm:$0xff]  }
 0x2a1   :  { %v2414_v61 = vrot.slane %v2413_v9, 7  ;;  %v9997_v40 = vsel %vm650_vm5, %v4683_v34, %v9518_v7  ;;  %v2584_v1 = vpack.c.b16 %v2583_v63, %v2583_v63  ;;  %v2747_v37 = vrot.slane %v2740_v44, %v9348_v39  ;;  %7333 = vmatprep.subr.bf16.mxu0 %v8536_v46 }
 0x2a2   :  { %v2917_v31 = vunpack.c.l.b16 %v2915_v36  ;;  %v4685_v50 = vpack.c.b16 %v9997_v40, %v9997_v40  ;;  %v2255_v7 = vrot.slane %v2248_v17, %v9342_v23  ;;  %v2087_v8 = vrot.slane %v2080_v14, %v9342_v23  ;;  %7334 = vmatpush2.bf16.msra.mxu0 %v8534_v45  ;;  %v4199_v45 = vld [vmem:[#allocation2 + $0x63] sm:$0x1] }
 0x2a3   :  { %v2415_v41 = vsel %vm650_vm5, %v2414_v61, %v9471_v4  ;;  %v2591_v48 = vrot.slane %v2584_v1, %v9342_v23  ;;  %v2749_v18 = vunpack.c.l.b16 %v2747_v37  ;;  %v3223_v43 = vrot.slane %v3216_v11, %v9342_v23  ;;  %v3359_v4 = vld [vmem:[#allocation2 + $0x59] sm:$0x1] }
 0x2a4   :  { %v2416_v33 = vpack.c.b16 %v2415_v41, %v2415_v41  ;;  %v2918_v2 = vrot.slane %v2917_v31, 7  ;;  %v2262_v0 = vrot.slane %v2255_v7, %v9342_v23  ;;  %v2094_v35 = vrot.slane %v2087_v8, %v9342_v23 }
 0x2a5   :  { %v3025_v28 = vpack.c.bf16 %v3023_v29, %v3023_v29  ;;  %v2598_v5 = vrot.slane %v2591_v48, %v9342_v23  ;;  %v2750_v38 = vrot.slane %v2749_v18, 7  ;;  %v3244_v44 = vrot.slane %v3223_v43, %v9348_v39 }
 0x2a6   :  { %v2423_v27 = vrot.slane %v2416_v33, %v9342_v23  ;;  %v2919_v26 = vsel %vm650_vm5, %v2918_v2, %v9473_v6  ;;  %2263 = vrot.lane.b32.xlu1 %v2262_v0, %s9058_s3  ;;  %2095 = vrot.lane.b32.xlu0 %v2094_v35, %s9058_s3  ;;  %v11474_v34 = vrot.slane %v9743_v20, %v9348_v39  ;;  %v4031_v2 = vld [vmem:[#allocation2 + $0x61] sm:$0x1] }
 0x2a7   :  { %v2920_v9 = vpack.c.b16 %v2919_v26, %v2919_v26  ;;  %v3048_v11 = vrot.slane %v3025_v28, %v9342_v23  ;;  %v2751_v57 = vsel %vm650_vm5, %v2750_v38, %v9479_v15  ;;  %v3529_v36 = vpack.c.bf16 %v3527_v47, %v3527_v47  ;;  %v8542_v28 = vld [vmem:[%s11447_s4 + $0x374] ss:$8 sps:$4 sm:$0xff]  }
 0x2a8   :  { %v10030_v25 = vunpack.c.l.b16 %v11474_v34  ;;  %v2430_v6 = vrot.slane %v2423_v27, %v9342_v23  ;;  %v3361_v17 = vpack.c.bf16 %v3359_v4, %v3359_v4  ;;  %v2752_v63 = vpack.c.b16 %v2751_v57, %v2751_v57  ;;  %7385 = vmatprep.subr.bf16.mxu0 %v8542_v28 }
 0x2a9   :  { %v2927_v14 = vrot.slane %v2920_v9, %v9342_v23  ;;  %v3251_v61 = vrot.slane %v3244_v44, %v9348_v39  ;;  %v3055_v1 = vrot.slane %v3048_v11, %v9342_v23  ;;  %v3552_v31 = vrot.slane %v3529_v36, %v9342_v23 }
 0x2aa   :  { %v3384_v20 = vrot.slane %v3361_v17, %v9342_v23  ;;  %v3865_v37 = vpack.c.bf16 %v3863_v10, %v3863_v10  ;;  %v3697_v29 = vpack.c.bf16 %v3695_v16, %v3695_v16  ;;  %2599 = vrot.lane.b32.xlu1 %v2598_v5, %s9058_s3  ;;  %2431 = vrot.lane.b32.xlu0 %v2430_v6, %s9058_s3 }
 0x2ab   :  { %v2934_v15 = vrot.slane %v2927_v14, %v9342_v23  ;;  %v2759_v46 = vrot.slane %v2752_v63, %v9342_v23  ;;  %v3253_v7 = vunpack.c.l.b16 %v3251_v61  ;;  %v3076_v8 = vrot.slane %v3055_v1, %v9348_v39 }
 0x2ac   :  { %v3559_v41 = vrot.slane %v3552_v31, %v9342_v23  ;;  %v3391_v52 = vrot.slane %v3384_v20, %v9342_v23  ;;  %v3888_v48 = vrot.slane %v3865_v37, %v9342_v23  ;;  %v3720_v33 = vrot.slane %v3697_v29, %v9342_v23  ;;  %v4535_v29 = vld [vmem:[#allocation2 + $0x67] sm:$0x1] }
 0x2ad   :  { %v2766_v18 = vrot.slane %v2759_v46, %v9342_v23  ;;  %v3254_v0 = vrot.slane %v3253_v7, 7  ;;  %v3083_v35 = vrot.slane %v3076_v8, %v9348_v39  ;;  %v4201_v43 = vpack.c.bf16 %v4199_v45, %v4199_v45 }
 0x2ae   :  { %v3580_v47 = vrot.slane %v3559_v41, %v9348_v39  ;;  %v3412_v4 = vrot.slane %v3391_v52, %v9348_v39  ;;  %v3895_v5 = vrot.slane %v3888_v48, %v9342_v23  ;;  %v3727_v27 = vrot.slane %v3720_v33, %v9342_v23  ;;  %2935 = vrot.lane.b32.xlu1 %v2934_v15, %s9058_s3 }
 0x2af   :  { %2767 = vrot.lane.b32.xlu0 %v2766_v18, %s9058_s3  ;;  %v3255_v26 = vsel %vm650_vm5, %v3254_v0, %v9486_v24  ;;  %v3085_v38 = vunpack.c.l.b16 %v3083_v35  ;;  %v4224_v9 = vrot.slane %v4201_v43, %v9342_v23  ;;  %v4033_v44 = vpack.c.bf16 %v4031_v2, %v4031_v2 }
 0x2b0   :  { %v3256_v11 = vpack.c.b16 %v3255_v26, %v3255_v26  ;;  %v3587_v10 = vrot.slane %v3580_v47, %v9348_v39  ;;  %v3419_v16 = vrot.slane %v3412_v4, %v9348_v39  ;;  %v3916_v34 = vrot.slane %v3895_v5, %v9348_v39  ;;  %v4367_v26 = vld [vmem:[#allocation2 + $0x65] sm:$0x1] }
 0x2b1   :  { %v3086_v6 = vrot.slane %v3085_v38, 7  ;;  %v3748_v57 = vrot.slane %v3727_v27, %v9348_v39  ;;  %v4231_v36 = vrot.slane %v4224_v9, %v9342_v23  ;;  %v4056_v17 = vrot.slane %v4033_v44, %v9342_v23 }
 0x2b2   :  { %v3263_v24 = vrot.slane %v3256_v11, %v9342_v23  ;;  %v3589_v14 = vunpack.c.l.b16 %v3587_v10  ;;  %v3421_v63 = vunpack.c.l.b16 %v3419_v16  ;;  %v3923_v61 = vrot.slane %v3916_v34, %v9348_v39 }
 0x2b3   :  { %v3087_v1 = vsel %vm650_vm5, %v3086_v6, %v9496_v30  ;;  %v3755_v31 = vrot.slane %v3748_v57, %v9348_v39  ;;  %v4252_v20 = vrot.slane %v4231_v36, %v9348_v39  ;;  %v4063_v37 = vrot.slane %v4056_v17, %v9342_v23 }
 0x2b4   :  { %v3270_v45 = vrot.slane %v3263_v24, %v9342_v23  ;;  %v3088_v15 = vpack.c.b16 %v3087_v1, %v3087_v1  ;;  %v3590_v46 = vrot.slane %v3589_v14, 7  ;;  %v3422_v7 = vrot.slane %v3421_v63, 7 }
 0x2b5   :  { %v3925_v8 = vunpack.c.l.b16 %v3923_v61  ;;  %v3757_v41 = vunpack.c.l.b16 %v3755_v31  ;;  %v4259_v52 = vrot.slane %v4252_v20, %v9348_v39  ;;  %v4084_v48 = vrot.slane %v4063_v37, %v9348_v39  ;;  %v756_v31 = vld [vmem:[#allocation2 + $0x3a] sm:$0x1] }
 0x2b6   :  { %3271 = vrot.lane.b32.xlu1 %v3270_v45, %s9058_s3  ;;  %v3095_v30 = vrot.slane %v3088_v15, %v9342_v23  ;;  %v3591_v33 = vsel %vm650_vm5, %v3590_v46, %v9520_v53  ;;  %v3423_v2 = vsel %vm650_vm5, %v3422_v7, %v9547_v19  ;;  %v4537_v18 = vpack.c.bf16 %v4535_v29, %v4535_v29 }
 0x2b7   :  { %v3592_v0 = vpack.c.b16 %v3591_v33, %v3591_v33  ;;  %v3424_v35 = vpack.c.b16 %v3423_v2, %v3423_v2  ;;  %v3926_v43 = vrot.slane %v3925_v8, 7  ;;  %v3758_v28 = vrot.slane %v3757_v41, 7 }
 0x2b8   :  { %v3102_v47 = vrot.slane %v3095_v30, %v9342_v23  ;;  %v4261_v4 = vunpack.c.l.b16 %v4259_v52  ;;  %v4091_v5 = vrot.slane %v4084_v48, %v9348_v39  ;;  %v4560_v27 = vrot.slane %v4537_v18, %v9342_v23  ;;  %v1428_v48 = vld [vmem:[#allocation2 + $0x42] sm:$0x1] }
 0x2b9   :  { %v3599_v38 = vrot.slane %v3592_v0, %v9342_v23  ;;  %v3431_v53 = vrot.slane %v3424_v35, %v9342_v23  ;;  %v3927_v19 = vsel %vm650_vm5, %v3926_v43, %v9568_v42  ;;  %v3759_v9 = vsel %vm650_vm5, %v3758_v28, %v9578_v51  ;;  %v1260_v43 = vld [vmem:[#allocation2 + $0x40] sm:$0x1] }
 0x2ba   :  { %3103 = vrot.lane.b32.xlu0 %v3102_v47, %s9058_s3  ;;  %v3928_v44 = vpack.c.b16 %v3927_v19, %v3927_v19  ;;  %v3760_v11 = vpack.c.b16 %v3759_v9, %v3759_v9  ;;  %v4262_v10 = vrot.slane %v4261_v4, 7  ;;  %v4093_v16 = vunpack.c.l.b16 %v4091_v5 }
 0x2bb   :  { %v3606_v34 = vrot.slane %v3599_v38, %v9342_v23  ;;  %v3438_v6 = vrot.slane %v3431_v53, %v9342_v23  ;;  %v4567_v57 = vrot.slane %v4560_v27, %v9342_v23  ;;  %v4369_v36 = vpack.c.bf16 %v4367_v26, %v4367_v26 }
 0x2bc   :  { %v3935_v17 = vrot.slane %v3928_v44, %v9342_v23  ;;  %v3767_v42 = vrot.slane %v3760_v11, %v9342_v23  ;;  %v4263_v51 = vsel %vm650_vm5, %v4262_v10, %v9588_v58  ;;  %v4094_v24 = vrot.slane %v4093_v16, 7 }
 0x2bd   :  { %3607 = vrot.lane.b32.xlu1 %v3606_v34, %s9058_s3  ;;  %v4264_v14 = vpack.c.b16 %v4263_v51, %v4263_v51  ;;  %v4588_v63 = vrot.slane %v4567_v57, %v9348_v39  ;;  %v4392_v61 = vrot.slane %v4369_v36, %v9342_v23  ;;  %v956_v1 = vrot.slane %v9797_v13, %v9342_v23 }
 0x2be   :  { %3439 = vrot.lane.b32.xlu0 %v3438_v6, %s9058_s3  ;;  %v3942_v20 = vrot.slane %v3935_v17, %v9342_v23  ;;  %v3774_v37 = vrot.slane %v3767_v42, %v9342_v23  ;;  %v4095_v58 = vsel %vm650_vm5, %v4094_v24, %v9590_v59  ;;  %v618_v29 = vrot.slane %v9800_v62, %v9342_v23 }
 0x2bf   :  { %v4271_v45 = vrot.slane %v4264_v14, %v9342_v23  ;;  %v4096_v15 = vpack.c.b16 %v4095_v58, %v4095_v58  ;;  %v4595_v46 = vrot.slane %v4588_v63, %v9348_v39  ;;  %v4399_v13 = vrot.slane %v4392_v61, %v9342_v23 }
 0x2c0   :  { %v977_v7 = vrot.slane %v956_v1, %v9348_v39  ;;  %v639_v8 = vrot.slane %v618_v29, %v9348_v39  ;;  %v11475_v41 = vpack.c.bf16 %v9786_v54, %v9786_v54  ;;  %v758_v59 = vpack.c.bf16 %v756_v31, %v756_v31 }
 0x2c1   :  { %3943 = vrot.lane.b32.xlu1 %v3942_v20, %s9058_s3  ;;  %v4278_v62 = vrot.slane %v4271_v45, %v9342_v23  ;;  %v4103_v30 = vrot.slane %v4096_v15, %v9342_v23  ;;  %v4597_v33 = vunpack.c.l.b16 %v4595_v46  ;;  %v4420_v2 = vrot.slane %v4399_v13, %v9348_v39  ;;  %v1764_v20 = vld [vmem:[#allocation2 + $0x46] sm:$0x1] }
 0x2c2   :  { %v1117_v52 = vrot.slane %v11475_v41, %v9342_v23  ;;  %3775 = vrot.lane.b32.xlu0 %v3774_v37, %s9058_s3  ;;  %v984_v18 = vrot.slane %v977_v7, %v9348_v39  ;;  %v646_v0 = vrot.slane %v639_v8, %v9348_v39  ;;  %v781_v35 = vrot.slane %v758_v59, %v9342_v23  ;;  %v1596_v41 = vld [vmem:[#allocation2 + $0x44] sm:$0x1] }
 0x2c3   :  { %v4110_v28 = vrot.slane %v4103_v30, %v9342_v23  ;;  %v4598_v47 = vrot.slane %v4597_v33, 7  ;;  %v4427_v4 = vrot.slane %v4420_v2, %v9348_v39  ;;  %v1430_v5 = vpack.c.bf16 %v1428_v48, %v1428_v48 }
 0x2c4   :  { %v1124_v54 = vrot.slane %v1117_v52, %v9342_v23  ;;  %v986_v27 = vunpack.c.l.b16 %v984_v18  ;;  %v648_v26 = vunpack.c.l.b16 %v646_v0  ;;  %v788_v53 = vrot.slane %v781_v35, %v9342_v23  ;;  %v2100_v52 = vld [vmem:[#allocation2 + $0x4a] sm:$0x1] }
 0x2c5   :  { %4279 = vrot.lane.b32.xlu1 %v4278_v62, %s9058_s3  ;;  %v4599_v19 = vsel %vm650_vm5, %v4598_v47, %v9592_v60  ;;  %v4429_v9 = vunpack.c.l.b16 %v4427_v4  ;;  %v1453_v44 = vrot.slane %v1430_v5, %v9342_v23  ;;  %v1262_v11 = vpack.c.bf16 %v1260_v43, %v1260_v43 }
 0x2c6   :  { %v1145_v38 = vrot.slane %v1124_v54, %v9348_v39  ;;  %4111 = vrot.lane.b32.xlu0 %v4110_v28, %s9058_s3  ;;  %v4600_v10 = vpack.c.b16 %v4599_v19, %v4599_v19  ;;  %v987_v16 = vrot.slane %v986_v27, 7  ;;  %v649_v34 = vrot.slane %v648_v26, 7  ;;  %v1932_v54 = vld [vmem:[#allocation2 + $0x48] sm:$0x1] }
 0x2c7   :  { %v4430_v57 = vrot.slane %v4429_v9, 7  ;;  %v809_v36 = vrot.slane %v788_v53, %v9348_v39  ;;  %v1460_v17 = vrot.slane %v1453_v44, %v9342_v23  ;;  %v1285_v42 = vrot.slane %v1262_v11, %v9342_v23  ;;  %v2436_v9 = vld [vmem:[#allocation2 + $0x4e] sm:$0x1] }
 0x2c8   :  { %v1152_v6 = vrot.slane %v1145_v38, %v9348_v39  ;;  %v4607_v60 = vrot.slane %v4600_v10, %v9342_v23  ;;  %v988_v51 = vsel %vm650_vm5, %v987_v16, %v9599_v3  ;;  %v651_v24 = vsel %vm650_vm5, %v649_v34, %v9616_v32 }
 0x2c9   :  { %v4431_v63 = vsel %vm650_vm5, %v4430_v57, %v9624_v49  ;;  %v989_v61 = vpack.c.b16 %v988_v51, %v988_v51  ;;  %v652_v1 = vpack.c.b16 %v651_v24, %v651_v24  ;;  %v816_v31 = vrot.slane %v809_v36, %v9348_v39  ;;  %v2268_v36 = vld [vmem:[#allocation2 + $0x4c] sm:$0x1] }
 0x2ca   :  { %v1154_v14 = vunpack.c.l.b16 %v1152_v6  ;;  %v4614_v37 = vrot.slane %v4607_v60, %v9342_v23  ;;  %v4432_v58 = vpack.c.b16 %v4431_v63, %v4431_v63  ;;  %v1481_v45 = vrot.slane %v1460_v17, %v9348_v39 }
 0x2cb   :  { %v996_v3 = vrot.slane %v989_v61, %v9342_v23  ;;  %v659_v15 = vrot.slane %v652_v1, %v9342_v23  ;;  %v818_v32 = vunpack.c.l.b16 %v816_v31  ;;  %v1292_v46 = vrot.slane %v1285_v42, %v9342_v23  ;;  %v11476_v61 = vld [vmem:[#allocation8_spill] sm:$0xff] }
 0x2cc   :  { %v1155_v29 = vrot.slane %v1154_v14, 7  ;;  %4615 = vrot.lane.b32.xlu1 %v4614_v37, %s9058_s3  ;;  %v4439_v49 = vrot.slane %v4432_v58, %v9342_v23  ;;  %v1488_v7 = vrot.slane %v1481_v45, %v9348_v39  ;;  %v1766_v8 = vpack.c.bf16 %v1764_v20, %v1764_v20  ;;  %v2772_v58 = vld [vmem:[#allocation2 + $0x52] sm:$0x1] }
 0x2cd   :  { %v1003_v59 = vrot.slane %v996_v3, %v9342_v23  ;;  %v666_v48 = vrot.slane %v659_v15, %v9342_v23  ;;  %v819_v30 = vrot.slane %v818_v32, 7  ;;  %v1313_v18 = vrot.slane %v1292_v46, %v9348_v39 }
 0x2ce   :  { %v1156_v13 = vsel %vm650_vm5, %v1155_v29, %v9632_v55  ;;  %v4446_v33 = vrot.slane %v4439_v49, %v9342_v23  ;;  %v1490_v2 = vunpack.c.l.b16 %v1488_v7  ;;  %v1789_v0 = vrot.slane %v1766_v8, %v9342_v23 }
 0x2cf   :  { %v1157_v62 = vpack.c.b16 %v1156_v13, %v1156_v13  ;;  %1005 = vst.msk [vmem:[#allocation3 + $0x2] sm:$0x1] %vm304_vm4, %v1003_v59  ;;  %668 = vst.msk [vmem:[#allocation3] sm:$0x1] %vm304_vm4, %v666_v48  ;;  %v820_v35 = vsel %vm650_vm5, %v819_v30, %v9634_v56  ;;  %v1598_v43 = vpack.c.bf16 %v1596_v41, %v1596_v41  ;;  %v11477_v59 = vld [vmem:[#allocation9_spill] sm:$0xff] }
 0x2d0   :  { %v2102_v28 = vpack.c.bf16 %v2100_v52, %v2100_v52  ;;  %4447 = vrot.lane.b32.xlu0 %v4446_v33, %s9058_s3  ;;  %v821_v47 = vpack.c.b16 %v820_v35, %v820_v35  ;;  %v1491_v4 = vrot.slane %v1490_v2, 7  ;;  %v1320_v5 = vrot.slane %v1313_v18, %v9348_v39  ;;  %v2604_v2 = vld [vmem:[#allocation2 + $0x50] sm:$0x1] }
 0x2d1   :  { %v1164_v55 = vrot.slane %v1157_v62, %v9342_v23  ;;  %v1796_v27 = vrot.slane %v1789_v0, %v9342_v23  ;;  %v1621_v38 = vrot.slane %v1598_v43, %v9342_v23  ;;  %v1934_v19 = vpack.c.bf16 %v1932_v54, %v1932_v54 }
 0x2d2   :  { %v2125_v53 = vrot.slane %v2102_v28, %v9342_v23  ;;  %v828_v56 = vrot.slane %v821_v47, %v9342_v23  ;;  %v1492_v44 = vsel %vm650_vm5, %v1491_v4, %v9644_v12  ;;  %v1322_v11 = vunpack.c.l.b16 %v1320_v5  ;;  %v11478_v5 = vld [vmem:[#allocation10_spill] sm:$0xff] }
 0x2d3   :  { %v1171_v26 = vrot.slane %v1164_v55, %v9342_v23  ;;  %v1817_v10 = vrot.slane %v1796_v27, %v9348_v39  ;;  %v1493_v16 = vpack.c.b16 %v1492_v44, %v1492_v44  ;;  %v1628_v34 = vrot.slane %v1621_v38, %v9342_v23 }
 0x2d4   :  { %v2132_v6 = vrot.slane %v2125_v53, %v9342_v23  ;;  %v1957_v57 = vrot.slane %v1934_v19, %v9342_v23  ;;  %v835_v17 = vrot.slane %v828_v56, %v9342_v23  ;;  %v1323_v42 = vrot.slane %v1322_v11, 7 }
 0x2d5   :  { %1173 = vst.msk [vmem:[#allocation3 + $0x3] sm:$0x1] %vm304_vm4, %v1171_v26  ;;  %v1824_v60 = vrot.slane %v1817_v10, %v9348_v39  ;;  %v2438_v51 = vpack.c.bf16 %v2436_v9, %v2436_v9  ;;  %v1500_v12 = vrot.slane %v1493_v16, %v9342_v23  ;;  %v1649_v24 = vrot.slane %v1628_v34, %v9348_v39  ;;  %v11479_v26 = vld [vmem:[#allocation11_spill] sm:$0xff] }
 0x2d6   :  { %v2153_v14 = vrot.slane %v2132_v6, %v9348_v39  ;;  %v1964_v63 = vrot.slane %v1957_v57, %v9342_v23  ;;  %837 = vst.msk [vmem:[#allocation3 + $0x1] sm:$0x1] %vm304_vm4, %v835_v17  ;;  %v1324_v1 = vsel %vm650_vm5, %v1323_v42, %v11476_v61  ;;  %v2270_v37 = vpack.c.bf16 %v2268_v36, %v2268_v36  ;;  %v3108_v6 = vld [vmem:[#allocation2 + $0x56] sm:$0x1]  ;;  %v11480_v17 = vld [vmem:[#allocation14_spill] sm:$0xff] }
 0x2d7   :  { %v1826_v31 = vunpack.c.l.b16 %v1824_v60  ;;  %v2461_v20 = vrot.slane %v2438_v51, %v9342_v23  ;;  %v1507_v29 = vrot.slane %v1500_v12, %v9342_v23  ;;  %v1325_v45 = vpack.c.b16 %v1324_v1, %v1324_v1  ;;  %v3444_v61 = vld [vmem:[#allocation2 + $0x5a] sm:$0x1] }
 0x2d8   :  { %v1656_v3 = vrot.slane %v1649_v24, %v9348_v39  ;;  %v2160_v15 = vrot.slane %v2153_v14, %v9348_v39  ;;  %v1985_v46 = vrot.slane %v1964_v63, %v9348_v39  ;;  %v2293_v13 = vrot.slane %v2270_v37, %v9342_v23  ;;  %v2940_v63 = vld [vmem:[#allocation2 + $0x54] sm:$0x1] }
 0x2d9   :  { %v1827_v32 = vrot.slane %v1826_v31, 7  ;;  %v2468_v49 = vrot.slane %v2461_v20, %v9342_v23  ;;  %1509 = vst.msk [vmem:[#allocation3 + $0x5] sm:$0x1] %vm304_vm4, %v1507_v29  ;;  %v1332_v7 = vrot.slane %v1325_v45, %v9342_v23  ;;  %v2774_v52 = vpack.c.bf16 %v2772_v58, %v2772_v58  ;;  %v11481_v20 = vld [vmem:[#allocation15_spill] sm:$0xff] }
 0x2da   :  { %v1658_v8 = vunpack.c.l.b16 %v1656_v3  ;;  %v2162_v41 = vunpack.c.l.b16 %v2160_v15  ;;  %v1992_v62 = vrot.slane %v1985_v46, %v9348_v39  ;;  %v2300_v33 = vrot.slane %v2293_v13, %v9342_v23 }
 0x2db   :  { %v1828_v48 = vsel %vm650_vm5, %v1827_v32, %v11477_v59  ;;  %v2489_v30 = vrot.slane %v2468_v49, %v9348_v39  ;;  %v1339_v18 = vrot.slane %v1332_v7, %v9342_v23  ;;  %v2797_v47 = vrot.slane %v2774_v52, %v9342_v23  ;;  %v3276_v7 = vld [vmem:[#allocation2 + $0x58] sm:$0x1] }
 0x2dc   :  { %v1829_v0 = vpack.c.b16 %v1828_v48, %v1828_v48  ;;  %v1659_v54 = vrot.slane %v1658_v8, 7  ;;  %v2163_v55 = vrot.slane %v2162_v41, 7  ;;  %v1994_v35 = vunpack.c.l.b16 %v1992_v62  ;;  %v11482_v52 = vld [vmem:[#allocation16_spill] sm:$0xff] }
 0x2dd   :  { %v2496_v43 = vrot.slane %v2489_v30, %v9348_v39  ;;  %v2321_v28 = vrot.slane %v2300_v33, %v9348_v39  ;;  %1341 = vst.msk [vmem:[#allocation3 + $0x4] sm:$0x1] %vm304_vm4, %v1339_v18  ;;  %v2606_v53 = vpack.c.bf16 %v2604_v2, %v2604_v2  ;;  %v2804_v16 = vrot.slane %v2797_v47, %v9342_v23  ;;  %v3780_v18 = vld [vmem:[#allocation2 + $0x5e] sm:$0x1] }
 0x2de   :  { %v1836_v4 = vrot.slane %v1829_v0, %v9342_v23  ;;  %v1660_v27 = vsel %vm650_vm5, %v1659_v54, %v11478_v5  ;;  %v2164_v38 = vsel %vm650_vm5, %v2163_v55, %v11479_v26  ;;  %v1995_v56 = vrot.slane %v1994_v35, 7  ;;  %v11483_v5 = vld [vmem:[#allocation18_spill] sm:$0xff] }
 0x2df   :  { %v1661_v19 = vpack.c.b16 %v1660_v27, %v1660_v27  ;;  %v2165_v9 = vpack.c.b16 %v2164_v38, %v2164_v38  ;;  %v2498_v44 = vunpack.c.l.b16 %v2496_v43  ;;  %v2328_v10 = vrot.slane %v2321_v28, %v9348_v39 }
 0x2e0   :  { %v1843_v11 = vrot.slane %v1836_v4, %v9342_v23  ;;  %v2629_v34 = vrot.slane %v2606_v53, %v9342_v23  ;;  %v1996_v42 = vsel %vm650_vm5, %v1995_v56, %v11480_v17  ;;  %v2825_v24 = vrot.slane %v2804_v16, %v9348_v39 }
 0x2e1   :  { %v1668_v57 = vrot.slane %v1661_v19, %v9342_v23  ;;  %v2172_v36 = vrot.slane %v2165_v9, %v9342_v23  ;;  %v2499_v60 = vrot.slane %v2498_v44, 7  ;;  %v1997_v51 = vpack.c.b16 %v1996_v42, %v1996_v42  ;;  %v3612_v19 = vld [vmem:[#allocation2 + $0x5c] sm:$0x1] }
 0x2e2   :  { %1845 = vst.msk [vmem:[#allocation3 + $0x7] sm:$0x1] %vm304_vm4, %v1843_v11  ;;  %v2330_v12 = vunpack.c.l.b16 %v2328_v10  ;;  %v2636_v14 = vrot.slane %v2629_v34, %v9342_v23  ;;  %v3110_v58 = vpack.c.bf16 %v3108_v6, %v3108_v6  ;;  %v2832_v15 = vrot.slane %v2825_v24, %v9348_v39 }
 0x2e3   :  { %v1675_v1 = vrot.slane %v1668_v57, %v9342_v23  ;;  %v2179_v31 = vrot.slane %v2172_v36, %v9342_v23  ;;  %v2500_v37 = vsel %vm650_vm5, %v2499_v60, %v11481_v20  ;;  %v2004_v29 = vrot.slane %v1997_v51, %v9342_v23  ;;  %v11484_v36 = vld [vmem:[#allocation19_spill] sm:$0xff] }
 0x2e4   :  { %v2501_v45 = vpack.c.b16 %v2500_v37, %v2500_v37  ;;  %v2331_v3 = vrot.slane %v2330_v12, 7  ;;  %v2657_v32 = vrot.slane %v2636_v14, %v9348_v39  ;;  %v3133_v46 = vrot.slane %v3110_v58, %v9342_v23 }
 0x2e5   :  { %1677 = vst.msk [vmem:[#allocation3 + $0x6] sm:$0x1] %vm304_vm4, %v1675_v1  ;;  %2181 = vst.msk [vmem:[#allocation3 + $0x9] sm:$0x1] %vm304_vm4, %v2179_v31  ;;  %v2942_v49 = vpack.c.bf16 %v2940_v63, %v2940_v63  ;;  %v3446_v13 = vpack.c.bf16 %v3444_v61, %v3444_v61  ;;  %v2011_v8 = vrot.slane %v2004_v29, %v9342_v23  ;;  %v2834_v48 = vunpack.c.l.b16 %v2832_v15  ;;  %v4116_v63 = vld [vmem:[#allocation2 + $0x62] sm:$0x1] }
 0x2e6   :  { %v2508_v41 = vrot.slane %v2501_v45, %v9342_v23  ;;  %v2332_v59 = vsel %vm650_vm5, %v2331_v3, %v11482_v52  ;;  %v2664_v30 = vrot.slane %v2657_v32, %v9348_v39  ;;  %v3140_v33 = vrot.slane %v3133_v46, %v9342_v23  ;;  %v11485_v3 = vld [vmem:[#allocation20_spill] sm:$0xff] }
 0x2e7   :  { %v2333_v62 = vpack.c.b16 %v2332_v59, %v2332_v59  ;;  %v2965_v2 = vrot.slane %v2942_v49, %v9342_v23  ;;  %2013 = vst.msk [vmem:[#allocation3 + $0x8] sm:$0x1] %vm304_vm4, %v2011_v8  ;;  %v2835_v54 = vrot.slane %v2834_v48, 7  ;;  %v3469_v55 = vrot.slane %v3446_v13, %v9342_v23  ;;  %v3948_v13 = vld [vmem:[#allocation2 + $0x60] sm:$0x1] }
 0x2e8   :  { %v2515_v0 = vrot.slane %v2508_v41, %v9342_v23  ;;  %v3278_v35 = vpack.c.bf16 %v3276_v7, %v3276_v7  ;;  %v2666_v28 = vunpack.c.l.b16 %v2664_v30  ;;  %v3161_v47 = vrot.slane %v3140_v33, %v9348_v39 }
 0x2e9   :  { %v2340_v43 = vrot.slane %v2333_v62, %v9342_v23  ;;  %v2972_v4 = vrot.slane %v2965_v2, %v9342_v23  ;;  %v2836_v27 = vsel %vm650_vm5, %v2835_v54, %v11483_v5  ;;  %v3476_v26 = vrot.slane %v3469_v55, %v9342_v23  ;;  %v11486_v2 = vld [vmem:[#allocation21_spill] sm:$0xff] }
 0x2ea   :  { %2517 = vst.msk [vmem:[#allocation3 + $0xb] sm:$0x1] %vm304_vm4, %v2515_v0  ;;  %v3301_v38 = vrot.slane %v3278_v35, %v9342_v23  ;;  %v3782_v53 = vpack.c.bf16 %v3780_v18, %v3780_v18  ;;  %v2837_v56 = vpack.c.b16 %v2836_v27, %v2836_v27  ;;  %v2667_v44 = vrot.slane %v2666_v28, 7  ;;  %v11487_v0 = vld [vmem:[#allocation22_spill] sm:$0xff] }
 0x2eb   :  { %v2347_v9 = vrot.slane %v2340_v43, %v9342_v23  ;;  %v3168_v11 = vrot.slane %v3161_v47, %v9348_v39  ;;  %v2993_v10 = vrot.slane %v2972_v4, %v9348_v39  ;;  %v3497_v16 = vrot.slane %v3476_v26, %v9348_v39 }
 0x2ec   :  { %v3308_v34 = vrot.slane %v3301_v38, %v9342_v23  ;;  %v3805_v6 = vrot.slane %v3782_v53, %v9342_v23  ;;  %v2844_v57 = vrot.slane %v2837_v56, %v9342_v23  ;;  %v2668_v17 = vsel %vm650_vm5, %v2667_v44, %v11484_v36  ;;  %v4452_v38 = vld [vmem:[#allocation2 + $0x66] sm:$0x1] }
 0x2ed   :  { %2349 = vst.msk [vmem:[#allocation3 + $0xa] sm:$0x1] %vm304_vm4, %v2347_v9  ;;  %v3170_v42 = vunpack.c.l.b16 %v3168_v11  ;;  %v3614_v60 = vpack.c.bf16 %v3612_v19, %v3612_v19  ;;  %v2669_v51 = vpack.c.b16 %v2668_v17, %v2668_v17  ;;  %v3000_v12 = vrot.slane %v2993_v10, %v9348_v39 }
 0x2ee   :  { %v3504_v24 = vrot.slane %v3497_v16, %v9348_v39  ;;  %v3329_v14 = vrot.slane %v3308_v34, %v9348_v39  ;;  %v2851_v61 = vrot.slane %v2844_v57, %v9342_v23  ;;  %v3812_v31 = vrot.slane %v3805_v6, %v9342_v23  ;;  %v4284_v34 = vld [vmem:[#allocation2 + $0x64] sm:$0x1] }
 0x2ef   :  { %v3171_v1 = vrot.slane %v3170_v42, 7  ;;  %v3637_v20 = vrot.slane %v3614_v60, %v9342_v23  ;;  %v2676_v37 = vrot.slane %v2669_v51, %v9342_v23  ;;  %v3002_v58 = vunpack.c.l.b16 %v3000_v12 }
 0x2f0   :  { %v3506_v29 = vunpack.c.l.b16 %v3504_v24  ;;  %v3336_v45 = vrot.slane %v3329_v14, %v9348_v39  ;;  %2853 = vst.msk [vmem:[#allocation3 + $0xd] sm:$0x1] %vm304_vm4, %v2851_v61  ;;  %v3833_v32 = vrot.slane %v3812_v31, %v9348_v39  ;;  %v4118_v49 = vpack.c.bf16 %v4116_v63, %v4116_v63 }
 0x2f1   :  { %v3172_v15 = vsel %vm650_vm5, %v3171_v1, %v11485_v3  ;;  %v3644_v46 = vrot.slane %v3637_v20, %v9342_v23  ;;  %v2683_v7 = vrot.slane %v2676_v37, %v9342_v23  ;;  %v3003_v41 = vrot.slane %v3002_v58, 7 }
 0x2f2   :  { %v3173_v8 = vpack.c.b16 %v3172_v15, %v3172_v15  ;;  %v3507_v52 = vrot.slane %v3506_v29, 7  ;;  %v3338_v59 = vunpack.c.l.b16 %v3336_v45  ;;  %v3840_v48 = vrot.slane %v3833_v32, %v9348_v39 }
 0x2f3   :  { %v3665_v62 = vrot.slane %v3644_v46, %v9348_v39  ;;  %v4141_v30 = vrot.slane %v4118_v49, %v9342_v23  ;;  %2685 = vst.msk [vmem:[#allocation3 + $0xc] sm:$0x1] %vm304_vm4, %v2683_v7  ;;  %v3004_v18 = vsel %vm650_vm5, %v3003_v41, %v11486_v2  ;;  %v3950_v55 = vpack.c.bf16 %v3948_v13, %v3948_v13 }
 0x2f4   :  { %v3180_v33 = vrot.slane %v3173_v8, %v9342_v23  ;;  %v3508_v54 = vsel %vm650_vm5, %v3507_v52, %v11487_v0  ;;  %v3005_v35 = vpack.c.b16 %v3004_v18, %v3004_v18  ;;  %v3339_v28 = vrot.slane %v3338_v59, 7  ;;  %v11490_v8 = vld [vmem:[#allocation17_spill] sm:$0xff]  ;;  %v11492_v59 = vld [vmem:[#allocation23_spill] sm:$0xff] }
 0x2f5   :  { %v3509_v43 = vpack.c.b16 %v3508_v54, %v3508_v54  ;;  %v3842_v47 = vunpack.c.l.b16 %v3840_v48  ;;  %v3672_v5 = vrot.slane %v3665_v62, %v9348_v39  ;;  %v4148_v27 = vrot.slane %v4141_v30, %v9342_v23  ;;  %v11493_v62 = vld [vmem:[#allocation13_spill] sm:$0xff] }
 0x2f6   :  { %v3187_v4 = vrot.slane %v3180_v33, %v9342_v23  ;;  %v3973_v26 = vrot.slane %v3950_v55, %v9342_v23  ;;  %v3012_v53 = vrot.slane %v3005_v35, %v9342_v23  ;;  %v3340_v9 = vsel %vm650_vm5, %v3339_v28, %v9925_v22 }
 0x2f7   :  { %v3516_v19 = vrot.slane %v3509_v43, %v9342_v23  ;;  %v3843_v56 = vrot.slane %v3842_v47, 7  ;;  %v3341_v44 = vpack.c.b16 %v3340_v9, %v3340_v9  ;;  %v3674_v11 = vunpack.c.l.b16 %v3672_v5 }
 0x2f8   :  { %3189 = vst.msk [vmem:[#allocation3 + $0xf] sm:$0x1] %vm304_vm4, %v3187_v4  ;;  %v4169_v10 = vrot.slane %v4148_v27, %v9348_v39  ;;  %v3980_v16 = vrot.slane %v3973_v26, %v9342_v23  ;;  %v3019_v6 = vrot.slane %v3012_v53, %v9342_v23  ;;  %v4454_v17 = vpack.c.bf16 %v4452_v38, %v4452_v38 }
 0x2f9   :  { %v3523_v57 = vrot.slane %v3516_v19, %v9342_v23  ;;  %v3844_v36 = vsel %vm650_vm5, %v3843_v56, %v9945_v21  ;;  %v3348_v22 = vrot.slane %v3341_v44, %v9342_v23  ;;  %v3675_v60 = vrot.slane %v3674_v11, 7 }
 0x2fa   :  { %v3845_v42 = vpack.c.b16 %v3844_v36, %v3844_v36  ;;  %v4176_v51 = vrot.slane %v4169_v10, %v9348_v39  ;;  %3021 = vst.msk [vmem:[#allocation3 + $0xe] sm:$0x1] %vm304_vm4, %v3019_v6  ;;  %v4001_v12 = vrot.slane %v3980_v16, %v9348_v39  ;;  %v4477_v24 = vrot.slane %v4454_v17, %v9342_v23 }
 0x2fb   :  { %3525 = vst.msk [vmem:[#allocation3 + $0x11] sm:$0x1] %vm304_vm4, %v3523_v57  ;;  %v4286_v14 = vpack.c.bf16 %v4284_v34, %v4284_v34  ;;  %v4692_v21 = vrot.slane %v4685_v50, %v9342_v23  ;;  %v3355_v63 = vrot.slane %v3348_v22, %v9342_v23  ;;  %v3676_v1 = vsel %vm650_vm5, %v3675_v60, %v10030_v25  ;;  %v11488_v50 = vld [vmem:[#allocation12_spill] sm:$0xff] }
 0x2fc   :  { %v3852_v61 = vrot.slane %v3845_v42, %v9342_v23  ;;  %v4178_v31 = vunpack.c.l.b16 %v4176_v51  ;;  %v3677_v20 = vpack.c.b16 %v3676_v1, %v3676_v1  ;;  %v4008_v37 = vrot.slane %v4001_v12, %v9348_v39 }
 0x2fd   :  { %v4484_v58 = vrot.slane %v4477_v24, %v9342_v23  ;;  %v4309_v29 = vrot.slane %v4286_v14, %v9342_v23  ;;  %3357 = vst.msk [vmem:[#allocation3 + $0x10] sm:$0x1] %vm304_vm4, %v3355_v63  ;;  %v11489_v45 = vrot.slane %v11488_v50, %v9348_v39  ;;  %v4699_v32 = vrot.slane %v4692_v21, %v9342_v23 }
 0x2fe   :  { %v3859_v40 = vrot.slane %v3852_v61, %v9342_v23  ;;  %v4179_v15 = vrot.slane %v4178_v31, 7  ;;  %v3684_v25 = vrot.slane %v3677_v20, %v9342_v23  ;;  %v4010_v46 = vunpack.c.l.b16 %v4008_v37 }
 0x2ff   :  { %v4177_v3 = vunpack.c.l.b16 %v11489_v45  ;;  %v4505_v49 = vrot.slane %v4484_v58, %v9348_v39  ;;  %v4316_v13 = vrot.slane %v4309_v29, %v9342_v23  ;;  %v11491_v41 = vrot.slane %v11490_v8, %v9348_v39  ;;  %4701 = vst.msk [vmem:[#allocation3 + $0x18] sm:$0x1] %vm304_vm4, %v4699_v32 }
 0x300   :  { %3861 = vst.msk [vmem:[#allocation3 + $0x13] sm:$0x1] %vm304_vm4, %v3859_v40  ;;  %v4498_v48 = vrot.slane %v11492_v59, %v9348_v39  ;;  %v11494_v30 = vrot.slane %v11493_v62, %v9342_v23  ;;  %v3691_v2 = vrot.slane %v3684_v25, %v9342_v23  ;;  %v4011_v0 = vrot.slane %v4010_v46, 7  ;;  %v8537_v40 = vld [vmem:[%s11447_s4 + $0x270] ss:$8 sps:$4 sm:$0xff]  }
 0x301   :  { %v4180_v7 = vsel %vm650_vm5, %v4179_v15, %v4177_v3  ;;  %v4009_v52 = vunpack.c.l.b16 %v11491_v41  ;;  %v4512_v54 = vrot.slane %v4505_v49, %v9348_v39  ;;  %v4337_v55 = vrot.slane %v4316_v13, %v9348_v39  ;;  %v1088_v47 = vpop.permute.xlu1 %1087  ;;  %v751_v4 = vpop.permute.xlu0 %750  ;;  %v8540_v25 = vld [vmem:[%s11447_s4 + $0x370] ss:$8 sps:$4 sm:$0xff]   ;;  %v8545_v46 = vld [vmem:[%s11447_s4 + $0x264] ss:$8 sps:$4 sm:$0xff]   ;;  %v8551_v59 = vld [vmem:[%s11447_s4 + $0x254] ss:$8 sps:$4 sm:$0xff]  }
 0x302   :  { %v4323_v33 = vrot.slane %v11494_v30, %v9348_v39  ;;  %v4181_v18 = vpack.c.b16 %v4180_v7, %v4180_v7  ;;  %3693 = vst.msk [vmem:[#allocation3 + $0x12] sm:$0x1] %vm304_vm4, %v3691_v2  ;;  %v4513_v53 = vunpack.c.l.b16 %v4498_v48  ;;  %v8548_v13 = vld [vmem:[%s11447_s4 + $0x364] ss:$8 sps:$4 sm:$0xff]   ;;  %v8543_v7 = vld [vmem:[%s11447_s4 + $0x260] ss:$8 sps:$4 sm:$0xff]  }
 0x303   :  { %v4012_v43 = vsel %vm650_vm5, %v4011_v0, %v4009_v52  ;;  %v4514_v28 = vunpack.c.l.b16 %v4512_v54  ;;  %v4344_v26 = vrot.slane %v4337_v55, %v9348_v39  ;;  %1090 = vst.msk [vmem:[#allocation3 + $0x2] sm:$0x1] %vm753_vm6, %v1088_v47  ;;  %754 = vst.msk [vmem:[#allocation3] sm:$0x1] %vm753_vm6, %v751_v4  ;;  %v8546_v48 = vld [vmem:[%s11447_s4 + $0x360] ss:$8 sps:$4 sm:$0xff]  }
 0x304   :  { %v4188_v35 = vrot.slane %v4181_v18, %v9342_v23  ;;  %v4013_v5 = vpack.c.b16 %v4012_v43, %v4012_v43  ;;  %v4330_v27 = vrot.slane %v4323_v33, %v9348_v39  ;;  %v8554_v62 = vld [vmem:[%s11447_s4 + $0x354] ss:$8 sps:$4 sm:$0xff]   ;;  %v8549_v30 = vld [vmem:[%s11447_s4 + $0x250] ss:$8 sps:$4 sm:$0xff]   ;;  %v8557_v33 = vld [vmem:[%s11447_s4 + $0x244] ss:$8 sps:$4 sm:$0xff]  }
 0x305   :  { %v4515_v19 = vrot.slane %v4514_v28, 7  ;;  %v4346_v56 = vunpack.c.l.b16 %v4344_v26  ;;  %v1256_v11 = vpop.permute.xlu1 %1255  ;;  %v920_v10 = vpop.permute.xlu0 %919  ;;  %v8552_v2 = vld [vmem:[%s11447_s4 + $0x350] ss:$8 sps:$4 sm:$0xff]   ;;  %v8560_v18 = vld [vmem:[%s11447_s4 + $0x344] ss:$8 sps:$4 sm:$0xff]  }
 0x306   :  { %v4195_v38 = vrot.slane %v4188_v35, %v9342_v23  ;;  %v4020_v9 = vrot.slane %v4013_v5, %v9342_v23  ;;  %v4345_v34 = vunpack.c.l.b16 %v4330_v27  ;;  %1258 = vst.msk [vmem:[#allocation3 + $0x3] sm:$0x1] %vm753_vm6, %v1256_v11  ;;  %922 = vst.msk [vmem:[#allocation3 + $0x1] sm:$0x1] %vm753_vm6, %v920_v10  ;;  %v8555_v54 = vld [vmem:[%s11447_s4 + $0x240] ss:$8 sps:$4 sm:$0xff]  }
 0x307   :  { %v4516_v44 = vsel %vm650_vm5, %v4515_v19, %v4513_v53  ;;  %v4347_v6 = vrot.slane %v4346_v56, 7  ;;  %v8563_v55 = vld [vmem:[%s11447_s4 + $0x234] ss:$8 sps:$4 sm:$0xff]   ;;  %v8558_v35 = vld [vmem:[%s11447_s4 + $0x340] ss:$8 sps:$4 sm:$0xff]  }
 0x308   :  { %4197 = vst.msk [vmem:[#allocation3 + $0x15] sm:$0x1] %vm304_vm4, %v4195_v38  ;;  %v4027_v16 = vrot.slane %v4020_v9, %v9342_v23  ;;  %v4517_v39 = vpack.c.b16 %v4516_v44, %v4516_v44  ;;  %v8566_v43 = vld [vmem:[%s11447_s4 + $0x334] ss:$8 sps:$4 sm:$0xff]   ;;  %v8561_v47 = vld [vmem:[%s11447_s4 + $0x230] ss:$8 sps:$4 sm:$0xff]  }
 0x309   :  { %v4348_v36 = vsel %vm650_vm5, %v4347_v6, %v4345_v34  ;;  %v1592_v22 = vpop.permute.xlu1 %1591  ;;  %v1424_v42 = vpop.permute.xlu0 %1423  ;;  %v8569_v4 = vld [vmem:[%s11447_s4 + $0x224] ss:$8 sps:$4 sm:$0xff]   ;;  %v8564_v5 = vld [vmem:[%s11447_s4 + $0x330] ss:$8 sps:$4 sm:$0xff]   ;;  %v8567_v53 = vld [vmem:[%s11447_s4 + $0x220] ss:$8 sps:$4 sm:$0xff]  }
 0x30a   :  { %4029 = vst.msk [vmem:[#allocation3 + $0x14] sm:$0x1] %vm304_vm4, %v4027_v16  ;;  %v4524_v57 = vrot.slane %v4517_v39, %v9342_v23  ;;  %v4349_v17 = vpack.c.b16 %v4348_v36, %v4348_v36  ;;  %v8572_v26 = vld [vmem:[%s11447_s4 + $0x324] ss:$8 sps:$4 sm:$0xff]   ;;  %v8575_v19 = vld [vmem:[%s11447_s4 + $0x214] ss:$8 sps:$4 sm:$0xff]  }
 0x30b   :  { %1594 = vst.msk [vmem:[#allocation3 + $0x5] sm:$0x1] %vm753_vm6, %v1592_v22  ;;  %1426 = vst.msk [vmem:[#allocation3 + $0x4] sm:$0x1] %vm753_vm6, %v1424_v42  ;;  %v8570_v9 = vld [vmem:[%s11447_s4 + $0x320] ss:$8 sps:$4 sm:$0xff]  }
 0x30c   :  { %v4531_v60 = vrot.slane %v4524_v57, %v9342_v23  ;;  %v4356_v51 = vrot.slane %v4349_v17, %v9342_v23  ;;  %v8578_v44 = vld [vmem:[%s11447_s4 + $0x314] ss:$8 sps:$4 sm:$0xff]   ;;  %v8573_v10 = vld [vmem:[%s11447_s4 + $0x210] ss:$8 sps:$4 sm:$0xff]   ;;  %v8581_v16 = vld [vmem:[%s11447_s4 + $0x204] ss:$8 sps:$4 sm:$0xff]  }
 0x30d   :  { %v1928_v24 = vpop.permute.xlu1 %1927  ;;  %v8576_v39 = vld [vmem:[%s11447_s4 + $0x310] ss:$8 sps:$4 sm:$0xff]   ;;  %v8584_v6 = vld [vmem:[%s11447_s4 + $0x304] ss:$8 sps:$4 sm:$0xff]   ;;  %v8579_v36 = vld [vmem:[%s11447_s4 + $0x200] ss:$8 sps:$4 sm:$0xff]  }
 0x30e   :  { %4533 = vst.msk [vmem:[#allocation3 + $0x17] sm:$0x1] %vm304_vm4, %v4531_v60  ;;  %v4363_v12 = vrot.slane %v4356_v51, %v9342_v23  ;;  %v1760_v14 = vpop.permute.xlu0 %1759  ;;  %v8587_v17 = vld [vmem:[%s11447_s4 + $0x2f4] ss:$8 sps:$4 sm:$0xff]   ;;  %v8582_v22 = vld [vmem:[%s11447_s4 + $0x300] ss:$8 sps:$4 sm:$0xff]  }
 0x30f   :  { %1930 = vst.msk [vmem:[#allocation3 + $0x7] sm:$0x1] %vm753_vm6, %v1928_v24  ;;  %1762 = vst.msk [vmem:[#allocation3 + $0x6] sm:$0x1] %vm753_vm6, %v1760_v14  ;;  %v8590_v42 = vld [vmem:[%s11447_s4 + $0x3f4] ss:$8 sps:$4 sm:$0xff]  }
 0x310   :  { %4365 = vst.msk [vmem:[#allocation3 + $0x16] sm:$0x1] %vm304_vm4, %v4363_v12  ;;  %v8585_v60 = vld [vmem:[%s11447_s4 + $0x2f0] ss:$8 sps:$4 sm:$0xff]   ;;  %v8593_v51 = vld [vmem:[%s11447_s4 + $0x2e4] ss:$8 sps:$4 sm:$0xff]  }
 0x311   :  { %v8588_v24 = vld [vmem:[%s11447_s4 + $0x3f0] ss:$8 sps:$4 sm:$0xff]   ;;  %v8596_v14 = vld [vmem:[%s11447_s4 + $0x3e4] ss:$8 sps:$4 sm:$0xff]  }
 0x316   :  { %v4702_v21 = vld [vmem:[#allocation3] sm:$0xff] }
 0x317   :  { %v5121_v63 = vrot.slane %v4702_v21, %v9342_v23  ;;  %v5114_v61 = vcombine.high %v4702_v21, %v4702_v21  ;;  %v8591_v21 = vld [vmem:[%s11447_s4 + $0x2e0] ss:$8 sps:$4 sm:$0xff]  }
 0x318   :  { %v2264_v1 = vpop.permute.xlu1 %2263  ;;  %v2096_v31 = vpop.permute.xlu0 %2095 }
 0x319   :  { %2266 = vst.msk [vmem:[#allocation3 + $0x9] sm:$0x1] %vm753_vm6, %v2264_v1  ;;  %2098 = vst.msk [vmem:[#allocation3 + $0x8] sm:$0x1] %vm753_vm6, %v2096_v31  ;;  %v5129_v20 = vcombine.high %v5121_v63, %v5121_v63  ;;  %v10378_v37 = vrot.slane %v5114_v61, %v9342_v23  ;;  %v5137_v58 = vrot.slane %v5121_v63, %v9342_v23  ;;  %v8599_v63 = vld [vmem:[%s11447_s4 + $0x2d4] ss:$8 sps:$4 sm:$0xff]  }
 0x31a   :  { %v8594_v1 = vld [vmem:[%s11447_s4 + $0x3e0] ss:$8 sps:$4 sm:$0xff]   ;;  %v8602_v31 = vld [vmem:[%s11447_s4 + $0x3d4] ss:$8 sps:$4 sm:$0xff]  }
 0x31b   :  { %v5151_v29 = vrot.slane %v5129_v20, %v9342_v23  ;;  %v5130_v50 = vcombine.high %v10378_v37, %v10378_v37  ;;  %v5159_v49 = vcombine.high %v5137_v58, %v5137_v58  ;;  %v8597_v20 = vld [vmem:[%s11447_s4 + $0x2d0] ss:$8 sps:$4 sm:$0xff]  }
 0x31c   :  { %v2600_v45 = vpop.permute.xlu1 %2599  ;;  %v2432_v3 = vpop.permute.xlu0 %2431 }
 0x31d   :  { %2602 = vst.msk [vmem:[#allocation3 + $0xb] sm:$0x1] %vm753_vm6, %v2600_v45  ;;  %2434 = vst.msk [vmem:[#allocation3 + $0xa] sm:$0x1] %vm753_vm6, %v2432_v3  ;;  %7294 = vmatprep.mubr.bf16.mxu1 %v5151_v29  ;;  %v5161_v15 = vcombine.high %v5151_v29, %v5151_v29  ;;  %v5158_v32 = vrot.slane %v5130_v50, %v9342_v23  ;;  %v8600_v29 = vld [vmem:[%s11447_s4 + $0x3d0] ss:$8 sps:$4 sm:$0xff]  }
 0x31e   :  { %7295 = vmatmul.mubr.bf16.vlgmr.msra.gmra.mxu1 %v5137_v58  ;;  %v8605_v58 = vld [vmem:[%s11447_s4 + $0x2c4] ss:$8 sps:$4 sm:$0xff]   ;;  %v8603_v50 = vld [vmem:[%s11447_s4 + $0x2c0] ss:$8 sps:$4 sm:$0xff]   ;;  %v8611_v45 = vld [vmem:[%s11447_s4 + $0x2b4] ss:$8 sps:$4 sm:$0xff]  }
 0x31f   :  { %7345 = vmatpush1.bf16.msra.mxu1 %v8537_v40  ;;  %7335 = vmatprep.mubr.bf16.mxu0 %v5161_v15  ;;  %v5162_v8 = vcombine.high %v5158_v32, %v5158_v32  ;;  %v8608_v40 = vld [vmem:[%s11447_s4 + $0x3c4] ss:$8 sps:$4 sm:$0xff]   ;;  %v8606_v3 = vld [vmem:[%s11447_s4 + $0x3c0] ss:$8 sps:$4 sm:$0xff]   ;;  %v8614_v15 = vld [vmem:[%s11447_s4 + $0x3b4] ss:$8 sps:$4 sm:$0xff]  }
 0x320   :  { %v2936_v41 = vpop.permute.xlu1 %2935  ;;  %7376 = vmatprep.mubr.bf16.mxu1 %v5158_v32  ;;  %7336 = vmatmul.mubr.bf16.vlgmr.msra.gmra.mxu0 %v5159_v49  ;;  %v8609_v32 = vld [vmem:[%s11447_s4 + $0x2b0] ss:$8 sps:$4 sm:$0xff]   ;;  %v8620_v49 = vld [vmem:[%s11447_s4 + $0x3a4] ss:$8 sps:$4 sm:$0xff]  }
 0x321   :  { %v2768_v52 = vpop.permute.xlu0 %2767  ;;  %2938 = vst.msk [vmem:[#allocation3 + $0xd] sm:$0x1] %vm753_vm6, %v2936_v41  ;;  %7386 = vmatpush1.bf16.msra.mxu0 %v8540_v25  ;;  %7346 = vmatprep.subr.bf16.mxu1 %v8545_v46  ;;  %v8617_v25 = vld [vmem:[%s11447_s4 + $0x2a4] ss:$8 sps:$4 sm:$0xff]   ;;  %v8612_v46 = vld [vmem:[%s11447_s4 + $0x3b0] ss:$8 sps:$4 sm:$0xff]  }
 0x322   :  { %2770 = vst.msk [vmem:[#allocation3 + $0xc] sm:$0x1] %vm753_vm6, %v2768_v52  ;;  %7417 = vmatprep.mubr.bf16.mxu0 %v5162_v8  ;;  %7387 = vmatprep.subr.bf16.mxu0 %v8548_v13  ;;  %v8615_v13 = vld [vmem:[%s11447_s4 + $0x2a0] ss:$8 sps:$4 sm:$0xff]   ;;  %v8626_v52 = vld [vmem:[%s11447_s4 + $0x394] ss:$8 sps:$4 sm:$0xff]  }
 0x323   :  { %7347 = vmatpush1.bf16.msra.mxu1 %v8543_v7  ;;  %v8623_v7 = vld [vmem:[%s11447_s4 + $0x294] ss:$8 sps:$4 sm:$0xff]   ;;  %v8618_v41 = vld [vmem:[%s11447_s4 + $0x3a0] ss:$8 sps:$4 sm:$0xff]  }
 0x324   :  { %7348 = vmatprep.subr.bf16.mxu1 %v8551_v59  ;;  %v8621_v59 = vld [vmem:[%s11447_s4 + $0x290] ss:$8 sps:$4 sm:$0xff]  }
 0x325   :  { %7388 = vmatpush1.bf16.msra.mxu0 %v8546_v48 }
 0x326   :  { %7389 = vmatprep.subr.bf16.mxu0 %v8554_v62  ;;  %v8629_v62 = vld [vmem:[%s11447_s4 + $0x284] ss:$8 sps:$4 sm:$0xff]  }
 0x327   :  { %7349 = vmatpush1.bf16.msra.mxu1 %v8549_v30  ;;  %v8624_v30 = vld [vmem:[%s11447_s4 + $0x390] ss:$8 sps:$4 sm:$0xff]  }
 0x328   :  { %v3272_v0 = vpop.permute.xlu1 %3271  ;;  %7350 = vmatprep.subr.bf16.mxu1 %v8557_v33  ;;  %v8632_v33 = vld [vmem:[%s11447_s4 + $0x384] ss:$8 sps:$4 sm:$0xff]  }
 0x329   :  { %3274 = vst.msk [vmem:[#allocation3 + $0xf] sm:$0x1] %vm753_vm6, %v3272_v0  ;;  %7390 = vmatpush1.bf16.msra.mxu0 %v8552_v2  ;;  %v8627_v2 = vld [vmem:[%s11447_s4 + $0x280] ss:$8 sps:$4 sm:$0xff]   ;;  %v8635_v0 = vld [vmem:[%s11447_s4 + $0x474] ss:$8 sps:$4 sm:$0xff]  }
 0x32a   :  { %7391 = vmatprep.subr.bf16.mxu0 %v8560_v18 }
 0x32b   :  { %7351 = vmatpush1.bf16.msra.mxu1 %v8555_v54  ;;  %v8630_v54 = vld [vmem:[%s11447_s4 + $0x380] ss:$8 sps:$4 sm:$0xff]  }
 0x32c   :  { %v3104_v28 = vpop.permute.xlu0 %3103  ;;  %7352 = vmatprep.subr.bf16.mxu1 %v8563_v55  ;;  %v5144_v55 = vrot.slane %v10378_v37, %v9342_v23  ;;  %v8636_v37 = vld [vmem:[%s11447_s4 + $0x570] ss:$8 sps:$4 sm:$0xff]  }
 0x32d   :  { %3106 = vst.msk [vmem:[#allocation3 + $0xe] sm:$0x1] %vm753_vm6, %v3104_v28  ;;  %7392 = vmatpush1.bf16.msra.mxu0 %v8558_v35  ;;  %v8638_v35 = vld [vmem:[%s11447_s4 + $0x574] ss:$8 sps:$4 sm:$0xff]  }
 0x32e   :  { %7393 = vmatprep.subr.bf16.mxu0 %v8566_v43  ;;  %v8633_v43 = vld [vmem:[%s11447_s4 + $0x470] ss:$8 sps:$4 sm:$0xff]  }
 0x32f   :  { %v3608_v27 = vpop.permute.xlu1 %3607  ;;  %7353 = vmatpush1.bf16.msra.mxu1 %v8561_v47  ;;  %v8641_v47 = vld [vmem:[%s11447_s4 + $0x464] ss:$8 sps:$4 sm:$0xff]  }
 0x330   :  { %3610 = vst.msk [vmem:[#allocation3 + $0x11] sm:$0x1] %vm753_vm6, %v3608_v27  ;;  %v3440_v38 = vpop.permute.xlu0 %3439  ;;  %7354 = vmatprep.subr.bf16.mxu1 %v8569_v4  ;;  %v5160_v4 = vcombine.high %v5144_v55, %v5144_v55 }
 0x331   :  { %3442 = vst.msk [vmem:[#allocation3 + $0x10] sm:$0x1] %vm753_vm6, %v3440_v38  ;;  %7394 = vmatpush1.bf16.msra.mxu0 %v8564_v5  ;;  %v8644_v5 = vld [vmem:[%s11447_s4 + $0x564] ss:$8 sps:$4 sm:$0xff]   ;;  %v8647_v38 = vld [vmem:[%s11447_s4 + $0x454] ss:$8 sps:$4 sm:$0xff]  }
 0x332   :  { %7395 = vmatprep.subr.bf16.mxu0 %v8572_v26  ;;  %v8639_v26 = vld [vmem:[%s11447_s4 + $0x460] ss:$8 sps:$4 sm:$0xff]  }
 0x333   :  { %v3944_v56 = vpop.permute.xlu1 %3943  ;;  %7355 = vmatpush1.bf16.msra.mxu1 %v8567_v53  ;;  %v8642_v53 = vld [vmem:[%s11447_s4 + $0x560] ss:$8 sps:$4 sm:$0xff]  }
 0x334   :  { %3946 = vst.msk [vmem:[#allocation3 + $0x13] sm:$0x1] %vm753_vm6, %v3944_v56  ;;  %v3776_v11 = vpop.permute.xlu0 %3775  ;;  %7356 = vmatprep.subr.bf16.mxu1 %v8575_v19  ;;  %v10561_v8 = vld [vmem:[#allocation3 + $0x8] sm:$0xff]  ;;  %v8653_v56 = vld [vmem:[%s11447_s4 + $0x444] ss:$8 sps:$4 sm:$0xff]  }
 0x335   :  { %3778 = vst.msk [vmem:[#allocation3 + $0x12] sm:$0x1] %vm753_vm6, %v3776_v11  ;;  %7396 = vmatpush1.bf16.msra.mxu0 %v8570_v9  ;;  %v10574_v48 = vrot.slane %v10561_v8, %v9342_v23  ;;  %v8650_v19 = vld [vmem:[%s11447_s4 + $0x554] ss:$8 sps:$4 sm:$0xff]   ;;  %v8645_v9 = vld [vmem:[%s11447_s4 + $0x450] ss:$8 sps:$4 sm:$0xff]  }
 0x336   :  { %7397 = vmatprep.subr.bf16.mxu0 %v8578_v44  ;;  %v8648_v44 = vld [vmem:[%s11447_s4 + $0x550] ss:$8 sps:$4 sm:$0xff]   ;;  %v8656_v11 = vld [vmem:[%s11447_s4 + $0x544] ss:$8 sps:$4 sm:$0xff]  }
 0x337   :  { %v4280_v34 = vpop.permute.xlu1 %4279  ;;  %7357 = vmatpush1.bf16.msra.mxu1 %v8573_v10  ;;  %v5178_v18 = vcombine.high %v10574_v48, %v10574_v48  ;;  %v8651_v10 = vld [vmem:[%s11447_s4 + $0x440] ss:$8 sps:$4 sm:$0xff]  }
 0x338   :  { %4282 = vst.msk [vmem:[#allocation3 + $0x15] sm:$0x1] %vm753_vm6, %v4280_v34  ;;  %v4112_v57 = vpop.permute.xlu0 %4111  ;;  %7358 = vmatprep.subr.bf16.mxu1 %v8581_v16  ;;  %v8659_v16 = vld [vmem:[%s11447_s4 + $0x434] ss:$8 sps:$4 sm:$0xff]  }
 0x339   :  { %4114 = vst.msk [vmem:[#allocation3 + $0x14] sm:$0x1] %vm753_vm6, %v4112_v57  ;;  %7398 = vmatpush1.bf16.msra.mxu0 %v8576_v39  ;;  %v5200_v28 = vrot.slane %v5178_v18, %v9342_v23  ;;  %v8654_v39 = vld [vmem:[%s11447_s4 + $0x540] ss:$8 sps:$4 sm:$0xff]   ;;  %v8662_v34 = vld [vmem:[%s11447_s4 + $0x534] ss:$8 sps:$4 sm:$0xff]   ;;  %v5163_v18 = vcombine.high %v10561_v8, %v10561_v8 }
 0x33a   :  { %7399 = vmatprep.subr.bf16.mxu0 %v8584_v6  ;;  %v8657_v6 = vld [vmem:[%s11447_s4 + $0x430] ss:$8 sps:$4 sm:$0xff]   ;;  %v8665_v57 = vld [vmem:[%s11447_s4 + $0x424] ss:$8 sps:$4 sm:$0xff]  }
 0x33b   :  { %7359 = vmatpush1.bf16.msra.mxu1 %v8579_v36  ;;  %v5210_v27 = vcombine.high %v5200_v28, %v5200_v28  ;;  %v8660_v36 = vld [vmem:[%s11447_s4 + $0x530] ss:$8 sps:$4 sm:$0xff]  }
 0x33c   :  { %7360 = vmatprep.subr.bf16.mxu1 %v8587_v17  ;;  %v8668_v17 = vld [vmem:[%s11447_s4 + $0x524] ss:$8 sps:$4 sm:$0xff]   ;;  %v8717_v8 = vld [vmem:[%s11447_s4 + $0x490] ss:$8 sps:$4 sm:$0xff]  }
 0x33d   :  { %7400 = vmatpush1.bf16.msra.mxu0 %v8582_v22  ;;  %v8663_v22 = vld [vmem:[%s11447_s4 + $0x420] ss:$8 sps:$4 sm:$0xff]  }
 0x33e   :  { %v4616_v12 = vpop.permute.xlu1 %4615  ;;  %7401 = vmatprep.subr.bf16.mxu0 %v8590_v42  ;;  %v8671_v42 = vld [vmem:[%s11447_s4 + $0x414] ss:$8 sps:$4 sm:$0xff]  }
 0x33f   :  { %4618 = vst.msk [vmem:[#allocation3 + $0x17] sm:$0x1] %vm753_vm6, %v4616_v12  ;;  %7361 = vmatpush2.bf16.msra.mxu1 %v8585_v60  ;;  %v8666_v60 = vld [vmem:[%s11447_s4 + $0x520] ss:$8 sps:$4 sm:$0xff]   ;;  %v8669_v12 = vld [vmem:[%s11447_s4 + $0x410] ss:$8 sps:$4 sm:$0xff]  }
 0x340   :  { %7362 = vmatprep.subr.bf16.mxu1 %v8593_v51  ;;  %v8674_v51 = vld [vmem:[%s11447_s4 + $0x514] ss:$8 sps:$4 sm:$0xff]  }
 0x341   :  { %7402 = vmatpush2.bf16.msra.mxu0 %v8588_v24  ;;  %v8677_v24 = vld [vmem:[%s11447_s4 + $0x404] ss:$8 sps:$4 sm:$0xff]  }
 0x342   :  { %v4448_v61 = vpop.permute.xlu0 %4447  ;;  %7403 = vmatprep.subr.bf16.mxu0 %v8596_v14  ;;  %v8672_v14 = vld [vmem:[%s11447_s4 + $0x510] ss:$8 sps:$4 sm:$0xff]  }
 0x343   :  { %4450 = vst.msk [vmem:[#allocation3 + $0x16] sm:$0x1] %vm753_vm6, %v4448_v61  ;;  %7363 = vmatpush2.bf16.msra.mxu1 %v8591_v21  ;;  %v8680_v21 = vld [vmem:[%s11447_s4 + $0x504] ss:$8 sps:$4 sm:$0xff]   ;;  %v8683_v61 = vld [vmem:[%s11447_s4 + $0x4f4] ss:$8 sps:$4 sm:$0xff]  }
 0x344   :  { %7364 = vmatprep.subr.bf16.mxu1 %v8599_v63  ;;  %v8675_v63 = vld [vmem:[%s11447_s4 + $0x400] ss:$8 sps:$4 sm:$0xff]  }
 0x345   :  { %7404 = vmatpush2.bf16.msra.mxu0 %v8594_v1  ;;  %v8678_v1 = vld [vmem:[%s11447_s4 + $0x500] ss:$8 sps:$4 sm:$0xff]  }
 0x346   :  { %7405 = vmatprep.subr.bf16.mxu0 %v8602_v31  ;;  %v8686_v31 = vld [vmem:[%s11447_s4 + $0x5f4] ss:$8 sps:$4 sm:$0xff]  }
 0x347   :  { %7365 = vmatpush2.bf16.msra.mxu1 %v8597_v20  ;;  %v8681_v20 = vld [vmem:[%s11447_s4 + $0x4f0] ss:$8 sps:$4 sm:$0xff]  }
 0x348   :  { %7366 = vmatprep.subr.bf16.mxu1 %v8605_v58  ;;  %v8689_v58 = vld [vmem:[%s11447_s4 + $0x4e4] ss:$8 sps:$4 sm:$0xff]  }
 0x349   :  { %7406 = vmatpush2.bf16.msra.mxu0 %v8600_v29  ;;  %v8684_v29 = vld [vmem:[%s11447_s4 + $0x5f0] ss:$8 sps:$4 sm:$0xff]  }
 0x34a   :  { %7407 = vmatprep.subr.bf16.mxu0 %v8608_v40  ;;  %v8692_v40 = vld [vmem:[%s11447_s4 + $0x5e4] ss:$8 sps:$4 sm:$0xff]  }
 0x34b   :  { %7367 = vmatpush2.bf16.msra.mxu1 %v8603_v50  ;;  %v8687_v50 = vld [vmem:[%s11447_s4 + $0x4e0] ss:$8 sps:$4 sm:$0xff]  }
 0x34c   :  { %7368 = vmatprep.subr.bf16.mxu1 %v8611_v45  ;;  %v8695_v45 = vld [vmem:[%s11447_s4 + $0x4d4] ss:$8 sps:$4 sm:$0xff]  }
 0x34d   :  { %7408 = vmatpush2.bf16.msra.mxu0 %v8606_v3  ;;  %v8690_v3 = vld [vmem:[%s11447_s4 + $0x5e0] ss:$8 sps:$4 sm:$0xff]  }
 0x34e   :  { %7409 = vmatprep.subr.bf16.mxu0 %v8614_v15  ;;  %v8698_v15 = vld [vmem:[%s11447_s4 + $0x5d4] ss:$8 sps:$4 sm:$0xff]  }
 0x34f   :  { %7369 = vmatpush2.bf16.msra.mxu1 %v8609_v32  ;;  %v8693_v32 = vld [vmem:[%s11447_s4 + $0x4d0] ss:$8 sps:$4 sm:$0xff]  }
 0x350   :  { %7370 = vmatprep.subr.bf16.mxu1 %v8617_v25  ;;  %v8701_v25 = vld [vmem:[%s11447_s4 + $0x4c4] ss:$8 sps:$4 sm:$0xff]  }
 0x351   :  { %7410 = vmatpush2.bf16.msra.mxu0 %v8612_v46  ;;  %v8696_v46 = vld [vmem:[%s11447_s4 + $0x5d0] ss:$8 sps:$4 sm:$0xff]  }
 0x352   :  { %7411 = vmatprep.subr.bf16.mxu0 %v8620_v49  ;;  %v8704_v49 = vld [vmem:[%s11447_s4 + $0x5c4] ss:$8 sps:$4 sm:$0xff]  }
 0x353   :  { %7371 = vmatpush2.bf16.msra.mxu1 %v8615_v13  ;;  %v8699_v13 = vld [vmem:[%s11447_s4 + $0x4c0] ss:$8 sps:$4 sm:$0xff]  }
 0x354   :  { %7372 = vmatprep.subr.bf16.mxu1 %v8623_v7  ;;  %v8707_v7 = vld [vmem:[%s11447_s4 + $0x4b4] ss:$8 sps:$4 sm:$0xff]  }
 0x355   :  { %7412 = vmatpush2.bf16.msra.mxu0 %v8618_v41  ;;  %v8702_v41 = vld [vmem:[%s11447_s4 + $0x5c0] ss:$8 sps:$4 sm:$0xff]  }
 0x356   :  { %7413 = vmatprep.subr.bf16.mxu0 %v8626_v52  ;;  %v8710_v52 = vld [vmem:[%s11447_s4 + $0x5b4] ss:$8 sps:$4 sm:$0xff]  }
 0x357   :  { %7373 = vmatpush2.bf16.msra.mxu1 %v8621_v59  ;;  %v8705_v59 = vld [vmem:[%s11447_s4 + $0x4b0] ss:$8 sps:$4 sm:$0xff]  }
 0x358   :  { %7374 = vmatprep.subr.bf16.mxu1 %v8629_v62  ;;  %v8713_v62 = vld [vmem:[%s11447_s4 + $0x4a4] ss:$8 sps:$4 sm:$0xff]  }
 0x359   :  { %7414 = vmatpush2.bf16.msra.mxu0 %v8624_v30  ;;  %v8708_v30 = vld [vmem:[%s11447_s4 + $0x5b0] ss:$8 sps:$4 sm:$0xff]  }
 0x35a   :  { %7415 = vmatprep.subr.bf16.mxu0 %v8632_v33  ;;  %v8716_v33 = vld [vmem:[%s11447_s4 + $0x5a4] ss:$8 sps:$4 sm:$0xff]  }
 0x35b   :  { %7375 = vmatpush2.bf16.msra.mxu1 %v8627_v2  ;;  %v8711_v2 = vld [vmem:[%s11447_s4 + $0x4a0] ss:$8 sps:$4 sm:$0xff]  }
 0x35c   :  { %7426 = vmatprep.subr.bf16.mxu1 %v8635_v0  ;;  %v8719_v0 = vld [vmem:[%s11447_s4 + $0x494] ss:$8 sps:$4 sm:$0xff]  }
 0x35d   :  { %7416 = vmatpush2.bf16.msra.mxu0 %v8630_v54  ;;  %v8714_v54 = vld [vmem:[%s11447_s4 + $0x5a0] ss:$8 sps:$4 sm:$0xff]  }
 0x35e   :  { %7377 = vmatmul.mubr.bf16.vlgmr.msra.gmra.mxu1 %v5144_v55  ;;  %7467 = vmatprep.subr.bf16.mxu0 %v8638_v35  ;;  %v8722_v55 = vld [vmem:[%s11447_s4 + $0x594] ss:$8 sps:$4 sm:$0xff]   ;;  %v10776_v35 = vrot.slane %v5163_v18, %v9342_v23 }
 0x35f   :  { %7427 = vmatpush1.bf16.msra.mxu1 %v8633_v43  ;;  %7458 = vmatprep.mubr.bf16.mxu1 %v5200_v28  ;;  %v8725_v43 = vld [vmem:[%s11447_s4 + $0x484] ss:$8 sps:$4 sm:$0xff]   ;;  %v8720_v28 = vld [vmem:[%s11447_s4 + $0x590] ss:$8 sps:$4 sm:$0xff]   ;;  %v8804_v18 = vld [vmem:[%s11447_s4 + $0x6b4] ss:$8 sps:$4 sm:$0xff]  }
 0x360   :  { %7418 = vmatmul.mubr.bf16.vlgmr.msra.gmra.mxu0 %v5160_v4  ;;  %7428 = vmatprep.subr.bf16.mxu1 %v8641_v47  ;;  %v8728_v47 = vld [vmem:[%s11447_s4 + $0x584] ss:$8 sps:$4 sm:$0xff]   ;;  %v5179_v4 = vcombine.high %v10776_v35, %v10776_v35 }
 0x361   :  { %7468 = vmatpush1.bf16.msra.mxu0 %v8636_v37  ;;  %7499 = vmatprep.mubr.bf16.mxu0 %v5210_v27  ;;  %v8723_v37 = vld [vmem:[%s11447_s4 + $0x480] ss:$8 sps:$4 sm:$0xff]  }
 0x362   :  { %7469 = vmatprep.subr.bf16.mxu0 %v8644_v5  ;;  %v8731_v5 = vld [vmem:[%s11447_s4 + $0x674] ss:$8 sps:$4 sm:$0xff]   ;;  %v8726_v27 = vld [vmem:[%s11447_s4 + $0x580] ss:$8 sps:$4 sm:$0xff]  }
 0x363   :  { %7429 = vmatpush1.bf16.msra.mxu1 %v8639_v26  ;;  %v5186_v26 = vrot.slane %v10574_v48, %v9342_v23  ;;  %v8733_v48 = vld [vmem:[%s11447_s4 + $0x770] ss:$8 sps:$4 sm:$0xff]  }
 0x364   :  { %7430 = vmatprep.subr.bf16.mxu1 %v8647_v38  ;;  %v8735_v38 = vld [vmem:[%s11447_s4 + $0x774] ss:$8 sps:$4 sm:$0xff]  }
 0x365   :  { %7470 = vmatpush1.bf16.msra.mxu0 %v8642_v53  ;;  %v8729_v53 = vld [vmem:[%s11447_s4 + $0x670] ss:$8 sps:$4 sm:$0xff]  }
 0x366   :  { %7471 = vmatprep.subr.bf16.mxu0 %v8650_v19  ;;  %v5207_v19 = vrot.slane %v5179_v4, %v9342_v23  ;;  %v10966_v4 = vld [vmem:[#allocation3 + $0x10] sm:$0xff] }
 0x367   :  { %7431 = vmatpush1.bf16.msra.mxu1 %v8645_v9  ;;  %v8738_v9 = vld [vmem:[%s11447_s4 + $0x664] ss:$8 sps:$4 sm:$0xff]  }
 0x368   :  { %7432 = vmatprep.subr.bf16.mxu1 %v8653_v56  ;;  %v5208_v56 = vcombine.high %v5186_v26, %v5186_v26 }
 0x369   :  { %7472 = vmatpush1.bf16.msra.mxu0 %v8648_v44  ;;  %v8741_v44 = vld [vmem:[%s11447_s4 + $0x764] ss:$8 sps:$4 sm:$0xff]  }
 0x36a   :  { %7473 = vmatprep.subr.bf16.mxu0 %v8656_v11  ;;  %v5211_v11 = vcombine.high %v5207_v19, %v5207_v19 }
 0x36b   :  { %7433 = vmatpush1.bf16.msra.mxu1 %v8651_v10  ;;  %v8736_v10 = vld [vmem:[%s11447_s4 + $0x660] ss:$8 sps:$4 sm:$0xff]  }
 0x36c   :  { %7434 = vmatprep.subr.bf16.mxu1 %v8659_v16  ;;  %v8744_v16 = vld [vmem:[%s11447_s4 + $0x654] ss:$8 sps:$4 sm:$0xff]  }
 0x36d   :  { %7474 = vmatpush1.bf16.msra.mxu0 %v8654_v39  ;;  %v8739_v39 = vld [vmem:[%s11447_s4 + $0x760] ss:$8 sps:$4 sm:$0xff]  }
 0x36e   :  { %7475 = vmatprep.subr.bf16.mxu0 %v8662_v34  ;;  %v8747_v34 = vld [vmem:[%s11447_s4 + $0x754] ss:$8 sps:$4 sm:$0xff]  }
 0x36f   :  { %7435 = vmatpush1.bf16.msra.mxu1 %v8657_v6  ;;  %v8742_v6 = vld [vmem:[%s11447_s4 + $0x650] ss:$8 sps:$4 sm:$0xff]  }
 0x370   :  { %7436 = vmatprep.subr.bf16.mxu1 %v8665_v57  ;;  %v8750_v57 = vld [vmem:[%s11447_s4 + $0x644] ss:$8 sps:$4 sm:$0xff]  }
 0x371   :  { %7476 = vmatpush1.bf16.msra.mxu0 %v8660_v36  ;;  %v8745_v36 = vld [vmem:[%s11447_s4 + $0x750] ss:$8 sps:$4 sm:$0xff]  }
 0x372   :  { %7477 = vmatprep.subr.bf16.mxu0 %v8668_v17  ;;  %v8753_v17 = vld [vmem:[%s11447_s4 + $0x744] ss:$8 sps:$4 sm:$0xff]  }
 0x373   :  { %7437 = vmatpush1.bf16.msra.mxu1 %v8663_v22  ;;  %v8748_v22 = vld [vmem:[%s11447_s4 + $0x640] ss:$8 sps:$4 sm:$0xff]  }
 0x374   :  { %7438 = vmatprep.subr.bf16.mxu1 %v8671_v42  ;;  %v8756_v42 = vld [vmem:[%s11447_s4 + $0x634] ss:$8 sps:$4 sm:$0xff]  }
 0x375   :  { %7478 = vmatpush1.bf16.msra.mxu0 %v8666_v60  ;;  %v8751_v60 = vld [vmem:[%s11447_s4 + $0x740] ss:$8 sps:$4 sm:$0xff]  }
 0x376   :  { %7479 = vmatprep.subr.bf16.mxu0 %v8674_v51  ;;  %v8759_v51 = vld [vmem:[%s11447_s4 + $0x734] ss:$8 sps:$4 sm:$0xff]  }
 0x377   :  { %7439 = vmatpush1.bf16.msra.mxu1 %v8669_v12  ;;  %v8754_v12 = vld [vmem:[%s11447_s4 + $0x630] ss:$8 sps:$4 sm:$0xff]  }
 0x378   :  { %7440 = vmatprep.subr.bf16.mxu1 %v8677_v24  ;;  %v8762_v24 = vld [vmem:[%s11447_s4 + $0x624] ss:$8 sps:$4 sm:$0xff]  }
 0x379   :  { %7480 = vmatpush1.bf16.msra.mxu0 %v8672_v14  ;;  %v8757_v14 = vld [vmem:[%s11447_s4 + $0x730] ss:$8 sps:$4 sm:$0xff]  }
 0x37a   :  { %7481 = vmatprep.subr.bf16.mxu0 %v8680_v21  ;;  %v8765_v21 = vld [vmem:[%s11447_s4 + $0x724] ss:$8 sps:$4 sm:$0xff]  }
 0x37b   :  { %7441 = vmatpush1.bf16.msra.mxu1 %v8675_v63  ;;  %v8760_v63 = vld [vmem:[%s11447_s4 + $0x620] ss:$8 sps:$4 sm:$0xff]  }
 0x37c   :  { %7442 = vmatprep.subr.bf16.mxu1 %v8683_v61  ;;  %v8768_v61 = vld [vmem:[%s11447_s4 + $0x614] ss:$8 sps:$4 sm:$0xff]  }
 0x37d   :  { %7482 = vmatpush1.bf16.msra.mxu0 %v8678_v1  ;;  %v8763_v1 = vld [vmem:[%s11447_s4 + $0x720] ss:$8 sps:$4 sm:$0xff]  }
 0x37e   :  { %7483 = vmatprep.subr.bf16.mxu0 %v8686_v31  ;;  %v8771_v31 = vld [vmem:[%s11447_s4 + $0x714] ss:$8 sps:$4 sm:$0xff]  }
 0x37f   :  { %7443 = vmatpush2.bf16.msra.mxu1 %v8681_v20  ;;  %v8766_v20 = vld [vmem:[%s11447_s4 + $0x610] ss:$8 sps:$4 sm:$0xff]  }
 0x380   :  { %7444 = vmatprep.subr.bf16.mxu1 %v8689_v58  ;;  %v8774_v58 = vld [vmem:[%s11447_s4 + $0x604] ss:$8 sps:$4 sm:$0xff]  }
 0x381   :  { %7484 = vmatpush2.bf16.msra.mxu0 %v8684_v29  ;;  %v8769_v29 = vld [vmem:[%s11447_s4 + $0x710] ss:$8 sps:$4 sm:$0xff]  }
 0x382   :  { %7485 = vmatprep.subr.bf16.mxu0 %v8692_v40  ;;  %v8777_v40 = vld [vmem:[%s11447_s4 + $0x704] ss:$8 sps:$4 sm:$0xff]  }
 0x383   :  { %7445 = vmatpush2.bf16.msra.mxu1 %v8687_v50  ;;  %v8772_v50 = vld [vmem:[%s11447_s4 + $0x600] ss:$8 sps:$4 sm:$0xff]  }
 0x384   :  { %7446 = vmatprep.subr.bf16.mxu1 %v8695_v45  ;;  %v8780_v45 = vld [vmem:[%s11447_s4 + $0x6f4] ss:$8 sps:$4 sm:$0xff]  }
 0x385   :  { %7486 = vmatpush2.bf16.msra.mxu0 %v8690_v3  ;;  %v8775_v3 = vld [vmem:[%s11447_s4 + $0x700] ss:$8 sps:$4 sm:$0xff]  }
 0x386   :  { %7487 = vmatprep.subr.bf16.mxu0 %v8698_v15  ;;  %v8783_v15 = vld [vmem:[%s11447_s4 + $0x7f4] ss:$8 sps:$4 sm:$0xff]  }
 0x387   :  { %7447 = vmatpush2.bf16.msra.mxu1 %v8693_v32  ;;  %v8778_v32 = vld [vmem:[%s11447_s4 + $0x6f0] ss:$8 sps:$4 sm:$0xff]  }
 0x388   :  { %7448 = vmatprep.subr.bf16.mxu1 %v8701_v25  ;;  %v8786_v25 = vld [vmem:[%s11447_s4 + $0x6e4] ss:$8 sps:$4 sm:$0xff]  }
 0x389   :  { %7488 = vmatpush2.bf16.msra.mxu0 %v8696_v46  ;;  %v8781_v46 = vld [vmem:[%s11447_s4 + $0x7f0] ss:$8 sps:$4 sm:$0xff]  }
 0x38a   :  { %7489 = vmatprep.subr.bf16.mxu0 %v8704_v49  ;;  %v8789_v49 = vld [vmem:[%s11447_s4 + $0x7e4] ss:$8 sps:$4 sm:$0xff]  }
 0x38b   :  { %7449 = vmatpush2.bf16.msra.mxu1 %v8699_v13  ;;  %v8784_v13 = vld [vmem:[%s11447_s4 + $0x6e0] ss:$8 sps:$4 sm:$0xff]  }
 0x38c   :  { %7450 = vmatprep.subr.bf16.mxu1 %v8707_v7  ;;  %v8792_v7 = vld [vmem:[%s11447_s4 + $0x6d4] ss:$8 sps:$4 sm:$0xff]  }
 0x38d   :  { %7490 = vmatpush2.bf16.msra.mxu0 %v8702_v41  ;;  %v8787_v41 = vld [vmem:[%s11447_s4 + $0x7e0] ss:$8 sps:$4 sm:$0xff]  }
 0x38e   :  { %7491 = vmatprep.subr.bf16.mxu0 %v8710_v52  ;;  %v8795_v52 = vld [vmem:[%s11447_s4 + $0x7d4] ss:$8 sps:$4 sm:$0xff]  }
 0x38f   :  { %7451 = vmatpush2.bf16.msra.mxu1 %v8705_v59  ;;  %v8790_v59 = vld [vmem:[%s11447_s4 + $0x6d0] ss:$8 sps:$4 sm:$0xff]  }
 0x390   :  { %7452 = vmatprep.subr.bf16.mxu1 %v8713_v62  ;;  %v8798_v62 = vld [vmem:[%s11447_s4 + $0x6c4] ss:$8 sps:$4 sm:$0xff]  }
 0x391   :  { %7492 = vmatpush2.bf16.msra.mxu0 %v8708_v30  ;;  %v8793_v30 = vld [vmem:[%s11447_s4 + $0x7d0] ss:$8 sps:$4 sm:$0xff]  }
 0x392   :  { %7493 = vmatprep.subr.bf16.mxu0 %v8716_v33  ;;  %v8801_v33 = vld [vmem:[%s11447_s4 + $0x7c4] ss:$8 sps:$4 sm:$0xff]  }
 0x393   :  { %7453 = vmatpush2.bf16.msra.mxu1 %v8711_v2  ;;  %v8796_v2 = vld [vmem:[%s11447_s4 + $0x6c0] ss:$8 sps:$4 sm:$0xff]  }
 0x394   :  { %7454 = vmatprep.subr.bf16.mxu1 %v8719_v0  ;;  %v8799_v0 = vld [vmem:[%s11447_s4 + $0x7c0] ss:$8 sps:$4 sm:$0xff]  }
 0x395   :  { %7494 = vmatpush2.bf16.msra.mxu0 %v8714_v54  ;;  %v8807_v54 = vld [vmem:[%s11447_s4 + $0x7b4] ss:$8 sps:$4 sm:$0xff]  }
 0x396   :  { %7495 = vmatprep.subr.bf16.mxu0 %v8722_v55  ;;  %v8802_v55 = vld [vmem:[%s11447_s4 + $0x6b0] ss:$8 sps:$4 sm:$0xff]  }
 0x397   :  { %7455 = vmatpush2.bf16.msra.mxu1 %v8717_v8  ;;  %v8810_v8 = vld [vmem:[%s11447_s4 + $0x6a4] ss:$8 sps:$4 sm:$0xff]  }
 0x398   :  { %7456 = vmatprep.subr.bf16.mxu1 %v8725_v43  ;;  %v8805_v43 = vld [vmem:[%s11447_s4 + $0x7b0] ss:$8 sps:$4 sm:$0xff]  }
 0x399   :  { %7496 = vmatpush2.bf16.msra.mxu0 %v8720_v28  ;;  %v8813_v28 = vld [vmem:[%s11447_s4 + $0x7a4] ss:$8 sps:$4 sm:$0xff]  }
 0x39a   :  { %7497 = vmatprep.subr.bf16.mxu0 %v8728_v47  ;;  %v8808_v47 = vld [vmem:[%s11447_s4 + $0x6a0] ss:$8 sps:$4 sm:$0xff]  }
 0x39b   :  { %7457 = vmatpush2.bf16.msra.mxu1 %v8723_v37  ;;  %v8816_v37 = vld [vmem:[%s11447_s4 + $0x694] ss:$8 sps:$4 sm:$0xff]  }
 0x39c   :  { %7508 = vmatprep.subr.bf16.mxu1 %v8731_v5  ;;  %v8811_v5 = vld [vmem:[%s11447_s4 + $0x7a0] ss:$8 sps:$4 sm:$0xff]  }
 0x39d   :  { %7498 = vmatpush2.bf16.msra.mxu0 %v8726_v27  ;;  %v8819_v27 = vld [vmem:[%s11447_s4 + $0x794] ss:$8 sps:$4 sm:$0xff]  }
 0x39e   :  { %7459 = vmatmul.mubr.bf16.vlgmr.msra.gmra.mxu1 %v5186_v26  ;;  %7549 = vmatprep.subr.bf16.mxu0 %v8735_v38  ;;  %v8814_v26 = vld [vmem:[%s11447_s4 + $0x690] ss:$8 sps:$4 sm:$0xff]   ;;  %v10979_v38 = vrot.slane %v10966_v4, %v9342_v23 }
 0x39f   :  { %7509 = vmatpush1.bf16.msra.mxu1 %v8729_v53  ;;  %7540 = vmatprep.mubr.bf16.mxu1 %v5207_v19  ;;  %v8822_v53 = vld [vmem:[%s11447_s4 + $0x684] ss:$8 sps:$4 sm:$0xff]   ;;  %v8817_v19 = vld [vmem:[%s11447_s4 + $0x790] ss:$8 sps:$4 sm:$0xff]  }
 0x3a0   :  { %7500 = vmatmul.mubr.bf16.vlgmr.msra.gmra.mxu0 %v5208_v56  ;;  %7510 = vmatprep.subr.bf16.mxu1 %v8738_v9  ;;  %v8825_v9 = vld [vmem:[%s11447_s4 + $0x784] ss:$8 sps:$4 sm:$0xff]  }
 0x3a1   :  { %7550 = vmatpush1.bf16.msra.mxu0 %v8733_v48  ;;  %7581 = vmatprep.mubr.bf16.mxu0 %v5211_v11  ;;  %v8820_v48 = vld [vmem:[%s11447_s4 + $0x680] ss:$8 sps:$4 sm:$0xff]   ;;  %v11495_v56 = vld [vmem:[#allocation7_spill] sm:$0xff]  ;;  %v5227_v11 = vcombine.high %v10979_v38, %v10979_v38 }
 0x3a2   :  { %7551 = vmatprep.subr.bf16.mxu0 %v8741_v44  ;;  %v5102_v44 = vsub.s32 0, %v11495_v56 }
 0x3a3   :  { %7511 = vmatpush1.bf16.msra.mxu1 %v8736_v10  ;;  %v8828_v10 = vld [vmem:[%s11447_s4 + $0x874] ss:$8 sps:$4 sm:$0xff]  }
 0x3a4   :  { %7512 = vmatprep.subr.bf16.mxu1 %v8744_v16  ;;  %v5098_v16 = vld [vmem:[%s11448_s5] sm:$0x3] }
 0x3a5   :  { %7552 = vmatpush1.bf16.msra.mxu0 %v8739_v39  ;;  %v8823_v39 = vld [vmem:[%s11447_s4 + $0x780] ss:$8 sps:$4 sm:$0xff]  }
 0x3a6   :  { %7553 = vmatprep.subr.bf16.mxu0 %v8747_v34  ;;  %v5106_v34 = vsub.s32 1, %v11495_v56  ;;  %v8885_v56 = vld [vmem:[%s11447_s4 + $0x9e4] ss:$8 sps:$4 sm:$0xff]  }
 0x3a7   :  { %7513 = vmatpush1.bf16.msra.mxu1 %v8742_v6  ;;  %v5193_v6 = vrot.slane %v10776_v35, %v9342_v23  ;;  %v8829_v35 = vld [vmem:[%s11447_s4 + $0x970] ss:$8 sps:$4 sm:$0xff]  }
 0x3a8   :  { %7514 = vmatprep.subr.bf16.mxu1 %v8750_v57  ;;  %v8831_v57 = vld [vmem:[%s11447_s4 + $0x974] ss:$8 sps:$4 sm:$0xff]  }
 0x3a9   :  { %7554 = vmatpush1.bf16.msra.mxu0 %v8745_v36  ;;  %v8826_v36 = vld [vmem:[%s11447_s4 + $0x870] ss:$8 sps:$4 sm:$0xff]  }
 0x3aa   :  { %7555 = vmatprep.subr.bf16.mxu0 %v8753_v17  ;;  %v5103_v17 = vrot.slane %v5098_v16, %v5102_v44  ;;  %v8880_v44 = vld [vmem:[%s11447_s4 + $0x8e0] ss:$8 sps:$4 sm:$0xff]  }
 0x3ab   :  { %7515 = vmatpush1.bf16.msra.mxu1 %v8748_v22  ;;  %v5249_v22 = vrot.slane %v5227_v11, %v9342_v23  ;;  %v8888_v11 = vld [vmem:[%s11447_s4 + $0x8d4] ss:$8 sps:$4 sm:$0xff]  }
 0x3ac   :  { %7516 = vmatprep.subr.bf16.mxu1 %v8756_v42  ;;  %v8834_v42 = vld [vmem:[%s11447_s4 + $0x864] ss:$8 sps:$4 sm:$0xff]  }
 0x3ad   :  { %7556 = vmatpush1.bf16.msra.mxu0 %v8751_v60  ;;  %v5107_v60 = vrot.slane %v5098_v16, %v5106_v34  ;;  %v8891_v16 = vld [vmem:[%s11447_s4 + $0x9d4] ss:$8 sps:$4 sm:$0xff]   ;;  %v8894_v34 = vld [vmem:[%s11447_s4 + $0x8c4] ss:$8 sps:$4 sm:$0xff]  }
 0x3ae   :  { %7557 = vmatprep.subr.bf16.mxu0 %v8759_v51 }
 0x3af   :  { %7517 = vmatpush1.bf16.msra.mxu1 %v8754_v12  ;;  %v5209_v12 = vcombine.high %v5193_v6, %v5193_v6 }
 0x3b0   :  { %7518 = vmatprep.subr.bf16.mxu1 %v8762_v24  ;;  %v8837_v24 = vld [vmem:[%s11447_s4 + $0x964] ss:$8 sps:$4 sm:$0xff]  }
 0x3b1   :  { %7558 = vmatpush1.bf16.msra.mxu0 %v8757_v14 }
 0x3b2   :  { %7559 = vmatprep.subr.bf16.mxu0 %v8765_v21  ;;  %v5259_v21 = vcombine.high %v5249_v22, %v5249_v22 }
 0x3b3   :  { %7519 = vmatpush1.bf16.msra.mxu1 %v8760_v63  ;;  %v8832_v63 = vld [vmem:[%s11447_s4 + $0x860] ss:$8 sps:$4 sm:$0xff]  }
 0x3b4   :  { %7520 = vmatprep.subr.bf16.mxu1 %v8768_v61 }
 0x3b5   :  { %7560 = vmatpush1.bf16.msra.mxu0 %v8763_v1 }
 0x3b6   :  { %7561 = vmatprep.subr.bf16.mxu0 %v8771_v31  ;;  %v8840_v31 = vld [vmem:[%s11447_s4 + $0x854] ss:$8 sps:$4 sm:$0xff]  }
 0x3b7   :  { %7521 = vmatpush1.bf16.msra.mxu1 %v8766_v20 }
 0x3b8   :  { %7522 = vmatprep.subr.bf16.mxu1 %v8774_v58 }
 0x3b9   :  { %7562 = vmatpush1.bf16.msra.mxu0 %v8769_v29  ;;  %v8835_v29 = vld [vmem:[%s11447_s4 + $0x960] ss:$8 sps:$4 sm:$0xff]  }
 0x3ba   :  { %7563 = vmatprep.subr.bf16.mxu0 %v8777_v40 }
 0x3bb   :  { %7523 = vmatpush1.bf16.msra.mxu1 %v8772_v50 }
 0x3bc   :  { %7524 = vmatprep.subr.bf16.mxu1 %v8780_v45  ;;  %v8843_v45 = vld [vmem:[%s11447_s4 + $0x954] ss:$8 sps:$4 sm:$0xff]  }
 0x3bd   :  { %7564 = vmatpush1.bf16.msra.mxu0 %v8775_v3 }
 0x3be   :  { %7565 = vmatprep.subr.bf16.mxu0 %v8783_v15  ;;  %v8838_v15 = vld [vmem:[%s11447_s4 + $0x850] ss:$8 sps:$4 sm:$0xff]  }
 0x3bf   :  { %7525 = vmatpush2.bf16.msra.mxu1 %v8778_v32 }
 0x3c0   :  { %7526 = vmatprep.subr.bf16.mxu1 %v8786_v25 }
 0x3c1   :  { %7566 = vmatpush2.bf16.msra.mxu0 %v8781_v46  ;;  %v8846_v46 = vld [vmem:[%s11447_s4 + $0x844] ss:$8 sps:$4 sm:$0xff]  }
 0x3c2   :  { %7567 = vmatprep.subr.bf16.mxu0 %v8789_v49  ;;  %v8841_v49 = vld [vmem:[%s11447_s4 + $0x950] ss:$8 sps:$4 sm:$0xff]  }
 0x3c3   :  { %7527 = vmatpush2.bf16.msra.mxu1 %v8784_v13 }
 0x3c4   :  { %7528 = vmatprep.subr.bf16.mxu1 %v8792_v7  ;;  %v8849_v7 = vld [vmem:[%s11447_s4 + $0x944] ss:$8 sps:$4 sm:$0xff]  }
 0x3c5   :  { %7568 = vmatpush2.bf16.msra.mxu0 %v8787_v41  ;;  %v8844_v41 = vld [vmem:[%s11447_s4 + $0x840] ss:$8 sps:$4 sm:$0xff]  }
 0x3c6   :  { %7569 = vmatprep.subr.bf16.mxu0 %v8795_v52  ;;  %v8852_v52 = vld [vmem:[%s11447_s4 + $0x834] ss:$8 sps:$4 sm:$0xff]  }
 0x3c7   :  { %7529 = vmatpush2.bf16.msra.mxu1 %v8790_v59  ;;  %v8847_v59 = vld [vmem:[%s11447_s4 + $0x940] ss:$8 sps:$4 sm:$0xff]  }
 0x3c8   :  { %7530 = vmatprep.subr.bf16.mxu1 %v8798_v62  ;;  %v8855_v62 = vld [vmem:[%s11447_s4 + $0x934] ss:$8 sps:$4 sm:$0xff]  }
 0x3c9   :  { %7570 = vmatpush2.bf16.msra.mxu0 %v8793_v30  ;;  %v8850_v30 = vld [vmem:[%s11447_s4 + $0x830] ss:$8 sps:$4 sm:$0xff]  }
 0x3ca   :  { %7571 = vmatprep.subr.bf16.mxu0 %v8801_v33  ;;  %v8858_v33 = vld [vmem:[%s11447_s4 + $0x824] ss:$8 sps:$4 sm:$0xff]  }
 0x3cb   :  { %7531 = vmatpush2.bf16.msra.mxu1 %v8796_v2  ;;  %v8853_v2 = vld [vmem:[%s11447_s4 + $0x930] ss:$8 sps:$4 sm:$0xff]  }
 0x3cc   :  { %7532 = vmatprep.subr.bf16.mxu1 %v8804_v18  ;;  %v8861_v18 = vld [vmem:[%s11447_s4 + $0x924] ss:$8 sps:$4 sm:$0xff]  }
 0x3cd   :  { %7572 = vmatpush2.bf16.msra.mxu0 %v8799_v0  ;;  %v8856_v0 = vld [vmem:[%s11447_s4 + $0x820] ss:$8 sps:$4 sm:$0xff]  }
 0x3ce   :  { %7573 = vmatprep.subr.bf16.mxu0 %v8807_v54  ;;  %v8864_v54 = vld [vmem:[%s11447_s4 + $0x814] ss:$8 sps:$4 sm:$0xff]  }
 0x3cf   :  { %7533 = vmatpush2.bf16.msra.mxu1 %v8802_v55  ;;  %v8859_v55 = vld [vmem:[%s11447_s4 + $0x920] ss:$8 sps:$4 sm:$0xff]  }
 0x3d0   :  { %7534 = vmatprep.subr.bf16.mxu1 %v8810_v8  ;;  %v8867_v8 = vld [vmem:[%s11447_s4 + $0x914] ss:$8 sps:$4 sm:$0xff]  }
 0x3d1   :  { %7574 = vmatpush2.bf16.msra.mxu0 %v8805_v43  ;;  %v8862_v43 = vld [vmem:[%s11447_s4 + $0x810] ss:$8 sps:$4 sm:$0xff]  }
 0x3d2   :  { %7575 = vmatprep.subr.bf16.mxu0 %v8813_v28  ;;  %v8870_v28 = vld [vmem:[%s11447_s4 + $0x804] ss:$8 sps:$4 sm:$0xff]  }
 0x3d3   :  { %7535 = vmatpush2.bf16.msra.mxu1 %v8808_v47  ;;  %v8865_v47 = vld [vmem:[%s11447_s4 + $0x910] ss:$8 sps:$4 sm:$0xff]  }
 0x3d4   :  { %7536 = vmatprep.subr.bf16.mxu1 %v8816_v37  ;;  %v8873_v37 = vld [vmem:[%s11447_s4 + $0x904] ss:$8 sps:$4 sm:$0xff]  }
 0x3d5   :  { %7576 = vmatpush2.bf16.msra.mxu0 %v8811_v5  ;;  %v8868_v5 = vld [vmem:[%s11447_s4 + $0x800] ss:$8 sps:$4 sm:$0xff]  }
 0x3d6   :  { %7577 = vmatprep.subr.bf16.mxu0 %v8819_v27  ;;  %v8876_v27 = vld [vmem:[%s11447_s4 + $0x8f4] ss:$8 sps:$4 sm:$0xff]  }
 0x3d7   :  { %7537 = vmatpush2.bf16.msra.mxu1 %v8814_v26  ;;  %v8871_v26 = vld [vmem:[%s11447_s4 + $0x900] ss:$8 sps:$4 sm:$0xff]  }
 0x3d8   :  { %7538 = vmatprep.subr.bf16.mxu1 %v8822_v53  ;;  %v8879_v53 = vld [vmem:[%s11447_s4 + $0x9f4] ss:$8 sps:$4 sm:$0xff]  }
 0x3d9   :  { %7578 = vmatpush2.bf16.msra.mxu0 %v8817_v19  ;;  %v8874_v19 = vld [vmem:[%s11447_s4 + $0x8f0] ss:$8 sps:$4 sm:$0xff]  }
 0x3da   :  { %7579 = vmatprep.subr.bf16.mxu0 %v8825_v9  ;;  %v8882_v9 = vld [vmem:[%s11447_s4 + $0x8e4] ss:$8 sps:$4 sm:$0xff]  }
 0x3db   :  { %7539 = vmatpush2.bf16.msra.mxu1 %v8820_v48  ;;  %v8877_v48 = vld [vmem:[%s11447_s4 + $0x9f0] ss:$8 sps:$4 sm:$0xff]  }
 0x3dc   :  { %7590 = vmatprep.subr.bf16.mxu1 %v8828_v10  ;;  %v8883_v10 = vld [vmem:[%s11447_s4 + $0x9e0] ss:$8 sps:$4 sm:$0xff]  }
 0x3dd   :  { %7580 = vmatpush2.bf16.msra.mxu0 %v8823_v39  ;;  %v8886_v39 = vld [vmem:[%s11447_s4 + $0x8d0] ss:$8 sps:$4 sm:$0xff]  }
 0x3de   :  { %7541 = vmatmul.mubr.bf16.vlgmr.msra.gmra.mxu1 %v5193_v6  ;;  %v7296_v51 = vpop.f32.mrf.mxu1  ;;  %7631 = vmatprep.subr.bf16.mxu0 %v8831_v57  ;;  %v8889_v6 = vld [vmem:[%s11447_s4 + $0x9d0] ss:$8 sps:$4 sm:$0xff]   ;;  %v8897_v57 = vld [vmem:[%s11447_s4 + $0x9c4] ss:$8 sps:$4 sm:$0xff]  }
 0x3df   :  { %v7297_v14 = vadd.f32 %v7296_v51, %v5103_v17  ;;  %7591 = vmatpush1.bf16.msra.mxu1 %v8826_v36  ;;  %7622 = vmatprep.mubr.bf16.mxu1 %v5249_v22  ;;  %v8892_v36 = vld [vmem:[%s11447_s4 + $0x8c0] ss:$8 sps:$4 sm:$0xff]   ;;  %v8900_v17 = vld [vmem:[%s11447_s4 + $0x8b4] ss:$8 sps:$4 sm:$0xff]   ;;  %v8901_v51 = vld [vmem:[%s11447_s4 + $0x9b0] ss:$8 sps:$4 sm:$0xff]  }
 0x3e0   :  { %7582 = vmatmul.mubr.bf16.vlgmr.msra.gmra.mxu0 %v5209_v12  ;;  %v7298_v61 = vpop.f32.mrf.mxu1  ;;  %v7337_v1 = vpop.f32.mrf.mxu0  ;;  %7592 = vmatprep.subr.bf16.mxu1 %v8834_v42  ;;  %v8895_v22 = vld [vmem:[%s11447_s4 + $0x9c0] ss:$8 sps:$4 sm:$0xff]   ;;  %v8903_v42 = vld [vmem:[%s11447_s4 + $0x9b4] ss:$8 sps:$4 sm:$0xff]   ;;  %v8909_v12 = vld [vmem:[%s11447_s4 + $0x9a4] ss:$8 sps:$4 sm:$0xff]  }
 0x3e1   :  { %v7299_v20 = vadd.f32 %v7298_v61, %v5107_v60  ;;  %v11030_v58 = vadd.f32 %v7337_v1, %v7297_v14  ;;  %7632 = vmatpush1.bf16.msra.mxu0 %v8829_v35  ;;  %7663 = vmatprep.mubr.bf16.mxu0 %v5259_v21  ;;  %v8898_v35 = vld [vmem:[%s11447_s4 + $0x8b0] ss:$8 sps:$4 sm:$0xff]   ;;  %v8906_v60 = vld [vmem:[%s11447_s4 + $0x8a4] ss:$8 sps:$4 sm:$0xff]   ;;  %v5212_v14 = vcombine.high %v10966_v4, %v10966_v4  ;;  %v8912_v21 = vld [vmem:[%s11447_s4 + $0x894] ss:$8 sps:$4 sm:$0xff]  }
 0x3e2   :  { %v7300_v40 = vpop.f32.mrf.mxu1  ;;  %v7339_v50 = vpop.f32.mrf.mxu0  ;;  %7633 = vmatprep.subr.bf16.mxu0 %v8837_v24  ;;  %v8904_v24 = vld [vmem:[%s11447_s4 + $0x8a0] ss:$8 sps:$4 sm:$0xff]   ;;  %v8915_v61 = vld [vmem:[%s11447_s4 + $0x994] ss:$8 sps:$4 sm:$0xff]   ;;  %v8910_v4 = vld [vmem:[%s11447_s4 + $0x890] ss:$8 sps:$4 sm:$0xff]  }
 0x3e3   :  { %v11038_v3 = vadd.f32 %v7339_v50, %v7299_v20  ;;  %7593 = vmatpush1.bf16.msra.mxu1 %v8832_v63  ;;  %v8907_v63 = vld [vmem:[%s11447_s4 + $0x9a0] ss:$8 sps:$4 sm:$0xff]   ;;  %v11190_v1 = vrot.slane %v5212_v14, %v9342_v23  ;;  %v8913_v20 = vld [vmem:[%s11447_s4 + $0x990] ss:$8 sps:$4 sm:$0xff]   ;;  %v8979_v14 = vld [vmem:[%s11447_s4 + $0xae4] ss:$8 sps:$4 sm:$0xff]  }
 0x3e4   :  { %v7301_v32 = vpop.f32.mrf.mxu1  ;;  %v7341_v25 = vpop.f32.mrf.mxu0  ;;  %7594 = vmatprep.subr.bf16.mxu1 %v8840_v31  ;;  %v8918_v31 = vld [vmem:[%s11447_s4 + $0x884] ss:$8 sps:$4 sm:$0xff]   ;;  %v8916_v40 = vld [vmem:[%s11447_s4 + $0x880] ss:$8 sps:$4 sm:$0xff]  }
 0x3e5   :  { %7634 = vmatpush1.bf16.msra.mxu0 %v8835_v29  ;;  %v8921_v29 = vld [vmem:[%s11447_s4 + $0x984] ss:$8 sps:$4 sm:$0xff]   ;;  %v5228_v50 = vcombine.high %v11190_v1, %v11190_v1  ;;  %v5235_v32 = vrot.slane %v10979_v38, %v9342_v23  ;;  %v8928_v25 = vld [vmem:[%s11447_s4 + $0xb74] ss:$8 sps:$4 sm:$0xff]   ;;  %v8926_v38 = vld [vmem:[%s11447_s4 + $0xb70] ss:$8 sps:$4 sm:$0xff]  }
 0x3e6   :  { %v7342_v13 = vpop.f32.mrf.mxu0  ;;  %7635 = vmatprep.subr.bf16.mxu0 %v8843_v45  ;;  %v8924_v45 = vld [vmem:[%s11447_s4 + $0xa74] ss:$8 sps:$4 sm:$0xff]  }
 0x3e7   :  { %7595 = vmatpush1.bf16.msra.mxu1 %v8838_v15  ;;  %v8919_v15 = vld [vmem:[%s11447_s4 + $0x980] ss:$8 sps:$4 sm:$0xff]   ;;  %v8931_v13 = vld [vmem:[%s11447_s4 + $0xa64] ss:$8 sps:$4 sm:$0xff]  }
 0x3e8   :  { %7596 = vmatprep.subr.bf16.mxu1 %v8846_v46  ;;  %v8922_v46 = vld [vmem:[%s11447_s4 + $0xa70] ss:$8 sps:$4 sm:$0xff]  }
 0x3e9   :  { %7636 = vmatpush1.bf16.msra.mxu0 %v8841_v49  ;;  %v5256_v49 = vrot.slane %v5228_v50, %v9342_v23  ;;  %v8986_v50 = vld [vmem:[%s11447_s4 + $0xbd0] ss:$8 sps:$4 sm:$0xff]  }
 0x3ea   :  { %7637 = vmatprep.subr.bf16.mxu0 %v8849_v7 }
 0x3eb   :  { %7597 = vmatpush1.bf16.msra.mxu1 %v8844_v41  ;;  %v5257_v41 = vcombine.high %v5235_v32, %v5235_v32 }
 0x3ec   :  { %7598 = vmatprep.subr.bf16.mxu1 %v8852_v52  ;;  %v8934_v52 = vld [vmem:[%s11447_s4 + $0xb64] ss:$8 sps:$4 sm:$0xff]  }
 0x3ed   :  { %7638 = vmatpush1.bf16.msra.mxu0 %v8847_v59 }
 0x3ee   :  { %7639 = vmatprep.subr.bf16.mxu0 %v8855_v62  ;;  %v5260_v62 = vcombine.high %v5256_v49, %v5256_v49 }
 0x3ef   :  { %7599 = vmatpush1.bf16.msra.mxu1 %v8850_v30  ;;  %v8929_v30 = vld [vmem:[%s11447_s4 + $0xa60] ss:$8 sps:$4 sm:$0xff]  }
 0x3f0   :  { %7600 = vmatprep.subr.bf16.mxu1 %v8858_v33 }
 0x3f1   :  { %7640 = vmatpush1.bf16.msra.mxu0 %v8853_v2 }
 0x3f2   :  { %7641 = vmatprep.subr.bf16.mxu0 %v8861_v18  ;;  %v8937_v18 = vld [vmem:[%s11447_s4 + $0xa54] ss:$8 sps:$4 sm:$0xff]  }
 0x3f3   :  { %7601 = vmatpush1.bf16.msra.mxu1 %v8856_v0 }
 0x3f4   :  { %7602 = vmatprep.subr.bf16.mxu1 %v8864_v54 }
 0x3f5   :  { %7642 = vmatpush1.bf16.msra.mxu0 %v8859_v55 }
 0x3f6   :  { %7643 = vmatprep.subr.bf16.mxu0 %v8867_v8 }
 0x3f7   :  { %7603 = vmatpush1.bf16.msra.mxu1 %v8862_v43  ;;  %v8940_v43 = vld [vmem:[%s11447_s4 + $0xb54] ss:$8 sps:$4 sm:$0xff]  }
 0x3f8   :  { %7604 = vmatprep.subr.bf16.mxu1 %v8870_v28 }
 0x3f9   :  { %7644 = vmatpush1.bf16.msra.mxu0 %v8865_v47 }
 0x3fa   :  { %7645 = vmatprep.subr.bf16.mxu0 %v8873_v37 }
 0x3fb   :  { %7605 = vmatpush1.bf16.msra.mxu1 %v8868_v5  ;;  %v8943_v5 = vld [vmem:[%s11447_s4 + $0xa44] ss:$8 sps:$4 sm:$0xff]  }
 0x3fc   :  { %7606 = vmatprep.subr.bf16.mxu1 %v8876_v27  ;;  %v8938_v27 = vld [vmem:[%s11447_s4 + $0xb50] ss:$8 sps:$4 sm:$0xff]  }
 0x3fd   :  { %7646 = vmatpush1.bf16.msra.mxu0 %v8871_v26 }
 0x3fe   :  { %7647 = vmatprep.subr.bf16.mxu0 %v8879_v53  ;;  %v8946_v53 = vld [vmem:[%s11447_s4 + $0xb44] ss:$8 sps:$4 sm:$0xff]  }
 0x3ff   :  { %7607 = vmatpush2.bf16.msra.mxu1 %v8874_v19  ;;  %v8941_v19 = vld [vmem:[%s11447_s4 + $0xa40] ss:$8 sps:$4 sm:$0xff]  }
 0x400   :  { %7608 = vmatprep.subr.bf16.mxu1 %v8882_v9  ;;  %v8949_v9 = vld [vmem:[%s11447_s4 + $0xa34] ss:$8 sps:$4 sm:$0xff]  }
 0x401   :  { %7648 = vmatpush2.bf16.msra.mxu0 %v8877_v48  ;;  %v8944_v48 = vld [vmem:[%s11447_s4 + $0xb40] ss:$8 sps:$4 sm:$0xff]  }
 0x402   :  { %7649 = vmatprep.subr.bf16.mxu0 %v8885_v56  ;;  %v8952_v56 = vld [vmem:[%s11447_s4 + $0xb34] ss:$8 sps:$4 sm:$0xff]  }
 0x403   :  { %7609 = vmatpush2.bf16.msra.mxu1 %v8880_v44  ;;  %v8947_v44 = vld [vmem:[%s11447_s4 + $0xa30] ss:$8 sps:$4 sm:$0xff]  }
 0x404   :  { %7610 = vmatprep.subr.bf16.mxu1 %v8888_v11  ;;  %v8955_v11 = vld [vmem:[%s11447_s4 + $0xa24] ss:$8 sps:$4 sm:$0xff]  }
 0x405   :  { %7650 = vmatpush2.bf16.msra.mxu0 %v8883_v10  ;;  %v8950_v10 = vld [vmem:[%s11447_s4 + $0xb30] ss:$8 sps:$4 sm:$0xff]  }
 0x406   :  { %7651 = vmatprep.subr.bf16.mxu0 %v8891_v16  ;;  %v8958_v16 = vld [vmem:[%s11447_s4 + $0xb24] ss:$8 sps:$4 sm:$0xff]  }
 0x407   :  { %7611 = vmatpush2.bf16.msra.mxu1 %v8886_v39  ;;  %v8953_v39 = vld [vmem:[%s11447_s4 + $0xa20] ss:$8 sps:$4 sm:$0xff]  }
 0x408   :  { %7612 = vmatprep.subr.bf16.mxu1 %v8894_v34  ;;  %v8961_v34 = vld [vmem:[%s11447_s4 + $0xa14] ss:$8 sps:$4 sm:$0xff]  }
 0x409   :  { %7652 = vmatpush2.bf16.msra.mxu0 %v8889_v6  ;;  %v8956_v6 = vld [vmem:[%s11447_s4 + $0xb20] ss:$8 sps:$4 sm:$0xff]  }
 0x40a   :  { %7653 = vmatprep.subr.bf16.mxu0 %v8897_v57  ;;  %v8964_v57 = vld [vmem:[%s11447_s4 + $0xb14] ss:$8 sps:$4 sm:$0xff]  }
 0x40b   :  { %7613 = vmatpush2.bf16.msra.mxu1 %v8892_v36  ;;  %v8959_v36 = vld [vmem:[%s11447_s4 + $0xa10] ss:$8 sps:$4 sm:$0xff]  }
 0x40c   :  { %7614 = vmatprep.subr.bf16.mxu1 %v8900_v17  ;;  %v8967_v17 = vld [vmem:[%s11447_s4 + $0xa04] ss:$8 sps:$4 sm:$0xff]  }
 0x40d   :  { %7654 = vmatpush2.bf16.msra.mxu0 %v8895_v22  ;;  %v8962_v22 = vld [vmem:[%s11447_s4 + $0xb10] ss:$8 sps:$4 sm:$0xff]  }
 0x40e   :  { %7655 = vmatprep.subr.bf16.mxu0 %v8903_v42  ;;  %v8970_v42 = vld [vmem:[%s11447_s4 + $0xb04] ss:$8 sps:$4 sm:$0xff]  }
 0x40f   :  { %7615 = vmatpush2.bf16.msra.mxu1 %v8898_v35  ;;  %v8965_v35 = vld [vmem:[%s11447_s4 + $0xa00] ss:$8 sps:$4 sm:$0xff]  }
 0x410   :  { %7616 = vmatprep.subr.bf16.mxu1 %v8906_v60  ;;  %v8973_v60 = vld [vmem:[%s11447_s4 + $0xaf4] ss:$8 sps:$4 sm:$0xff]  }
 0x411   :  { %7656 = vmatpush2.bf16.msra.mxu0 %v8901_v51  ;;  %v8968_v51 = vld [vmem:[%s11447_s4 + $0xb00] ss:$8 sps:$4 sm:$0xff]  }
 0x412   :  { %7657 = vmatprep.subr.bf16.mxu0 %v8909_v12  ;;  %v8976_v12 = vld [vmem:[%s11447_s4 + $0xbf4] ss:$8 sps:$4 sm:$0xff]  }
 0x413   :  { %7617 = vmatpush2.bf16.msra.mxu1 %v8904_v24  ;;  %v8971_v24 = vld [vmem:[%s11447_s4 + $0xaf0] ss:$8 sps:$4 sm:$0xff]  }
 0x414   :  { %7618 = vmatprep.subr.bf16.mxu1 %v8912_v21  ;;  %v8974_v21 = vld [vmem:[%s11447_s4 + $0xbf0] ss:$8 sps:$4 sm:$0xff]  }
 0x415   :  { %7658 = vmatpush2.bf16.msra.mxu0 %v8907_v63  ;;  %v8982_v63 = vld [vmem:[%s11447_s4 + $0xbe4] ss:$8 sps:$4 sm:$0xff]  }
 0x416   :  { %7659 = vmatprep.subr.bf16.mxu0 %v8915_v61  ;;  %v8977_v61 = vld [vmem:[%s11447_s4 + $0xae0] ss:$8 sps:$4 sm:$0xff]  }
 0x417   :  { %7619 = vmatpush2.bf16.msra.mxu1 %v8910_v4  ;;  %v8985_v4 = vld [vmem:[%s11447_s4 + $0xad4] ss:$8 sps:$4 sm:$0xff]  }
 0x418   :  { %7620 = vmatprep.subr.bf16.mxu1 %v8918_v31  ;;  %v8980_v31 = vld [vmem:[%s11447_s4 + $0xbe0] ss:$8 sps:$4 sm:$0xff]  }
 0x419   :  { %7660 = vmatpush2.bf16.msra.mxu0 %v8913_v20  ;;  %v8988_v20 = vld [vmem:[%s11447_s4 + $0xbd4] ss:$8 sps:$4 sm:$0xff]  }
 0x41a   :  { %7661 = vmatprep.subr.bf16.mxu0 %v8921_v29  ;;  %v8983_v29 = vld [vmem:[%s11447_s4 + $0xad0] ss:$8 sps:$4 sm:$0xff]  }
 0x41b   :  { %7621 = vmatpush2.bf16.msra.mxu1 %v8916_v40  ;;  %v8991_v40 = vld [vmem:[%s11447_s4 + $0xac4] ss:$8 sps:$4 sm:$0xff]  }
 0x41c   :  { %7672 = vmatprep.subr.bf16.mxu1 %v8924_v45  ;;  %v8994_v45 = vld [vmem:[%s11447_s4 + $0xbc4] ss:$8 sps:$4 sm:$0xff]  }
 0x41d   :  { %7662 = vmatpush2.bf16.msra.mxu0 %v8919_v15  ;;  %v8989_v15 = vld [vmem:[%s11447_s4 + $0xac0] ss:$8 sps:$4 sm:$0xff]  }
 0x41e   :  { %v7378_v7 = vpop.f32.mrf.mxu1  ;;  %7623 = vmatmul.mubr.bf16.vlgmr.msra.gmra.mxu1 %v5235_v32  ;;  %7713 = vmatprep.subr.bf16.mxu0 %v8928_v25  ;;  %v8997_v32 = vld [vmem:[%s11447_s4 + $0xab4] ss:$8 sps:$4 sm:$0xff]   ;;  %v8992_v25 = vld [vmem:[%s11447_s4 + $0xbc0] ss:$8 sps:$4 sm:$0xff]  }
 0x41f   :  { %v7379_v59 = vadd.f32 %v7378_v7, %v11030_v58  ;;  %7673 = vmatpush1.bf16.msra.mxu1 %v8922_v46  ;;  %7704 = vmatprep.mubr.bf16.mxu1 %v5256_v49  ;;  %v8932_v58 = vld [vmem:[%s11447_s4 + $0xb60] ss:$8 sps:$4 sm:$0xff]   ;;  %v9000_v46 = vld [vmem:[%s11447_s4 + $0xbb4] ss:$8 sps:$4 sm:$0xff]   ;;  %v8995_v49 = vld [vmem:[%s11447_s4 + $0xab0] ss:$8 sps:$4 sm:$0xff]  }
 0x420   :  { %v7380_v33 = vpop.f32.mrf.mxu1  ;;  %v7419_v2 = vpop.f32.mrf.mxu0  ;;  %7664 = vmatmul.mubr.bf16.vlgmr.msra.gmra.mxu0 %v5257_v41  ;;  %7674 = vmatprep.subr.bf16.mxu1 %v8931_v13  ;;  %v9003_v13 = vld [vmem:[%s11447_s4 + $0xaa4] ss:$8 sps:$4 sm:$0xff]   ;;  %v9001_v41 = vld [vmem:[%s11447_s4 + $0xaa0] ss:$8 sps:$4 sm:$0xff]  }
 0x421   :  { %v7381_v0 = vadd.f32 %v7380_v33, %v11038_v3  ;;  %v11238_v54 = vadd.f32 %v7419_v2, %v7379_v59  ;;  %7714 = vmatpush1.bf16.msra.mxu0 %v8926_v38  ;;  %7745 = vmatprep.mubr.bf16.mxu0 %v5260_v62  ;;  %v8935_v3 = vld [vmem:[%s11447_s4 + $0xa50] ss:$8 sps:$4 sm:$0xff]   ;;  %v9006_v7 = vld [vmem:[%s11447_s4 + $0xba4] ss:$8 sps:$4 sm:$0xff]   ;;  %v9004_v59 = vld [vmem:[%s11447_s4 + $0xba0] ss:$8 sps:$4 sm:$0xff]  }
 0x422   :  { %v7382_v55 = vpop.f32.mrf.mxu1  ;;  %v7421_v8 = vpop.f32.mrf.mxu0  ;;  %7715 = vmatprep.subr.bf16.mxu0 %v8934_v52  ;;  %v8998_v38 = vld [vmem:[%s11447_s4 + $0xbb0] ss:$8 sps:$4 sm:$0xff]   ;;  %v9009_v52 = vld [vmem:[%s11447_s4 + $0xa94] ss:$8 sps:$4 sm:$0xff]   ;;  %v9015_v33 = vld [vmem:[%s11447_s4 + $0xa84] ss:$8 sps:$4 sm:$0xff]  }
 0x423   :  { %v11246_v28 = vadd.f32 %v7421_v8, %v7381_v0  ;;  %7675 = vmatpush1.bf16.msra.mxu1 %v8929_v30  ;;  %v9012_v62 = vld [vmem:[%s11447_s4 + $0xb94] ss:$8 sps:$4 sm:$0xff]   ;;  %v9007_v30 = vld [vmem:[%s11447_s4 + $0xa90] ss:$8 sps:$4 sm:$0xff]   ;;  %v9013_v0 = vld [vmem:[%s11447_s4 + $0xa80] ss:$8 sps:$4 sm:$0xff]   ;;  %v5242_v8 = vrot.slane %v11190_v1, %v9342_v23 }
 0x424   :  { %v7383_v47 = vpop.f32.mrf.mxu1  ;;  %v7423_v37 = vpop.f32.mrf.mxu0  ;;  %7676 = vmatprep.subr.bf16.mxu1 %v8937_v18  ;;  %v9010_v2 = vld [vmem:[%s11447_s4 + $0xb90] ss:$8 sps:$4 sm:$0xff]   ;;  %v9018_v18 = vld [vmem:[%s11447_s4 + $0xb84] ss:$8 sps:$4 sm:$0xff]   ;;  %v9016_v55 = vld [vmem:[%s11447_s4 + $0xb80] ss:$8 sps:$4 sm:$0xff]  }
 0x425   :  { %7716 = vmatpush1.bf16.msra.mxu0 %v8932_v58  ;;  %v9021_v58 = vld [vmem:[%s11447_s4 + $0xc34] ss:$8 sps:$4 sm:$0xff]   ;;  %v5258_v37 = vcombine.high %v5242_v8, %v5242_v8  ;;  %v9022_v1 = vld [vmem:[%s11447_s4 + $0xc20] ss:$8 sps:$4 sm:$0xff]  }
 0x426   :  { %v7424_v26 = vpop.f32.mrf.mxu0  ;;  %7717 = vmatprep.subr.bf16.mxu0 %v8940_v43  ;;  %v9019_v43 = vld [vmem:[%s11447_s4 + $0xc30] ss:$8 sps:$4 sm:$0xff]  }
 0x427   :  { %7677 = vmatpush1.bf16.msra.mxu1 %v8935_v3  ;;  %v9024_v3 = vld [vmem:[%s11447_s4 + $0xc24] ss:$8 sps:$4 sm:$0xff]  }
 0x428   :  { %7678 = vmatprep.subr.bf16.mxu1 %v8943_v5 }
 0x429   :  { %7718 = vmatpush1.bf16.msra.mxu0 %v8938_v27  ;;  %v9059_v27 = vmov 0  }
 0x42a   :  { %7719 = vmatprep.subr.bf16.mxu0 %v8946_v53 }
 0x42b   :  { %7679 = vmatpush1.bf16.msra.mxu1 %v8941_v19  ;;  %v9027_v19 = vld [vmem:[%s11447_s4 + $0xc14] ss:$8 sps:$4 sm:$0xff]  }
 0x42c   :  { %7680 = vmatprep.subr.bf16.mxu1 %v8949_v9 }
 0x42d   :  { %7720 = vmatpush1.bf16.msra.mxu0 %v8944_v48 }
 0x42e   :  { %7721 = vmatprep.subr.bf16.mxu0 %v8952_v56 }
 0x42f   :  { %7681 = vmatpush1.bf16.msra.mxu1 %v8947_v44 }
 0x430   :  { %7682 = vmatprep.subr.bf16.mxu1 %v8955_v11  ;;  %v9025_v11 = vld [vmem:[%s11447_s4 + $0xc10] ss:$8 sps:$4 sm:$0xff]  }
 0x431   :  { %7722 = vmatpush1.bf16.msra.mxu0 %v8950_v10 }
 0x432   :  { %7723 = vmatprep.subr.bf16.mxu0 %v8958_v16 }
 0x433   :  { %7683 = vmatpush1.bf16.msra.mxu1 %v8953_v39  ;;  %v9030_v39 = vld [vmem:[%s11447_s4 + $0xc04] ss:$8 sps:$4 sm:$0xff]  }
 0x434   :  { %7684 = vmatprep.subr.bf16.mxu1 %v8961_v34 }
 0x435   :  { %7724 = vmatpush1.bf16.msra.mxu0 %v8956_v6  ;;  %v7861_v6 = vld.sshfl [vmem:[#allocation3 + $0x18] sm:$0x1 pattern:$0x75316420] }
 0x436   :  { %7725 = vmatprep.subr.bf16.mxu0 %v8964_v57  ;;  %v5274_v57 = vrot.slane %v7861_v6, %v9342_v23 }
 0x437   :  { %7685 = vmatpush1.bf16.msra.mxu1 %v8959_v36 }
 0x438   :  { %7686 = vmatprep.subr.bf16.mxu1 %v8967_v17 }
 0x439   :  { %7726 = vmatpush1.bf16.msra.mxu0 %v8962_v22 }
 0x43a   :  { %7727 = vmatprep.subr.bf16.mxu0 %v8970_v42 }
 0x43b   :  { %7687 = vmatpush1.bf16.msra.mxu1 %v8965_v35 }
 0x43c   :  { %7688 = vmatprep.subr.bf16.mxu1 %v8973_v60 }
 0x43d   :  { %7728 = vmatpush1.bf16.msra.mxu0 %v8968_v51 }
 0x43e   :  { %7729 = vmatprep.subr.bf16.mxu0 %v8976_v12 }
 0x43f   :  { %7689 = vmatpush2.bf16.msra.mxu1 %v8971_v24 }
 0x440   :  { %7690 = vmatprep.subr.bf16.mxu1 %v8979_v14 }
 0x441   :  { %7730 = vmatpush2.bf16.msra.mxu0 %v8974_v21 }
 0x442   :  { %7731 = vmatprep.subr.bf16.mxu0 %v8982_v63 }
 0x443   :  { %7691 = vmatpush2.bf16.msra.mxu1 %v8977_v61 }
 0x444   :  { %7692 = vmatprep.subr.bf16.mxu1 %v8985_v4 }
 0x445   :  { %7732 = vmatpush2.bf16.msra.mxu0 %v8980_v31 }
 0x446   :  { %7733 = vmatprep.subr.bf16.mxu0 %v8988_v20 }
 0x447   :  { %7693 = vmatpush2.bf16.msra.mxu1 %v8983_v29 }
 0x448   :  { %7694 = vmatprep.subr.bf16.mxu1 %v8991_v40 }
 0x449   :  { %7734 = vmatpush2.bf16.msra.mxu0 %v8986_v50 }
 0x44a   :  { %7735 = vmatprep.subr.bf16.mxu0 %v8994_v45 }
 0x44b   :  { %7695 = vmatpush2.bf16.msra.mxu1 %v8989_v15 }
 0x44c   :  { %7696 = vmatprep.subr.bf16.mxu1 %v8997_v32 }
 0x44d   :  { %7736 = vmatpush2.bf16.msra.mxu0 %v8992_v25 }
 0x44e   :  { %7737 = vmatprep.subr.bf16.mxu0 %v9000_v46 }
 0x44f   :  { %7697 = vmatpush2.bf16.msra.mxu1 %v8995_v49 }
 0x450   :  { %7698 = vmatprep.subr.bf16.mxu1 %v9003_v13 }
 0x451   :  { %7738 = vmatpush2.bf16.msra.mxu0 %v8998_v38 }
 0x452   :  { %7739 = vmatprep.subr.bf16.mxu0 %v9006_v7 }
 0x453   :  { %7699 = vmatpush2.bf16.msra.mxu1 %v9001_v41 }
 0x454   :  { %7700 = vmatprep.subr.bf16.mxu1 %v9009_v52 }
 0x455   :  { %7740 = vmatpush2.bf16.msra.mxu0 %v9004_v59 }
 0x456   :  { %7741 = vmatprep.subr.bf16.mxu0 %v9012_v62 }
 0x457   :  { %7701 = vmatpush2.bf16.msra.mxu1 %v9007_v30 }
 0x458   :  { %7702 = vmatprep.subr.bf16.mxu1 %v9015_v33 }
 0x459   :  { %7742 = vmatpush2.bf16.msra.mxu0 %v9010_v2 }
 0x45a   :  { %7743 = vmatprep.subr.bf16.mxu0 %v9018_v18 }
 0x45b   :  { %7703 = vmatpush2.bf16.msra.mxu1 %v9013_v0 }
 0x45c   :  { %7762 = vmatprep.subr.bf16.mxu1 %v9021_v58 }
 0x45d   :  { %7744 = vmatpush2.bf16.msra.mxu0 %v9016_v55 }
 0x45e   :  { %v7460_v47 = vpop.f32.mrf.mxu1  ;;  %7705 = vmatmul.mubr.bf16.vlgmr.msra.gmra.mxu1 %v5242_v8 }
 0x45f   :  { %v7461_v5 = vadd.f32 %v7460_v47, %v11238_v54  ;;  %7763 = vmatpush1.bf16.msra.mxu1 %v9019_v43  ;;  %7786 = vmatprep.mubr.bf16.mxu1 %v9059_v27 }
 0x460   :  { %v7462_v26 = vpop.f32.mrf.mxu1  ;;  %v7501_v53 = vpop.f32.mrf.mxu0  ;;  %7746 = vmatmul.mubr.bf16.vlgmr.msra.gmra.mxu0 %v5258_v37  ;;  %7764 = vmatprep.subr.bf16.mxu1 %v9024_v3 }
 0x461   :  { %v7463_v9 = vadd.f32 %v7462_v26, %v11246_v28  ;;  %v7502_v48 = vadd.f32 %v7501_v53, %v7461_v5  ;;  %v9028_v28 = vld [vmem:[%s11447_s4 + $0xc00] ss:$8 sps:$4 sm:$0xff]   ;;  %s9060_s4 = smov [#allocation4]  }
 0x462   :  { %v7464_v56 = vpop.f32.mrf.mxu1  ;;  %v7503_v54 = vpop.f32.mrf.mxu0  ;;  %s7813_s3 = sshll.u32 %s9060_s4, 4  ;;  %s7814_s3 = int_to_ptr.vmem [resolvable:$true] %s7813_s3 }
 0x463   :  { %v7504_v44 = vadd.f32 %v7503_v54, %v7463_v9  ;;  %7765 = vmatpush1.bf16.msra.mxu1 %v9022_v1  ;;  %s9032_s28 = scalar_lea.vmem %s7814_s3, 64  ;;  %p9037_p1 = scmp.lt.s32.totalorder %s7814_s3, %s7814_s3 }
 0x464   :  { %v7465_v10 = vpop.f32.mrf.mxu1  ;;  %v7505_v16 = vpop.f32.mrf.mxu0  ;;  %7766 = vmatprep.subr.bf16.mxu1 %v9027_v19  ;;  %p9033_p0 = scmp.ne.s32.totalorder %s7814_s3, %s9032_s28  ;;  %p9038_p2 = scmp.lt.s32.totalorder %s9032_s28, %s9032_s28 }
 0x466   :  { %v7506_v34 = vpop.f32.mrf.mxu0  ;;  %p9039_p3 = por %p9038_p2, %p9037_p1 }
 0x467   :  { %7767 = vmatpush1.bf16.msra.mxu1 %v9025_v11 }
 0x468   :  { %7768 = vmatprep.subr.bf16.mxu1 %v9030_v39  ;;  %p9040_p4 = pnand %p9039_p3, %p9033_p0 }
 0x46b   :  { %7769 = vmatpush1.bf16.msra.mxu1 %v9028_v28 }
 0x46e   :  { %8254 = vmatmul.mubr.msk.bf16.vlgmr.msra.gmra.mxu1 %vm40_vm2, %v5274_v57 }
 0x49e   :  { %v7542_v36 = vpop.f32.mrf.mxu1 }
 0x49f   :  { %v7543_v17 = vadd.f32 %v7542_v36, %v7502_v48 }
 0x4a0   :  { %v7544_v22 = vpop.f32.mrf.mxu1  ;;  %v7583_v42 = vpop.f32.mrf.mxu0 }
 0x4a1   :  { %v7545_v35 = vadd.f32 %v7544_v22, %v7504_v44  ;;  %v7584_v60 = vadd.f32 %v7583_v42, %v7543_v17 }
 0x4a2   :  { %v7546_v51 = vpop.f32.mrf.mxu1  ;;  %v7585_v12 = vpop.f32.mrf.mxu0 }
 0x4a3   :  { %v7586_v24 = vadd.f32 %v7585_v12, %v7545_v35 }
 0x4a4   :  { %v7547_v14 = vpop.f32.mrf.mxu1  ;;  %v7587_v21 = vpop.f32.mrf.mxu0 }
 0x4a6   :  { %v7588_v63 = vpop.f32.mrf.mxu0 }
 0x4de   :  { %v7624_v61 = vpop.f32.mrf.mxu1 }
 0x4df   :  { %v7625_v4 = vadd.f32 %v7624_v61, %v7584_v60 }
 0x4e0   :  { %v7626_v31 = vpop.f32.mrf.mxu1  ;;  %v7665_v20 = vpop.f32.mrf.mxu0 }
 0x4e1   :  { %v7627_v29 = vadd.f32 %v7626_v31, %v7586_v24  ;;  %v7666_v23 = vadd.f32 %v7665_v20, %v7625_v4 }
 0x4e2   :  { %v7628_v40 = vpop.f32.mrf.mxu1  ;;  %v7667_v50 = vpop.f32.mrf.mxu0 }
 0x4e3   :  { %v7668_v45 = vadd.f32 %v7667_v50, %v7627_v29 }
 0x4e4   :  { %v7629_v15 = vpop.f32.mrf.mxu1  ;;  %v7669_v32 = vpop.f32.mrf.mxu0 }
 0x4e6   :  { %v7670_v25 = vpop.f32.mrf.mxu0 }
 0x51e   :  { %v7706_v46 = vpop.f32.mrf.mxu1 }
 0x51f   :  { %v7707_v62 = vadd.f32 %v7706_v46, %v7666_v23 }
 0x520   :  { %v7708_v49 = vpop.f32.mrf.mxu1  ;;  %v7747_v13 = vpop.f32.mrf.mxu0 }
 0x521   :  { %v7709_v30 = vadd.f32 %v7708_v49, %v7668_v45  ;;  %v7748_v2 = vadd.f32 %v7747_v13, %v7707_v62 }
 0x522   :  { %v7710_v38 = vpop.f32.mrf.mxu1  ;;  %v7749_v7 = vpop.f32.mrf.mxu0 }
 0x523   :  { %v7750_v18 = vadd.f32 %v7749_v7, %v7709_v30 }
 0x524   :  { %v7711_v41 = vpop.f32.mrf.mxu1  ;;  %v7751_v52 = vpop.f32.mrf.mxu0 }
 0x526   :  { %v7752_v59 = vpop.f32.mrf.mxu0 }
 0x52e   :  { %v7788_v33 = vpop.f32.mrf.mxu1 }
 0x52f   :  { %v7789_v58 = vadd.f32 %v7788_v33, %v7748_v2 }
 0x530   :  { %v7790_v0 = vpop.f32.mrf.mxu1 }
 0x531   :  { %v7791_v55 = vadd.f32 %v7790_v0, %v7750_v18 }
 0x532   :  { %v7792_v8 = vpop.f32.mrf.mxu1 }
 0x533   :  { %v7797_v43 = vcombine.low %v7789_v58, %v7791_v55 }
 0x534   :  { %v7793_v3 = vpop.f32.mrf.mxu1 }
 0x535   :  { %8255 = vst.sshfl [vmem:[#allocation4] sm:$0x33 pattern:$0x76325410] %v7797_v43 }
 0x536   :  { %9043 = shalt.err (!%p9040_p4)
}
 0x537   :  { %7816 = dma.vmem_to_hbm [thread:$0]  %s7814_s3, 64, %s11449_s6, [#allocation5]  }
 0x538   :  { %9052 = dma.done.wait [#allocation5], 64  }
 0x539   :  { %9053 = vsyncadd [#allocation5], 4294967232 }
 0x53a   :  { %7820 = vsyncpa [#allocation5], 1 }

</bundles_post_ra>
